<compile_context>
chip_gen: v7x
topology: tpu7x:2x2x1
jax: 0.10.0
libtpu: 0.0.40
codegen_flags: <defaults>
</compile_context>

<pallas_src>
import jax
import jax.numpy as jnp
import numpy as np
from jax.experimental import pallas as pl
from jax.experimental.pallas import tpu as pltpu

_LANE = 128   # lane alignment for every K / N dim
_SUB = 16     # bf16 sublane tile: batch (M) rounded up to this


def _round_up(x, m):
    return ((x + m - 1) // m) * m


# ----------------------------------------------------------------------------
# Fused forward kernel: 5 x (matmul + bias + activation), all VMEM-resident.
# ----------------------------------------------------------------------------
def _generator_fused_kernel(z_ref,
                            w1_ref, b1_ref, w2_ref, b2_ref, w3_ref, b3_ref,
                            w4_ref, b4_ref, w5_ref, b5_ref,
                            o_ref):
    def layer(a, w_ref, b_ref, act):
        # bf16 operands feed the MXU; accumulate + epilogue in f32.
        r = jnp.dot(a.astype(jnp.bfloat16), w_ref[...],
                    preferred_element_type=jnp.float32)
        r = r + b_ref[...]                      # (1, N) bias broadcasts over rows
        if act == "relu":
            r = jnp.maximum(r, 0.0)
        elif act == "sigmoid":
            r = jax.nn.sigmoid(r)
        return r

    h = layer(z_ref[...], w1_ref, b1_ref, "none")      # Generator.fc3
    h = layer(h, w2_ref, b2_ref, "relu")               # Net3 fc1
    h = layer(h, w3_ref, b3_ref, "relu")               # Net3 fc2
    h = layer(h, w4_ref, b4_ref, "relu")               # deconv1 (k4,s2,p1) as matmul
    o_ref[...] = layer(h, w5_ref, b5_ref, "sigmoid")   # deconv2 (k3,s1)   as matmul


# ----------------------------------------------------------------------------
# One-time weight prepack: deconvs -> dense matmul matrices, aligned + bf16.
# ----------------------------------------------------------------------------
def _unroll_deconv_to_matmul(w, b, H, W, stride, padding):
    """Lower a PyTorch ConvTranspose2d (weight (Cin,Cout,KH,KW)) acting on a
    (Cin, H, W) map into a dense matmul:
        y[n, co*Hout*Wout + oh*Wout + ow] = (x_flat @ W_eff + b_eff)[n, ...]
    with x_flat[n, ci*H*W + ih*W + iw] = x[n, ci, ih, iw].
    Done once on weights; at run time the deconv is a single MXU matmul."""
    Cin, Cout, KH, KW = w.shape
    Hout = (H - 1) * stride - 2 * padding + KH
    Wout = (W - 1) * stride - 2 * padding + KW

    ci, ih, iw, co, kh, kw = np.meshgrid(
        np.arange(Cin), np.arange(H), np.arange(W),
        np.arange(Cout), np.arange(KH), np.arange(KW), indexing="ij")
    oh = ih * stride - padding + kh
    ow = iw * stride - padding + kw
    valid = (oh >= 0) & (oh < Hout) & (ow >= 0) & (ow < Wout)

    rows = (ci * (H * W) + ih * W + iw)[valid]
    cols = (co * (Hout * Wout) + oh * Wout + ow)[valid]
    vals = w[ci[valid], co[valid], kh[valid], kw[valid]].astype(jnp.float32)

    w_eff = jnp.zeros((Cin * H * W, Cout * Hout * Wout), jnp.float32)
    w_eff = w_eff.at[rows, cols].add(vals)
    b_eff = jnp.repeat(b.astype(jnp.float32), Hout * Wout)
    return w_eff, b_eff, (Cout, Hout, Wout)


def _pad2d(x, rows, cols):
    return jnp.pad(x, ((0, rows - x.shape[0]), (0, cols - x.shape[1])))


def prepack_generator_params(params, args, s0=5):
    """Weight-only transformation for the fused kernel:
       * deconv1/deconv2 -> dense matmul matrices,
       * every (K, N) zero-padded to multiples of 128 (lane-aligned single-shot
         matmuls; padded rows/cols are zeros so results are unchanged),
       * weights cast to bf16, biases kept f32 as (1, N) rows."""
    w1, b1 = params["fc3"]
    w2, b2 = params["dec_fc1"]
    w3, b3 = params["dec_fc2"]
    w4, b4, (c1, h1, wd1) = _unroll_deconv_to_matmul(
        *params["deconv1"], H=s0, W=s0, stride=2, padding=1)
    w5, b5, (c2, h2, wd2) = _unroll_deconv_to_matmul(
        *params["deconv2"], H=h1, W=wd1, stride=1, padding=0)

    ws, bs = [], []
    for w, b in ((w1, b1), (w2, b2), (w3, b3), (w4, b4), (w5, b5)):
        k, n = w.shape
        kp, np_ = _round_up(k, _LANE), _round_up(n, _LANE)
        ws.append(_pad2d(w.astype(jnp.float32), kp, np_).astype(jnp.bfloat16))
        bs.append(_pad2d(b.astype(jnp.float32).reshape(1, n), 1, np_))

    meta = dict(
        in_dim=args.h_dim,
        in_dim_padded=ws[0].shape[0],
        out_chw=(c2, h2, wd2),
        out_dim=c2 * h2 * wd2,
        out_dim_padded=ws[-1].shape[1],
    )
    return ws, bs, meta


# ----------------------------------------------------------------------------
# Generator forward:  recon = decoder(fc3(z.view(-1, h_dim)))  (one pallas_call)
# ----------------------------------------------------------------------------
def generator_forward(packed, z):
    ws, bs, meta = packed
    z2 = z.reshape(-1, meta["in_dim"]).astype(jnp.float32)
    m = z2.shape[0]
    mp = _round_up(m, _SUB)
    zp = jnp.pad(z2, ((0, mp - m), (0, meta["in_dim_padded"] - meta["in_dim"])))

    vmem = pl.BlockSpec(memory_space=pltpu.MemorySpace.VMEM)
    out = pl.pallas_call(
        _generator_fused_kernel,
        out_shape=jax.ShapeDtypeStruct((mp, meta["out_dim_padded"]), jnp.float32),
        in_specs=[vmem] * 11,
        out_specs=vmem,
        compiler_params=pltpu.CompilerParams(
            vmem_limit_bytes=32 * 1024 * 1024),
    )(zp, ws[0], bs[0], ws[1], bs[1], ws[2], bs[2], ws[3], bs[3], ws[4], bs[4])

    c, hh, ww = meta["out_chw"]
    return out[:m, :meta["out_dim"]].reshape(m, c, hh, ww)


# ----------------------------------------------------------------------------
# Deterministic parameter init (shapes follow the module's __init__)
# ----------------------------------------------------------------------------
class Args:
    h_dim = 32
    x_fdim1 = 128
    x_fdim2 = 64


def init_params(key, args, nChannels=1, s0=5):
    ks = jax.random.split(key, 12)

    def lin(kw, kb, fan_in, fan_out):
        bound = 1.0 / np.sqrt(fan_in)
        return (jax.random.uniform(kw, (fan_in, fan_out), jnp.float32, -bound, bound),
                jax.random.uniform(kb, (fan_out,), jnp.float32, -bound, bound))

    def deconv(kw, kb, cin, cout, k):
        bound = 1.0 / np.sqrt(cin * k * k)
        return (jax.random.uniform(kw, (cin, cout, k, k), jnp.float32, -bound, bound),
                jax.random.uniform(kb, (cout,), jnp.float32, -bound, bound))

    p = {}
    p["fc3"] = lin(ks[0], ks[1], args.h_dim, args.x_fdim2)         # Generator.fc3
    p["dec_fc1"] = lin(ks[2], ks[3], args.x_fdim2, args.x_fdim1)   # Net3
    p["dec_fc2"] = lin(ks[4], ks[5], args.x_fdim1, 32 * s0 * s0)   # Net3
    p["deconv1"] = deconv(ks[6], ks[7], 32, 16, 4)                 # k4 s2 p1
    p["deconv2"] = deconv(ks[8], ks[9], 16, nChannels, 3)          # k3 s1 p0
    return p


# ----------------------------------------------------------------------------
# Pure-JAX reference (PyTorch semantics) for correctness checking
# ----------------------------------------------------------------------------
def _bf16_round(x):
    return x.astype(jnp.bfloat16).astype(jnp.float32)


def _ref_linear(x, w, b, act, round_fn):
    r = round_fn(x) @ round_fn(w) + b
    if act == "relu":
        r = jnp.maximum(r, 0.0)
    elif act == "sigmoid":
        r = jax.nn.sigmoid(r)
    return r


def _ref_conv_transpose2d(x, w, b, stride, padding, act, round_fn):
    """PyTorch ConvTranspose2d semantics (scatter-add form), pure jnp/XLA."""
    N, Cin, H, W = x.shape
    _, Cout, KH, KW = w.shape
    Hout = (H - 1) * stride - 2 * padding + KH
    Wout = (W - 1) * stride - 2 * padding + KW
    xr, wr = round_fn(x), round_fn(w)
    full = jnp.zeros((N, Cout, (H - 1) * stride + KH, (W - 1) * stride + KW),
                     jnp.float32)
    for i in range(KH):
        for j in range(KW):
            contrib = jnp.einsum("nchw,cd->ndhw", xr, wr[:, :, i, j])
            full = full.at[:, :, i:i + (H - 1) * stride + 1:stride,
                                 j:j + (W - 1) * stride + 1:stride].add(contrib)
    out = full[:, :, padding:padding + Hout, padding:padding + Wout]
    out = out + b.reshape(1, Cout, 1, 1)
    if act == "relu":
        out = jnp.maximum(out, 0.0)
    elif act == "sigmoid":
        out = jax.nn.sigmoid(out)
    return out


def generator_forward_ref(params, z, args, s0=5, round_fn=lambda x: x):
    z = z.reshape(-1, args.h_dim).astype(jnp.float32)
    h = _ref_linear(z, *params["fc3"], act="none", round_fn=round_fn)
    h = _ref_linear(h, *params["dec_fc1"], act="relu", round_fn=round_fn)
    h = _ref_linear(h, *params["dec_fc2"], act="relu", round_fn=round_fn)
    h = h.reshape(-1, 32, s0, s0)
    h = _ref_conv_transpose2d(h, *params["deconv1"], stride=2, padding=1,
                              act="relu", round_fn=round_fn)
    return _ref_conv_transpose2d(h, *params["deconv2"], stride=1, padding=0,
                                 act="sigmoid", round_fn=round_fn)


if __name__ == "__main__":
    args = Args()
    key = jax.random.PRNGKey(0)
    kp, kz = jax.random.split(key)

    params = init_params(kp, args, nChannels=1, s0=5)
    packed = prepack_generator_params(params, args, s0=5)   # one-time prepack

    z = jax.random.normal(kz, (2, args.h_dim), dtype=jnp.float32)  # batch=2, h_dim=32

    recon = generator_forward(packed, z)
    recon = jax.block_until_ready(recon)
    assert recon.shape == (2, 1, 12, 12), recon.shape

    # Tight check vs a reference with identical bf16 operand rounding.
    ref_bf16 = generator_forward_ref(params, z, args, round_fn=_bf16_round)
    np.testing.assert_allclose(np.asarray(recon), np.asarray(ref_bf16),
                               rtol=1e-3, atol=1e-3)
    # Sanity check vs the pure-f32 PyTorch-semantics reference.
    ref_f32 = generator_forward_ref(params, z, args)
    np.testing.assert_allclose(np.asarray(recon), np.asarray(ref_f32),
                               rtol=2e-2, atol=2e-2)
    print("KERNEL_OK")
</pallas_src>

<mosaic_0001>
module attributes {stable_mosaic.version = 11 : i64} {
  func.func @_generator_fused_kernel(%arg0: memref<16x128xf32, #tpu.memory_space<vmem>>, %arg1: memref<128x128xbf16, #tpu.memory_space<vmem>>, %arg2: memref<1x128xf32, #tpu.memory_space<vmem>>, %arg3: memref<128x128xbf16, #tpu.memory_space<vmem>>, %arg4: memref<1x128xf32, #tpu.memory_space<vmem>>, %arg5: memref<128x896xbf16, #tpu.memory_space<vmem>>, %arg6: memref<1x896xf32, #tpu.memory_space<vmem>>, %arg7: memref<896x1664xbf16, #tpu.memory_space<vmem>>, %arg8: memref<1x1664xf32, #tpu.memory_space<vmem>>, %arg9: memref<1664x256xbf16, #tpu.memory_space<vmem>>, %arg10: memref<1x256xf32, #tpu.memory_space<vmem>>, %arg11: memref<16x256xf32, #tpu.memory_space<vmem>>) attributes {dimension_semantics = [], scalar_prefetch = 0 : i64, scratch_operands = 0 : i64, tpu.core_type = #tpu.core_type<tc>} {
    %c0 = arith.constant 0 : index
    %c0_0 = arith.constant 0 : index
    %0 = vector.load %arg0[%c0, %c0_0] : memref<16x128xf32, #tpu.memory_space<vmem>>, vector<16x128xf32>
    %1 = arith.truncf %0 : vector<16x128xf32> to vector<16x128xbf16>
    %c0_1 = arith.constant 0 : index
    %c0_2 = arith.constant 0 : index
    %2 = vector.load %arg1[%c0_1, %c0_2] : memref<128x128xbf16, #tpu.memory_space<vmem>>, vector<128x128xbf16>
    %cst = arith.constant dense<0.000000e+00> : vector<16x128xf32>
    %3 = tpu.matmul %1, %2, %cst {dimension_numbers = #tpu.dot_dimension_numbers<[1], [0], [0], [1], [0, 0, 1, 1], [], []>} : vector<16x128xbf16>, vector<128x128xbf16>, vector<16x128xf32> -> vector<16x128xf32>
    %c0_3 = arith.constant 0 : index
    %c0_4 = arith.constant 0 : index
    %4 = vector.load %arg2[%c0_3, %c0_4] : memref<1x128xf32, #tpu.memory_space<vmem>>, vector<1x128xf32>
    %5 = vector.broadcast %4 : vector<1x128xf32> to vector<16x128xf32>
    %6 = arith.addf %3, %5 : vector<16x128xf32>
    %7 = arith.truncf %6 : vector<16x128xf32> to vector<16x128xbf16>
    %c0_5 = arith.constant 0 : index
    %c0_6 = arith.constant 0 : index
    %8 = vector.load %arg3[%c0_5, %c0_6] : memref<128x128xbf16, #tpu.memory_space<vmem>>, vector<128x128xbf16>
    %cst_7 = arith.constant dense<0.000000e+00> : vector<16x128xf32>
    %9 = tpu.matmul %7, %8, %cst_7 {dimension_numbers = #tpu.dot_dimension_numbers<[1], [0], [0], [1], [0, 0, 1, 1], [], []>} : vector<16x128xbf16>, vector<128x128xbf16>, vector<16x128xf32> -> vector<16x128xf32>
    %c0_8 = arith.constant 0 : index
    %c0_9 = arith.constant 0 : index
    %10 = vector.load %arg4[%c0_8, %c0_9] : memref<1x128xf32, #tpu.memory_space<vmem>>, vector<1x128xf32>
    %11 = vector.broadcast %10 : vector<1x128xf32> to vector<16x128xf32>
    %12 = arith.addf %9, %11 : vector<16x128xf32>
    %cst_10 = arith.constant 0.000000e+00 : f32
    %13 = vector.broadcast %cst_10 : f32 to vector<16x128xf32>
    %14 = arith.maximumf %12, %13 : vector<16x128xf32>
    %15 = arith.truncf %14 : vector<16x128xf32> to vector<16x128xbf16>
    %c0_11 = arith.constant 0 : index
    %c0_12 = arith.constant 0 : index
    %16 = vector.load %arg5[%c0_11, %c0_12] : memref<128x896xbf16, #tpu.memory_space<vmem>>, vector<128x896xbf16>
    %cst_13 = arith.constant dense<0.000000e+00> : vector<16x896xf32>
    %17 = tpu.matmul %15, %16, %cst_13 {dimension_numbers = #tpu.dot_dimension_numbers<[1], [0], [0], [1], [0, 0, 1, 1], [], []>} : vector<16x128xbf16>, vector<128x896xbf16>, vector<16x896xf32> -> vector<16x896xf32>
    %c0_14 = arith.constant 0 : index
    %c0_15 = arith.constant 0 : index
    %18 = vector.load %arg6[%c0_14, %c0_15] : memref<1x896xf32, #tpu.memory_space<vmem>>, vector<1x896xf32>
    %19 = vector.broadcast %18 : vector<1x896xf32> to vector<16x896xf32>
    %20 = arith.addf %17, %19 : vector<16x896xf32>
    %cst_16 = arith.constant 0.000000e+00 : f32
    %21 = vector.broadcast %cst_16 : f32 to vector<16x896xf32>
    %22 = arith.maximumf %20, %21 : vector<16x896xf32>
    %23 = arith.truncf %22 : vector<16x896xf32> to vector<16x896xbf16>
    %c0_17 = arith.constant 0 : index
    %c0_18 = arith.constant 0 : index
    %24 = vector.load %arg7[%c0_17, %c0_18] : memref<896x1664xbf16, #tpu.memory_space<vmem>>, vector<896x1664xbf16>
    %cst_19 = arith.constant dense<0.000000e+00> : vector<16x1664xf32>
    %25 = tpu.matmul %23, %24, %cst_19 {dimension_numbers = #tpu.dot_dimension_numbers<[1], [0], [0], [1], [0, 0, 1, 1], [], []>} : vector<16x896xbf16>, vector<896x1664xbf16>, vector<16x1664xf32> -> vector<16x1664xf32>
    %c0_20 = arith.constant 0 : index
    %c0_21 = arith.constant 0 : index
    %26 = vector.load %arg8[%c0_20, %c0_21] : memref<1x1664xf32, #tpu.memory_space<vmem>>, vector<1x1664xf32>
    %27 = vector.broadcast %26 : vector<1x1664xf32> to vector<16x1664xf32>
    %28 = arith.addf %25, %27 : vector<16x1664xf32>
    %cst_22 = arith.constant 0.000000e+00 : f32
    %29 = vector.broadcast %cst_22 : f32 to vector<16x1664xf32>
    %30 = arith.maximumf %28, %29 : vector<16x1664xf32>
    %31 = arith.truncf %30 : vector<16x1664xf32> to vector<16x1664xbf16>
    %c0_23 = arith.constant 0 : index
    %c0_24 = arith.constant 0 : index
    %32 = vector.load %arg9[%c0_23, %c0_24] : memref<1664x256xbf16, #tpu.memory_space<vmem>>, vector<1664x256xbf16>
    %cst_25 = arith.constant dense<0.000000e+00> : vector<16x256xf32>
    %33 = tpu.matmul %31, %32, %cst_25 {dimension_numbers = #tpu.dot_dimension_numbers<[1], [0], [0], [1], [0, 0, 1, 1], [], []>} : vector<16x1664xbf16>, vector<1664x256xbf16>, vector<16x256xf32> -> vector<16x256xf32>
    %c0_26 = arith.constant 0 : index
    %c0_27 = arith.constant 0 : index
    %34 = vector.load %arg10[%c0_26, %c0_27] : memref<1x256xf32, #tpu.memory_space<vmem>>, vector<1x256xf32>
    %35 = vector.broadcast %34 : vector<1x256xf32> to vector<16x256xf32>
    %36 = arith.addf %33, %35 : vector<16x256xf32>
    %37 = arith.negf %36 : vector<16x256xf32>
    %38 = math.exp %37 : vector<16x256xf32>
    %cst_28 = arith.constant 1.000000e+00 : f32
    %39 = vector.broadcast %cst_28 : f32 to vector<16x256xf32>
    %40 = arith.addf %39, %38 : vector<16x256xf32>
    %41 = arith.divf %39, %40 : vector<16x256xf32>
    %c0_29 = arith.constant 0 : index
    %c0_30 = arith.constant 0 : index
    %42 = vector.load %arg11[%c0_29, %c0_30] : memref<16x256xf32, #tpu.memory_space<vmem>>, vector<16x256xf32>
    tpu.vector_store %arg11[%c0_29, %c0_30], %41 {strides = array<i32>} : memref<16x256xf32, #tpu.memory_space<vmem>>, vector<16x256xf32>,
    return
  }
}

</mosaic_0001>

<bundles_post_ra>
// kernel: tpu_custom_call.1
= control target key start
LH: loop header
LB: loop body
LE: loop exit
PB: predicated region body
PF: predicated region fallthrough
CT: control target
= control target key end

     0   :  { %16 = vsyncpa [#allocation3], 0  ;;  %s11963_s0 = inlined_call_operand.hbm [shape: f32[16,128], index: 0, kind: input, shape index: {}]   ;;  %s11964_s1 = inlined_call_operand.hbm [shape: bf16[128,128], index: 1, kind: input, shape index: {}]   ;;  %s11965_s2 = inlined_call_operand.hbm [shape: f32[1,128], index: 2, kind: input, shape index: {}]   ;;  %s11966_s3 = inlined_call_operand.hbm [shape: bf16[128,128], index: 3, kind: input, shape index: {}]   ;;  %s11967_s4 = inlined_call_operand.hbm [shape: f32[1,128], index: 4, kind: input, shape index: {}]   ;;  %s11968_s5 = inlined_call_operand.hbm [shape: bf16[128,896], index: 5, kind: input, shape index: {}]   ;;  %s11969_s6 = inlined_call_operand.hbm [shape: f32[1,896], index: 6, kind: input, shape index: {}]   ;;  %s11970_s7 = inlined_call_operand.hbm [shape: bf16[896,1664], index: 7, kind: input, shape index: {}]   ;;  %s11971_s8 = inlined_call_operand.hbm [shape: f32[1,1664], index: 8, kind: input, shape index: {}]   ;;  %s11972_s9 = inlined_call_operand.hbm [shape: bf16[1664,256], index: 9, kind: input, shape index: {}]   ;;  %s11973_s10 = inlined_call_operand.hbm [shape: f32[1,256], index: 10, kind: input, shape index: {}]   ;;  %s11974_s11 = inlined_call_operand.hbm [shape: f32[16,256], index: 11, kind: output, shape index: {}]  }
   0x1   :  { %17 = vsyncpa [#allocation6], 0 }
   0x2   :  { %18 = vsyncpa [#allocation9], 0 }
   0x3   :  { %19 = vsyncpa [#allocation12], 0 }
   0x4   :  { %20 = vsyncpa [#allocation15], 0 }
   0x5   :  { %21 = vsyncpa [#allocation18], 0 }
   0x6   :  { %22 = vsyncpa [#allocation4], 0  ;;  %s11497_s17 = smov [#allocation5]   ;;  %s11219_s21 = scalar_lea.hbm %s11964_s1, 1024 }
   0x7   :  { %s40_s18 = sshll.u32 %s11497_s17, 4  ;;  %p11220_p0 = scmp.ne.s32.totalorder %s11964_s1, %s11219_s21  ;;  %s41_s18 = int_to_ptr.vmem [resolvable:$true] %s40_s18 }
   0x8   :  { %p11223_p1 = scmp.lt.u32.totalorder %s11219_s21, %s11964_s1 }
   0xa   :  { %p11225_p2 = pnand %p11223_p1, %p11220_p0 }
   0xc   :  { %11228 = shalt.err (!%p11225_p2)
}
   0xd   :  { %s11229_s26 = scalar_lea.vmem %s41_s18, 1024  ;;  %p11234_p4 = scmp.lt.s32.totalorder %s41_s18, %s41_s18 }
   0xe   :  { %p11230_p3 = scmp.ne.s32.totalorder %s41_s18, %s11229_s26  ;;  %p11235_p5 = scmp.lt.s32.totalorder %s11229_s26, %s11229_s26 }
  0x10   :  { %p11236_p6 = por %p11235_p5, %p11234_p4 }
  0x12   :  { %p11237_p7 = pnand %p11236_p6, %p11230_p3 }
  0x14   :  { %11240 = shalt.err (!%p11237_p7)
}
  0x15   :  { %s11498_s27 = smov 64   ;;  %s11499_s28 = smov 4  }
  0x16   :  { %46 = dma.hbm_to_vmem [thread:$0]  %s11964_s1, 1024, %s41_s18, [#allocation6], %s11498_s27, %s11498_s27, %s11499_s28  }
  0x17   :  { %s11500_s12 = smov [#allocation8]   ;;  %s11501_s14 = smov [#allocation11]  }
  0x18   :  { %s62_s13 = sshll.u32 %s11500_s12, 4  ;;  %s84_s15 = sshll.u32 %s11501_s14, 4  ;;  %s63_s13 = int_to_ptr.vmem [resolvable:$true] %s62_s13  ;;  %s85_s15 = int_to_ptr.vmem [resolvable:$true] %s84_s15 }
  0x19   :  { %s11241_s19 = scalar_lea.hbm %s11966_s3, 1024 }
  0x1a   :  { %p11242_p8 = scmp.ne.s32.totalorder %s11966_s3, %s11241_s19  ;;  %p11245_p9 = scmp.lt.u32.totalorder %s11241_s19, %s11966_s3 }
  0x1c   :  { %p11247_p10 = pnand %p11245_p9, %p11242_p8 }
  0x1e   :  { %11250 = shalt.err (!%p11247_p10)
}
  0x1f   :  { %s11251_s1 = scalar_lea.vmem %s63_s13, 1024  ;;  %p11256_p12 = scmp.lt.s32.totalorder %s63_s13, %s63_s13 }
  0x20   :  { %p11252_p11 = scmp.ne.s32.totalorder %s63_s13, %s11251_s1  ;;  %p11257_p13 = scmp.lt.s32.totalorder %s11251_s1, %s11251_s1 }
  0x22   :  { %p11258_p0 = por %p11257_p13, %p11256_p12 }
  0x24   :  { %p11259_p1 = pnand %p11258_p0, %p11252_p11 }
  0x26   :  { %11262 = shalt.err (!%p11259_p1)
}
  0x27   :  { %68 = dma.hbm_to_vmem [thread:$0]  %s11966_s3, 1024, %s63_s13, [#allocation9], %s11498_s27, %s11498_s27, %s11499_s28  }
  0x28   :  { %s11263_s29 = scalar_lea.hbm %s11968_s5, 7168 }
  0x29   :  { %p11264_p2 = scmp.ne.s32.totalorder %s11968_s5, %s11263_s29  ;;  %p11267_p3 = scmp.lt.u32.totalorder %s11263_s29, %s11968_s5 }
  0x2b   :  { %p11269_p4 = pnand %p11267_p3, %p11264_p2 }
  0x2d   :  { %11272 = shalt.err (!%p11269_p4)
}
  0x2e   :  { %s11273_s17 = scalar_lea.vmem %s85_s15, 7168  ;;  %p11278_p6 = scmp.lt.s32.totalorder %s85_s15, %s85_s15 }
  0x2f   :  { %p11274_p5 = scmp.ne.s32.totalorder %s85_s15, %s11273_s17  ;;  %p11279_p7 = scmp.lt.s32.totalorder %s11273_s17, %s11273_s17 }
  0x31   :  { %p11280_p8 = por %p11279_p7, %p11278_p6 }
  0x33   :  { %p11281_p9 = pnand %p11280_p8, %p11274_p5 }
  0x35   :  { %11284 = shalt.err (!%p11281_p9)
}
  0x36   :  { %s11502_s3 = smov 448   ;;  %s11503_s27 = smov 28  }
  0x37   :  { %90 = dma.hbm_to_vmem [thread:$0]  %s11968_s5, 7168, %s85_s15, [#allocation12], %s11502_s3, %s11502_s3, %s11503_s27  }
  0x38   :  { %s11504_s19 = smov [#allocation14]   ;;  %s11285_s23 = scalar_lea.hbm %s11970_s7, 93184 }
  0x39   :  { %s106_s20 = sshll.u32 %s11504_s19, 4  ;;  %p11286_p10 = scmp.ne.s32.totalorder %s11970_s7, %s11285_s23  ;;  %s107_s20 = int_to_ptr.vmem [resolvable:$true] %s106_s20 }
  0x3a   :  { %p11289_p11 = scmp.lt.u32.totalorder %s11285_s23, %s11970_s7 }
  0x3c   :  { %p11291_p12 = pnand %p11289_p11, %p11286_p10 }
  0x3e   :  { %11294 = shalt.err (!%p11291_p12)
}
  0x3f   :  { %s11295_s26 = scalar_lea.vmem %s107_s20, 93184  ;;  %p11300_p0 = scmp.lt.s32.totalorder %s107_s20, %s107_s20 }
  0x40   :  { %p11296_p13 = scmp.ne.s32.totalorder %s107_s20, %s11295_s26  ;;  %p11301_p1 = scmp.lt.s32.totalorder %s11295_s26, %s11295_s26 }
  0x42   :  { %p11302_p2 = por %p11301_p1, %p11300_p0 }
  0x44   :  { %p11303_p3 = pnand %p11302_p2, %p11296_p13 }
  0x46   :  { %11306 = shalt.err (!%p11303_p3)
}
  0x47   :  { %s11505_s5 = smov 832   ;;  %s11506_s15 = smov 52  }
  0x48   :  { %112 = dma.hbm_to_vmem [thread:$0]  %s11970_s7, 93184, %s107_s20, [#allocation15], %s11505_s5, %s11505_s5, %s11506_s15  }
  0x49   :  { %s11507_s12 = smov [#allocation17]   ;;  %s11508_s16 = smov [#allocation2]  }
  0x4a   :  { %s128_s14 = sshll.u32 %s11507_s12, 4  ;;  %s28_s17 = sshll.u32 %s11508_s16, 4  ;;  %s129_s14 = int_to_ptr.vmem [resolvable:$true] %s128_s14  ;;  %s11630_s17 = int_to_ptr.vmem [resolvable:$true] %s28_s17 }
  0x4b   :  { %s11307_s28 = scalar_lea.hbm %s11972_s9, 26624 }
  0x4c   :  { %p11308_p4 = scmp.ne.s32.totalorder %s11972_s9, %s11307_s28  ;;  %p11311_p5 = scmp.lt.u32.totalorder %s11307_s28, %s11972_s9 }
  0x4e   :  { %p11313_p6 = pnand %p11311_p5, %p11308_p4 }
  0x50   :  { %11316 = shalt.err (!%p11313_p6)
}
  0x51   :  { %s11317_s7 = scalar_lea.vmem %s129_s14, 26624  ;;  %p11322_p8 = scmp.lt.s32.totalorder %s129_s14, %s129_s14 }
  0x52   :  { %p11318_p7 = scmp.ne.s32.totalorder %s129_s14, %s11317_s7  ;;  %p11323_p9 = scmp.lt.s32.totalorder %s11317_s7, %s11317_s7 }
  0x54   :  { %p11324_p10 = por %p11323_p9, %p11322_p8 }
  0x56   :  { %p11325_p11 = pnand %p11324_p10, %p11318_p7 }
  0x58   :  { %11328 = shalt.err (!%p11325_p11)
}
  0x59   :  { %s11509_s20 = smov 128   ;;  %s11510_s23 = smov 8  }
  0x5a   :  { %134 = dma.hbm_to_vmem [thread:$0]  %s11972_s9, 26624, %s129_s14, [#allocation18], %s11509_s20, %s11509_s20, %s11510_s23  }
  0x5b   :  { %s11329_s26 = scalar_lea.hbm %s11963_s0, 256 }
  0x5c   :  { %p11330_p12 = scmp.ne.s32.totalorder %s11963_s0, %s11329_s26  ;;  %p11333_p13 = scmp.lt.u32.totalorder %s11329_s26, %s11963_s0 }
  0x5e   :  { %p11335_p0 = pnand %p11333_p13, %p11330_p12 }
  0x60   :  { %11338 = shalt.err (!%p11335_p0)
}
  0x61   :  { %s11339_s12 = scalar_lea.vmem %s11630_s17, 256  ;;  %p11344_p2 = scmp.lt.s32.totalorder %s11630_s17, %s11630_s17 }
  0x62   :  { %p11340_p1 = scmp.ne.s32.totalorder %s11630_s17, %s11339_s12  ;;  %p11345_p3 = scmp.lt.s32.totalorder %s11339_s12, %s11339_s12 }
  0x64   :  { %p11346_p4 = por %p11345_p3, %p11344_p2 }
  0x66   :  { %p11347_p5 = pnand %p11346_p4, %p11340_p1 }
  0x68   :  { %11350 = shalt.err (!%p11347_p5)
}
  0x69   :  { %34 = dma.hbm_to_vmem [thread:$0]  %s11963_s0, 256, %s11630_s17, [#allocation3], %s11509_s20, %s11509_s20, %s11510_s23  }
  0x6a   :  { %s11511_s16 = smov [#allocation7]   ;;  %s11512_s27 = smov [#allocation10]  }
  0x6b   :  { %s53_s3 = sshll.u32 %s11511_s16, 4  ;;  %s75_s28 = sshll.u32 %s11512_s27, 4  ;;  %s54_s3 = int_to_ptr.vmem [resolvable:$true] %s53_s3  ;;  %s76_s28 = int_to_ptr.vmem [resolvable:$true] %s75_s28 }
  0x6c   :  { %s11351_s21 = scalar_lea.hbm %s11965_s2, 16 }
  0x6d   :  { %p11352_p6 = scmp.ne.s32.totalorder %s11965_s2, %s11351_s21  ;;  %p11355_p7 = scmp.lt.u32.totalorder %s11351_s21, %s11965_s2 }
  0x6f   :  { %p11357_p8 = pnand %p11355_p7, %p11352_p6 }
  0x71   :  { %11360 = shalt.err (!%p11357_p8)
}
  0x72   :  { %s11361_s0 = scalar_lea.vmem %s54_s3, 16  ;;  %s11365_s17 = scalar_lea.vmem %s54_s3, 32 }
  0x73   :  { %p11362_p9 = scmp.ne.s32.totalorder %s54_s3, %s11361_s0  ;;  %p11366_p10 = scmp.lt.s32.totalorder %s54_s3, %s54_s3 }
  0x74   :  { %p11367_p11 = scmp.lt.s32.totalorder %s11365_s17, %s11361_s0 }
  0x76   :  { %p11368_p12 = por %p11367_p11, %p11366_p10 }
  0x78   :  { %p11369_p13 = pnand %p11368_p12, %p11362_p9 }
  0x7a   :  { %11372 = shalt.err (!%p11369_p13)
}
  0x7b   :  { %56 = dma.hbm_to_vmem [thread:$0]  %s11965_s2, 16, %s54_s3, [#allocation6]  }
  0x7c   :  { %s11373_s26 = scalar_lea.hbm %s11967_s4, 16 }
  0x7d   :  { %p11374_p0 = scmp.ne.s32.totalorder %s11967_s4, %s11373_s26  ;;  %p11377_p1 = scmp.lt.u32.totalorder %s11373_s26, %s11967_s4 }
  0x7f   :  { %p11379_p2 = pnand %p11377_p1, %p11374_p0 }
  0x81   :  { %11382 = shalt.err (!%p11379_p2)
}
  0x82   :  { %s11383_s12 = scalar_lea.vmem %s76_s28, 16  ;;  %s11387_s9 = scalar_lea.vmem %s76_s28, 32 }
  0x83   :  { %p11384_p3 = scmp.ne.s32.totalorder %s76_s28, %s11383_s12  ;;  %p11388_p4 = scmp.lt.s32.totalorder %s76_s28, %s76_s28 }
  0x84   :  { %p11389_p5 = scmp.lt.s32.totalorder %s11387_s9, %s11383_s12 }
  0x86   :  { %p11390_p6 = por %p11389_p5, %p11388_p4 }
  0x88   :  { %p11391_p7 = pnand %p11390_p6, %p11384_p3 }
  0x8a   :  { %11394 = shalt.err (!%p11391_p7)
}
  0x8b   :  { %78 = dma.hbm_to_vmem [thread:$0]  %s11967_s4, 16, %s76_s28, [#allocation9]  }
  0x8c   :  { %s11513_s16 = smov [#allocation13]   ;;  %s11514_s27 = smov [#allocation16]  }
  0x8d   :  { %s97_s3 = sshll.u32 %s11513_s16, 4  ;;  %s119_s13 = sshll.u32 %s11514_s27, 4  ;;  %s98_s3 = int_to_ptr.vmem [resolvable:$true] %s97_s3  ;;  %s120_s13 = int_to_ptr.vmem [resolvable:$true] %s119_s13 }
  0x8e   :  { %s11395_s22 = scalar_lea.hbm %s11969_s6, 112 }
  0x8f   :  { %p11396_p8 = scmp.ne.s32.totalorder %s11969_s6, %s11395_s22  ;;  %p11399_p9 = scmp.lt.u32.totalorder %s11395_s22, %s11969_s6 }
  0x91   :  { %p11401_p10 = pnand %p11399_p9, %p11396_p8 }
  0x93   :  { %11404 = shalt.err (!%p11401_p10)
}
  0x94   :  { %s11405_s4 = scalar_lea.vmem %s98_s3, 112  ;;  %s11409_s28 = scalar_lea.vmem %s98_s3, 128 }
  0x95   :  { %p11406_p11 = scmp.ne.s32.totalorder %s98_s3, %s11405_s4  ;;  %p11410_p12 = scmp.lt.s32.totalorder %s98_s3, %s98_s3 }
  0x96   :  { %p11411_p13 = scmp.lt.s32.totalorder %s11409_s28, %s11405_s4 }
  0x98   :  { %p11412_p0 = por %p11411_p13, %p11410_p12 }
  0x9a   :  { %p11413_p1 = pnand %p11412_p0, %p11406_p11 }
  0x9c   :  { %11416 = shalt.err (!%p11413_p1)
}
  0x9d   :  { %100 = dma.hbm_to_vmem [thread:$0]  %s11969_s6, 112, %s98_s3, [#allocation12]  }
  0x9e   :  { %s11417_s25 = scalar_lea.hbm %s11971_s8, 208 }
  0x9f   :  { %p11418_p2 = scmp.ne.s32.totalorder %s11971_s8, %s11417_s25  ;;  %p11421_p3 = scmp.lt.u32.totalorder %s11417_s25, %s11971_s8 }
  0xa1   :  { %p11423_p4 = pnand %p11421_p3, %p11418_p2 }
  0xa3   :  { %11426 = shalt.err (!%p11423_p4)
}
  0xa4   :  { %s11427_s30 = scalar_lea.vmem %s120_s13, 208  ;;  %s11431_s12 = scalar_lea.vmem %s120_s13, 224 }
  0xa5   :  { %p11428_p5 = scmp.ne.s32.totalorder %s120_s13, %s11427_s30  ;;  %p11432_p6 = scmp.lt.s32.totalorder %s120_s13, %s120_s13 }
  0xa6   :  { %p11433_p7 = scmp.lt.s32.totalorder %s11431_s12, %s11427_s30 }
  0xa8   :  { %p11434_p8 = por %p11433_p7, %p11432_p6 }
  0xaa   :  { %p11435_p9 = pnand %p11434_p8, %p11428_p5 }
  0xac   :  { %11438 = shalt.err (!%p11435_p9)
}
  0xad   :  { %122 = dma.hbm_to_vmem [thread:$0]  %s11971_s8, 208, %s120_s13, [#allocation15]  }
  0xae   :  { %s11515_s2 = smov [#allocation19]   ;;  %s11439_s27 = scalar_lea.hbm %s11973_s10, 32 }
  0xaf   :  { %s141_s14 = sshll.u32 %s11515_s2, 4  ;;  %p11440_p10 = scmp.ne.s32.totalorder %s11973_s10, %s11439_s27  ;;  %s142_s14 = int_to_ptr.vmem [resolvable:$true] %s141_s14 }
  0xb0   :  { %p11443_p11 = scmp.lt.u32.totalorder %s11439_s27, %s11973_s10 }
  0xb2   :  { %p11445_p12 = pnand %p11443_p11, %p11440_p10 }
  0xb4   :  { %11448 = shalt.err (!%p11445_p12)
}
  0xb5   :  { %s11449_s1 = scalar_lea.vmem %s142_s14, 32  ;;  %p11454_p0 = scmp.lt.s32.totalorder %s142_s14, %s142_s14 }
  0xb6   :  { %p11450_p13 = scmp.ne.s32.totalorder %s142_s14, %s11449_s1  ;;  %p11455_p1 = scmp.lt.s32.totalorder %s11449_s1, %s11449_s1 }
  0xb8   :  { %p11456_p2 = por %p11455_p1, %p11454_p0 }
  0xba   :  { %p11457_p3 = pnand %p11456_p2, %p11450_p13 }
  0xbc   :  { %11460 = shalt.err (!%p11457_p3)
}
  0xbd   :  { %144 = dma.hbm_to_vmem [thread:$0]  %s11973_s10, 32, %s142_s14, [#allocation18]  }
  0xbe   :  { %11483 = dma.done.wait [#allocation3], 256  }
  0xbf   :  { %11484 = vsyncadd [#allocation3], 4294967040 }
  0xc0   :  { %11485 = dma.done.wait [#allocation6], 1040  }
  0xc1   :  { %11486 = vsyncadd [#allocation6], 4294966256 }
  0xc2   :  { %11487 = dma.done.wait [#allocation9], 1040  }
  0xc3   :  { %11488 = vsyncadd [#allocation9], 4294966256 }
  0xc4   :  { %11489 = dma.done.wait [#allocation12], 7280  }
  0xc5   :  { %11490 = vsyncadd [#allocation12], 4294960016 }
  0xc6   :  { %11491 = dma.done.wait [#allocation15], 93392  }
  0xc7   :  { %11492 = vsyncadd [#allocation15], 4294873904 }
  0xc8   :  { %11493 = dma.done.wait [#allocation18], 26656  }
  0xc9   :  { %11494 = vsyncadd [#allocation18], 4294940640  ;;  %v11516_v0 = vmov 0.0   ;;  %vm11517_vm0 = vmmov 0   ;;  %v9730_v1 = vld [vmem:[#allocation5] sm:$0xff]   ;;  %v9731_v2 = vld [vmem:[#allocation5 + $0x8] sm:$0xff]  }
  0xca   :  { %9501 = vmatprep.subr.bf16.mxu0 %v11516_v0  ;;  %9517 = vmatprep.mubr.msk.bf16.mxu0 %vm11517_vm0, %v11516_v0  ;;  %v9732_v3 = vld [vmem:[#allocation5 + $0x10] sm:$0xff]   ;;  %v9738_v4 = vld [vmem:[#allocation8] sm:$0xff]   ;;  %v9733_v5 = vld [vmem:[#allocation5 + $0x18] sm:$0xff]   ;;  %v11518_v61 = vmov 0   ;;  %s11519_s10 = smov [#allocation20]  }
  0xcb   :  { %9521 = vmatprep.subr.bf16.mxu1 %v11516_v0  ;;  %9537 = vmatprep.mubr.msk.bf16.mxu1 %vm11517_vm0, %v11516_v0  ;;  %v9739_v6 = vld [vmem:[#allocation8 + $0x8] sm:$0xff]   ;;  %v9734_v7 = vld [vmem:[#allocation5 + $0x20] sm:$0xff]   ;;  %v9740_v8 = vld [vmem:[#allocation8 + $0x10] sm:$0xff]   ;;  %s8368_s18 = sshll.u32 %s11519_s10, 4  ;;  %s8369_s18 = int_to_ptr.vmem [resolvable:$true] %s8368_s18 }
  0xcc   :  { %9502 = vmatpush3.bf16.msra.mxu0 %v9730_v1  ;;  %9522 = vmatpush3.bf16.msra.mxu1 %v9738_v4  ;;  %v9735_v9 = vld [vmem:[#allocation5 + $0x28] sm:$0xff]   ;;  %v9741_v10 = vld [vmem:[#allocation8 + $0x18] sm:$0xff]   ;;  %v9736_v11 = vld [vmem:[#allocation5 + $0x30] sm:$0xff]   ;;  %s11461_s0 = scalar_lea.vmem %s8369_s18, 512  ;;  %p11466_p5 = scmp.lt.s32.totalorder %s8369_s18, %s8369_s18 }
  0xcd   :  { %9503 = vmatprep.subr.bf16.mxu0 %v11516_v0  ;;  %9523 = vmatprep.subr.bf16.mxu1 %v11516_v0  ;;  %v9742_v12 = vld [vmem:[#allocation8 + $0x20] sm:$0xff]   ;;  %v9737_v13 = vld [vmem:[#allocation5 + $0x38] sm:$0xff]   ;;  %v179_v14 = vld [vmem:[#allocation2] sm:$0xff]  ;;  %p11462_p4 = scmp.ne.s32.totalorder %s8369_s18, %s11461_s0  ;;  %p11467_p6 = scmp.lt.s32.totalorder %s11461_s0, %s11461_s0 }
  0xce   :  { %v180_v15 = vld [vmem:[#allocation2 + $0x8] sm:$0xff]  ;;  %v9743_v16 = vld [vmem:[#allocation8 + $0x28] sm:$0xff]   ;;  %v9746_v20 = vld [vmem:[#allocation11] ss:$28 sps:$4 sm:$0xff]  }
  0xcf   :  { %v181_v17 = vpack.c.bf16 %v180_v15, %v179_v14  ;;  %v9744_v18 = vld [vmem:[#allocation8 + $0x30] sm:$0xff]   ;;  %v9745_v19 = vld [vmem:[#allocation8 + $0x38] sm:$0xff]   ;;  %v9748_v21 = vld [vmem:[#allocation11 + $0x4] ss:$28 sps:$4 sm:$0xff]   ;;  %p11468_p7 = por %p11467_p6, %p11466_p5 }
  0xd0   :  { %9504 = vmatpush3.bf16.msra.mxu0 %v9731_v2  ;;  %9524 = vmatpush3.bf16.msra.mxu1 %v9739_v6  ;;  %v9751_v22 = vld [vmem:[#allocation11 + $0xc] ss:$28 sps:$4 sm:$0xff]   ;;  %v9754_v23 = vld [vmem:[#allocation11 + $0x3c] ss:$28 sps:$4 sm:$0xff]   ;;  %v9760_v25 = vld [vmem:[#allocation11 + $0x74] ss:$28 sps:$4 sm:$0xff]  }
  0xd1   :  { %9505 = vmatprep.subr.bf16.mxu0 %v11516_v0  ;;  %9525 = vmatprep.subr.bf16.mxu1 %v11516_v0  ;;  %v9752_v24 = vld [vmem:[#allocation11 + $0x38] ss:$28 sps:$4 sm:$0xff]   ;;  %v9758_v26 = vld [vmem:[#allocation11 + $0x70] ss:$28 sps:$4 sm:$0xff]   ;;  %v9764_v28 = vld [vmem:[#allocation11 + $0xa8] ss:$28 sps:$4 sm:$0xff]   ;;  %p11469_p8 = pnand %p11468_p7, %p11462_p4 }
  0xd2   :  { %v9766_v27 = vld [vmem:[#allocation11 + $0xac] ss:$28 sps:$4 sm:$0xff]   ;;  %v9772_v29 = vld [vmem:[#allocation11 + $0xe4] ss:$28 sps:$4 sm:$0xff]   ;;  %v9778_v31 = vld [vmem:[#allocation11 + $0x11c] ss:$28 sps:$4 sm:$0xff]  }
  0xd3   :  { %v9770_v30 = vld [vmem:[#allocation11 + $0xe0] ss:$28 sps:$4 sm:$0xff]   ;;  %v9776_v32 = vld [vmem:[#allocation11 + $0x118] ss:$28 sps:$4 sm:$0xff]   ;;  %v9749_v37 = vld [vmem:[#allocation11 + $0x8] ss:$28 sps:$4 sm:$0xff]  }
  0xd4   :  { %9506 = vmatpush3.bf16.msra.mxu0 %v9732_v3  ;;  %9526 = vmatpush3.bf16.msra.mxu1 %v9740_v8  ;;  %v8385_v33 = vld [vmem:[#allocation7] ss:$0 sm:$0xff]  ;;  %v9757_v41 = vld [vmem:[#allocation11 + $0x44] ss:$28 sps:$4 sm:$0xff]   ;;  %v9761_v45 = vld [vmem:[#allocation11 + $0x78] ss:$28 sps:$4 sm:$0xff]  }
  0xd5   :  { %9507 = vmatprep.subr.bf16.mxu0 %v11516_v0  ;;  %9527 = vmatprep.subr.bf16.mxu1 %v11516_v0  ;;  %v9755_v43 = vld [vmem:[#allocation11 + $0x40] ss:$28 sps:$4 sm:$0xff]   ;;  %v9769_v46 = vld [vmem:[#allocation11 + $0xb4] ss:$28 sps:$4 sm:$0xff]   ;;  %v9775_v48 = vld [vmem:[#allocation11 + $0xec] ss:$28 sps:$4 sm:$0xff]  }
  0xd6   :  { %v9763_v44 = vld [vmem:[#allocation11 + $0x7c] ss:$28 sps:$4 sm:$0xff]   ;;  %v9767_v47 = vld [vmem:[#allocation11 + $0xb0] ss:$28 sps:$4 sm:$0xff]   ;;  %v9773_v49 = vld [vmem:[#allocation11 + $0xe8] ss:$28 sps:$4 sm:$0xff]  }
  0xd7   :  { %v9781_v50 = vld [vmem:[#allocation11 + $0x124] ss:$28 sps:$4 sm:$0xff]   ;;  %v9784_v52 = vld [vmem:[#allocation11 + $0x154] ss:$28 sps:$4 sm:$0xff]   ;;  %v9787_v53 = vld [vmem:[#allocation11 + $0x15c] ss:$28 sps:$4 sm:$0xff]  }
  0xd8   :  { %9508 = vmatpush3.bf16.msra.mxu0 %v9733_v5  ;;  %9528 = vmatpush3.bf16.msra.mxu1 %v9741_v10  ;;  %v9779_v51 = vld [vmem:[#allocation11 + $0x120] ss:$28 sps:$4 sm:$0xff]   ;;  %v9782_v54 = vld [vmem:[#allocation11 + $0x150] ss:$28 sps:$4 sm:$0xff]   ;;  %v9785_v55 = vld [vmem:[#allocation11 + $0x158] ss:$28 sps:$4 sm:$0xff]  }
  0xd9   :  { %9509 = vmatprep.subr.bf16.mxu0 %v11516_v0  ;;  %9529 = vmatprep.subr.bf16.mxu1 %v11516_v0  ;;  %v9790_v56 = vld [vmem:[#allocation11 + $0x18c] ss:$28 sps:$4 sm:$0xff]   ;;  %v9793_v57 = vld [vmem:[#allocation11 + $0x194] ss:$28 sps:$4 sm:$0xff]   ;;  %v8394_v62 = vld [vmem:[#allocation10] ss:$0 sm:$0xff] }
  0xda   :  { %v9788_v58 = vld [vmem:[#allocation11 + $0x188] ss:$28 sps:$4 sm:$0xff]   ;;  %v9791_v59 = vld [vmem:[#allocation11 + $0x190] ss:$28 sps:$4 sm:$0xff]   ;;  %v9802_v15 = vld [vmem:[#allocation11 + $0x80] ss:$28 sps:$4 sm:$0xff]  }
  0xdb   :  { %v9796_v60 = vld [vmem:[#allocation11 + $0x14] ss:$28 sps:$4 sm:$0xff]   ;;  %v9804_v14 = vld [vmem:[#allocation11 + $0x84] ss:$28 sps:$4 sm:$0xff]  }
  0xdc   :  { %9510 = vmatpush3.bf16.msra.mxu0 %v9734_v7  ;;  %9530 = vmatpush3.bf16.msra.mxu1 %v9742_v12  ;;  %v9794_v8 = vld [vmem:[#allocation11 + $0x10] ss:$28 sps:$4 sm:$0xff]   ;;  %v9798_v12 = vld [vmem:[#allocation11 + $0x48] ss:$28 sps:$4 sm:$0xff]  }
  0xdd   :  { %9511 = vmatprep.subr.bf16.mxu0 %v11516_v0  ;;  %9531 = vmatprep.subr.bf16.mxu1 %v11516_v0 }
  0xe0   :  { %9512 = vmatpush3.bf16.msra.mxu0 %v9735_v9  ;;  %9532 = vmatpush3.bf16.msra.mxu1 %v9743_v16  ;;  %v9797_v9 = vld [vmem:[#allocation11 + $0x18] ss:$28 sps:$4 sm:$0xff]   ;;  %v9805_v16 = vld [vmem:[#allocation11 + $0x88] ss:$28 sps:$4 sm:$0xff]  }
  0xe1   :  { %9513 = vmatprep.subr.bf16.mxu0 %v11516_v0  ;;  %9533 = vmatprep.subr.bf16.mxu1 %v11516_v0 }
  0xe4   :  { %9514 = vmatpush3.bf16.msra.mxu0 %v9736_v11  ;;  %9534 = vmatpush3.bf16.msra.mxu1 %v9744_v18  ;;  %v9800_v11 = vld [vmem:[#allocation11 + $0x4c] ss:$28 sps:$4 sm:$0xff]   ;;  %v9806_v18 = vld [vmem:[#allocation11 + $0xb8] ss:$28 sps:$4 sm:$0xff]  }
  0xe5   :  { %9515 = vmatprep.subr.bf16.mxu0 %v11516_v0  ;;  %9535 = vmatprep.subr.bf16.mxu1 %v11516_v0 }
  0xe8   :  { %9516 = vmatpush3.bf16.msra.mxu0 %v9737_v13  ;;  %9536 = vmatpush3.bf16.msra.mxu1 %v9745_v19  ;;  %v9801_v13 = vld [vmem:[#allocation11 + $0x50] ss:$28 sps:$4 sm:$0xff]   ;;  %v9809_v19 = vld [vmem:[#allocation11 + $0xc0] ss:$28 sps:$4 sm:$0xff]  }
  0xe9   :  { %799 = vmatprep.subr.bf16.mxu0 %v9748_v21  ;;  %842 = vmatprep.subr.bf16.mxu1 %v9751_v22  ;;  %v9810_v21 = vld [vmem:[#allocation11 + $0xf0] ss:$28 sps:$4 sm:$0xff]   ;;  %v9813_v22 = vld [vmem:[#allocation11 + $0xf8] ss:$28 sps:$4 sm:$0xff]  }
  0xeb   :  { %9518 = vmatmul.mubr.bf16.vlgmr.msra.gmra.mrb[0].mxu0 %v181_v17  ;;  %v9808_v17 = vld [vmem:[#allocation11 + $0xbc] ss:$28 sps:$4 sm:$0xff]  }
  0xec   :  { %800 = vmatpush1.bf16.msra.mxu0 %v9746_v20  ;;  %831 = vmatprep.mubr.bf16.mxu0 %v11518_v61  ;;  %v9812_v20 = vld [vmem:[#allocation11 + $0xf4] ss:$28 sps:$4 sm:$0xff]  }
  0xed   :  { %801 = vmatprep.subr.bf16.mxu0 %v9754_v23  ;;  %v9816_v23 = vld [vmem:[#allocation11 + $0x12c] ss:$28 sps:$4 sm:$0xff]  }
  0xf0   :  { %802 = vmatpush1.bf16.msra.mxu0 %v9752_v24  ;;  %v9814_v24 = vld [vmem:[#allocation11 + $0x128] ss:$28 sps:$4 sm:$0xff]  }
  0xf1   :  { %803 = vmatprep.subr.bf16.mxu0 %v9760_v25  ;;  %v9817_v25 = vld [vmem:[#allocation11 + $0x130] ss:$28 sps:$4 sm:$0xff]  }
  0xf4   :  { %804 = vmatpush1.bf16.msra.mxu0 %v9758_v26  ;;  %v9820_v26 = vld [vmem:[#allocation11 + $0x164] ss:$28 sps:$4 sm:$0xff]  }
  0xf5   :  { %805 = vmatprep.subr.bf16.mxu0 %v9766_v27  ;;  %v9818_v27 = vld [vmem:[#allocation11 + $0x160] ss:$28 sps:$4 sm:$0xff]  }
  0xf8   :  { %806 = vmatpush1.bf16.msra.mxu0 %v9764_v28  ;;  %v9821_v28 = vld [vmem:[#allocation11 + $0x168] ss:$28 sps:$4 sm:$0xff]  }
  0xf9   :  { %807 = vmatprep.subr.bf16.mxu0 %v9772_v29  ;;  %v9824_v29 = vld [vmem:[#allocation11 + $0x19c] ss:$28 sps:$4 sm:$0xff]  }
  0xfc   :  { %808 = vmatpush1.bf16.msra.mxu0 %v9770_v30  ;;  %v9822_v30 = vld [vmem:[#allocation11 + $0x198] ss:$28 sps:$4 sm:$0xff]  }
  0xfd   :  { %809 = vmatprep.subr.bf16.mxu0 %v9778_v31  ;;  %v9825_v31 = vld [vmem:[#allocation11 + $0x1a0] ss:$28 sps:$4 sm:$0xff]  }
 0x100   :  { %810 = vmatpush1.bf16.msra.mxu0 %v9776_v32  ;;  %v9828_v32 = vld [vmem:[#allocation14 + $0x4] ss:$52 sps:$4 sm:$0xff]  }
 0x101   :  { %811 = vmatprep.subr.bf16.mxu0 %v9784_v52  ;;  %v9858_v52 = vld [vmem:[#allocation14 + $0x414] ss:$52 sps:$4 sm:$0xff]  }
 0x104   :  { %812 = vmatpush1.bf16.msra.mxu0 %v9782_v54  ;;  %v9861_v54 = vld [vmem:[#allocation14 + $0x47c] ss:$52 sps:$4 sm:$0xff]  }
 0x105   :  { %813 = vmatprep.subr.bf16.mxu0 %v9790_v56  ;;  %v9864_v56 = vld [vmem:[#allocation14 + $0x4e4] ss:$52 sps:$4 sm:$0xff]  }
 0x108   :  { %814 = vmatpush1.bf16.msra.mxu0 %v9788_v58  ;;  %v9867_v58 = vld [vmem:[#allocation14 + $0x54c] ss:$52 sps:$4 sm:$0xff]  }
 0x109   :  { %885 = vmatprep.subr.bf16.mxu0 %v9796_v60  ;;  %v9870_v60 = vld [vmem:[#allocation14 + $0x5b4] ss:$52 sps:$4 sm:$0xff]  }
 0x1be   :  { %v287_v34 = vpop.f32.mrb[0].mxu0 }
 0x1bf   :  { %v9519_v35 = vpop.f32.mrb[1].mxu0  ;;  %v288_v38 = vadd.f32 %v8385_v33, %v287_v34  ;;  %v9831_v34 = vld [vmem:[#allocation14 + $0x6c] ss:$52 sps:$4 sm:$0xff]  }
 0x1c0   :  { %v290_v36 = vpop.f32.mrb[2].mxu0  ;;  %v9829_v35 = vld [vmem:[#allocation14 + $0x68] ss:$52 sps:$4 sm:$0xff]  }
 0x1c1   :  { %v291_v39 = vadd.f32 %v8385_v33, %v290_v36  ;;  %v9520_v40 = vpop.f32.mrb[3].mxu0  ;;  %v9826_v33 = vld [vmem:[#allocation14] ss:$52 sps:$4 sm:$0xff]  }
 0x1c2   :  { %v9834_v36 = vld [vmem:[#allocation14 + $0xd4] ss:$52 sps:$4 sm:$0xff]   ;;  %v9840_v40 = vld [vmem:[#allocation14 + $0x1a4] ss:$52 sps:$4 sm:$0xff]  }
 0x1c3   :  { %v294_v42 = vpack.c.bf16 %v291_v39, %v288_v38  ;;  %v9837_v38 = vld [vmem:[#allocation14 + $0x13c] ss:$52 sps:$4 sm:$0xff]   ;;  %v9835_v39 = vld [vmem:[#allocation14 + $0x138] ss:$52 sps:$4 sm:$0xff]  }
 0x1c5   :  { %9538 = vmatmul.mubr.bf16.vlgmr.msra.gmra.mrb[0].mxu1 %v294_v42  ;;  %v9843_v42 = vld [vmem:[#allocation14 + $0x20c] ss:$52 sps:$4 sm:$0xff]  }
 0x1c6   :  { %843 = vmatpush1.bf16.msra.mxu1 %v9749_v37  ;;  %874 = vmatprep.mubr.bf16.mxu1 %v11518_v61  ;;  %v9832_v37 = vld [vmem:[#allocation14 + $0xd0] ss:$52 sps:$4 sm:$0xff]  }
 0x1c7   :  { %844 = vmatprep.subr.bf16.mxu1 %v9757_v41  ;;  %v9838_v41 = vld [vmem:[#allocation14 + $0x1a0] ss:$52 sps:$4 sm:$0xff]  }
 0x1ca   :  { %845 = vmatpush1.bf16.msra.mxu1 %v9755_v43  ;;  %v9841_v43 = vld [vmem:[#allocation14 + $0x208] ss:$52 sps:$4 sm:$0xff]  }
 0x1cb   :  { %846 = vmatprep.subr.bf16.mxu1 %v9763_v44  ;;  %v9846_v44 = vld [vmem:[#allocation14 + $0x274] ss:$52 sps:$4 sm:$0xff]  }
 0x1ce   :  { %847 = vmatpush1.bf16.msra.mxu1 %v9761_v45  ;;  %v9844_v45 = vld [vmem:[#allocation14 + $0x270] ss:$52 sps:$4 sm:$0xff]  }
 0x1cf   :  { %848 = vmatprep.subr.bf16.mxu1 %v9769_v46  ;;  %v9849_v46 = vld [vmem:[#allocation14 + $0x2dc] ss:$52 sps:$4 sm:$0xff]  }
 0x1d2   :  { %849 = vmatpush1.bf16.msra.mxu1 %v9767_v47  ;;  %v9847_v47 = vld [vmem:[#allocation14 + $0x2d8] ss:$52 sps:$4 sm:$0xff]  }
 0x1d3   :  { %850 = vmatprep.subr.bf16.mxu1 %v9775_v48  ;;  %v9852_v48 = vld [vmem:[#allocation14 + $0x344] ss:$52 sps:$4 sm:$0xff]  }
 0x1d6   :  { %851 = vmatpush1.bf16.msra.mxu1 %v9773_v49  ;;  %v9850_v49 = vld [vmem:[#allocation14 + $0x340] ss:$52 sps:$4 sm:$0xff]  }
 0x1d7   :  { %852 = vmatprep.subr.bf16.mxu1 %v9781_v50  ;;  %v9855_v50 = vld [vmem:[#allocation14 + $0x3ac] ss:$52 sps:$4 sm:$0xff]  }
 0x1da   :  { %853 = vmatpush1.bf16.msra.mxu1 %v9779_v51  ;;  %v9853_v51 = vld [vmem:[#allocation14 + $0x3a8] ss:$52 sps:$4 sm:$0xff]  }
 0x1db   :  { %854 = vmatprep.subr.bf16.mxu1 %v9787_v53  ;;  %v9856_v53 = vld [vmem:[#allocation14 + $0x410] ss:$52 sps:$4 sm:$0xff]  }
 0x1de   :  { %855 = vmatpush1.bf16.msra.mxu1 %v9785_v55  ;;  %v9859_v55 = vld [vmem:[#allocation14 + $0x478] ss:$52 sps:$4 sm:$0xff]  }
 0x1df   :  { %856 = vmatprep.subr.bf16.mxu1 %v9793_v57  ;;  %v9862_v57 = vld [vmem:[#allocation14 + $0x4e0] ss:$52 sps:$4 sm:$0xff]  }
 0x1e2   :  { %857 = vmatpush1.bf16.msra.mxu1 %v9791_v59  ;;  %v9865_v59 = vld [vmem:[#allocation14 + $0x548] ss:$52 sps:$4 sm:$0xff]  }
 0x1e3   :  { %9541 = vmatprep.subr.bf16.mxu1 %v11516_v0 }
 0x298   :  { %v400_v63 = vpop.f32.mrb[0].mxu1 }
 0x299   :  { %v401_v1 = vadd.f32 %v8394_v62, %v400_v63  ;;  %v9539_v2 = vpop.f32.mrb[1].mxu1  ;;  %v9873_v63 = vld [vmem:[#allocation14 + $0x61c] ss:$52 sps:$4 sm:$0xff]  }
 0x29a   :  { %v403_v3 = vpop.f32.mrb[2].mxu1  ;;  %v9876_v2 = vld [vmem:[#allocation14 + $0x1384] ss:$52 sps:$4 sm:$0xff]  }
 0x29b   :  { %v404_v4 = vadd.f32 %v8394_v62, %v403_v3  ;;  %v9540_v5 = vpop.f32.mrb[3].mxu1  ;;  %v407_v6 = vmax.f32 %v401_v1, 0.0  ;;  %v9868_v62 = vld [vmem:[#allocation14 + $0x5b0] ss:$52 sps:$4 sm:$0xff]   ;;  %v9871_v1 = vld [vmem:[#allocation14 + $0x618] ss:$52 sps:$4 sm:$0xff]  }
 0x29c   :  { %v9874_v3 = vld [vmem:[#allocation14 + $0x1380] ss:$52 sps:$4 sm:$0xff]  }
 0x29d   :  { %v408_v7 = vmax.f32 %v404_v4, 0.0  ;;  %v9879_v4 = vld [vmem:[#allocation14 + $0x684] ss:$52 sps:$4 sm:$0xff]   ;;  %v9882_v5 = vld [vmem:[#allocation14 + $0x13ec] ss:$52 sps:$4 sm:$0xff]  }
 0x29f   :  { %v409_v10 = vpack.c.bf16 %v408_v7, %v407_v6  ;;  %v9880_v6 = vld [vmem:[#allocation14 + $0x13e8] ss:$52 sps:$4 sm:$0xff]  }
 0x2a0   :  { %v9888_v7 = vld [vmem:[#allocation14 + $0x1454] ss:$52 sps:$4 sm:$0xff]  }
 0x2a1   :  { %832 = vmatmul.mubr.bf16.vlgmr.msra.gmra.mrb[4].mxu0 %v409_v10  ;;  %875 = vmatmul.mubr.bf16.vlgmr.msra.gmra.mrb[4].mxu1 %v409_v10 }
 0x2a2   :  { %886 = vmatpush1.bf16.msra.mxu0 %v9794_v8  ;;  %9542 = vmatpush3.bf16.msra.mxu1 %v9797_v9  ;;  %v9886_v8 = vld [vmem:[#allocation14 + $0x1450] ss:$52 sps:$4 sm:$0xff]  }
 0x2a3   :  { %887 = vmatprep.subr.bf16.mxu0 %v9800_v11  ;;  %9543 = vmatprep.subr.bf16.mxu1 %v11516_v0  ;;  %v9894_v9 = vld [vmem:[#allocation14 + $0x14bc] ss:$52 sps:$4 sm:$0xff]   ;;  %v9900_v11 = vld [vmem:[#allocation14 + $0x1524] ss:$52 sps:$4 sm:$0xff]  }
 0x2a4   :  { %917 = vmatprep.mubr.bf16.mxu0 %v11518_v61  ;;  %9557 = vmatprep.mubr.msk.bf16.mxu1 %vm11517_vm0, %v11516_v0 }
 0x2a6   :  { %888 = vmatpush1.bf16.msra.mxu0 %v9798_v12  ;;  %9544 = vmatpush3.bf16.msra.mxu1 %v9801_v13  ;;  %v9898_v12 = vld [vmem:[#allocation14 + $0x1520] ss:$52 sps:$4 sm:$0xff]  }
 0x2a7   :  { %889 = vmatprep.subr.bf16.mxu0 %v9804_v14  ;;  %9545 = vmatprep.subr.bf16.mxu1 %v11516_v0  ;;  %v9906_v13 = vld [vmem:[#allocation14 + $0x158c] ss:$52 sps:$4 sm:$0xff]   ;;  %v9904_v14 = vld [vmem:[#allocation14 + $0x1588] ss:$52 sps:$4 sm:$0xff]  }
 0x2aa   :  { %890 = vmatpush1.bf16.msra.mxu0 %v9802_v15  ;;  %9546 = vmatpush3.bf16.msra.mxu1 %v9805_v16  ;;  %v9912_v15 = vld [vmem:[#allocation14 + $0x15f4] ss:$52 sps:$4 sm:$0xff]   ;;  %v9910_v16 = vld [vmem:[#allocation14 + $0x15f0] ss:$52 sps:$4 sm:$0xff]  }
 0x2ab   :  { %891 = vmatprep.subr.bf16.mxu0 %v9808_v17  ;;  %9547 = vmatprep.subr.bf16.mxu1 %v11516_v0  ;;  %v9918_v17 = vld [vmem:[#allocation14 + $0x165c] ss:$52 sps:$4 sm:$0xff]  }
 0x2ae   :  { %892 = vmatpush1.bf16.msra.mxu0 %v9806_v18  ;;  %9548 = vmatpush3.bf16.msra.mxu1 %v9809_v19  ;;  %v9916_v18 = vld [vmem:[#allocation14 + $0x1658] ss:$52 sps:$4 sm:$0xff]   ;;  %v9924_v19 = vld [vmem:[#allocation14 + $0x14] ss:$52 sps:$4 sm:$0xff]  }
 0x2af   :  { %893 = vmatprep.subr.bf16.mxu0 %v9812_v20  ;;  %9549 = vmatprep.subr.bf16.mxu1 %v11516_v0  ;;  %v476_v20 = vlaneseq }
 0x2b2   :  { %894 = vmatpush1.bf16.msra.mxu0 %v9810_v21  ;;  %9550 = vmatpush3.bf16.msra.mxu1 %v9813_v22  ;;  %v11755_v21 = vshrl.u32 %v476_v20, 7 }
 0x2b3   :  { %895 = vmatprep.subr.bf16.mxu0 %v9816_v23  ;;  %9551 = vmatprep.subr.bf16.mxu1 %v11516_v0 }
 0x2b4   :  { %v11758_v22 = vsub.s32 0, %v11755_v21  ;;  %v11761_v23 = vsub.s32 2, %v11755_v21 }
 0x2b6   :  { %896 = vmatpush1.bf16.msra.mxu0 %v9814_v24  ;;  %9552 = vmatpush3.bf16.msra.mxu1 %v9817_v25  ;;  %v11763_v24 = vld [vmem:[#allocation13] sm:$0xff]  ;;  %v11766_v25 = vsub.s32 1, %v11755_v21 }
 0x2b7   :  { %897 = vmatprep.subr.bf16.mxu0 %v9820_v26  ;;  %9553 = vmatprep.subr.bf16.mxu1 %v11516_v0  ;;  %v11769_v26 = vsub.s32 3, %v11755_v21 }
 0x2ba   :  { %898 = vmatpush1.bf16.msra.mxu0 %v9818_v27  ;;  %9554 = vmatpush3.bf16.msra.mxu1 %v9821_v28  ;;  %v479_v27 = vrot.slane %v11763_v24, %v11758_v22  ;;  %v487_v28 = vrot.slane %v11763_v24, %v11761_v23 }
 0x2bb   :  { %899 = vmatprep.subr.bf16.mxu0 %v9824_v29  ;;  %9555 = vmatprep.subr.bf16.mxu1 %v11516_v0  ;;  %v483_v29 = vrot.slane %v11763_v24, %v11766_v25 }
 0x2be   :  { %900 = vmatpush1.bf16.msra.mxu0 %v9822_v30  ;;  %9556 = vmatpush3.bf16.msra.mxu1 %v9825_v31  ;;  %v491_v30 = vrot.slane %v11763_v24, %v11769_v26 }
 0x2bf   :  { %5539 = vmatprep.subr.bf16.mxu1 %v9828_v32  ;;  %5668 = vmatprep.subr.bf16.mxu0 %v9876_v2  ;;  %v9897_v2 = vld [vmem:[#allocation14 + $0x7bc] ss:$52 sps:$4 sm:$0xff]  }
 0x2c1   :  { %918 = vmatmul.mubr.bf16.vlgmr.msra.gmra.mrb[8].mxu0 %v409_v10  ;;  %9558 = vmatmul.mubr.bf16.vlgmr.msra.gmra.mrb[8].mxu1 %v409_v10  ;;  %v9892_v10 = vld [vmem:[#allocation14 + $0x14b8] ss:$52 sps:$4 sm:$0xff]  }
 0x2c2   :  { %5540 = vmatpush1.bf16.msra.mxu1 %v9826_v33  ;;  %5700 = vmatprep.mubr.bf16.mxu0 %v11518_v61 }
 0x2c3   :  { %5541 = vmatprep.subr.bf16.mxu1 %v9831_v34  ;;  %5669 = vmatpush1.bf16.msra.mxu0 %v9874_v3  ;;  %v9895_v3 = vld [vmem:[#allocation14 + $0x7b8] ss:$52 sps:$4 sm:$0xff]  }
 0x2c4   :  { %5670 = vmatprep.subr.bf16.mxu0 %v9882_v5  ;;  %v9901_v5 = vld [vmem:[#allocation14 + $0x820] ss:$52 sps:$4 sm:$0xff]  }
 0x2c6   :  { %5542 = vmatpush1.bf16.msra.mxu1 %v9829_v35 }
 0x2c7   :  { %5543 = vmatprep.subr.bf16.mxu1 %v9834_v36  ;;  %5671 = vmatpush1.bf16.msra.mxu0 %v9880_v6  ;;  %v9909_v6 = vld [vmem:[#allocation14 + $0x88c] ss:$52 sps:$4 sm:$0xff]  }
 0x2c8   :  { %5672 = vmatprep.subr.bf16.mxu0 %v9888_v7  ;;  %v11791_v7 = vsub.s32 4, %v11755_v21 }
 0x2ca   :  { %5544 = vmatpush1.bf16.msra.mxu1 %v9832_v37 }
 0x2cb   :  { %5545 = vmatprep.subr.bf16.mxu1 %v9837_v38  ;;  %5673 = vmatpush1.bf16.msra.mxu0 %v9886_v8  ;;  %v502_v8 = vsub.s32 6, %v11755_v21 }
 0x2cc   :  { %5674 = vmatprep.subr.bf16.mxu0 %v9894_v9  ;;  %v498_v9 = vsub.s32 5, %v11755_v21 }
 0x2ce   :  { %5546 = vmatpush1.bf16.msra.mxu1 %v9835_v39 }
 0x2cf   :  { %5547 = vmatprep.subr.bf16.mxu1 %v9840_v40  ;;  %5675 = vmatpush1.bf16.msra.mxu0 %v9892_v10  ;;  %v9907_v10 = vld [vmem:[#allocation14 + $0x888] ss:$52 sps:$4 sm:$0xff]  }
 0x2d0   :  { %5676 = vmatprep.subr.bf16.mxu0 %v9900_v11  ;;  %v495_v11 = vrot.slane %v11763_v24, %v11791_v7 }
 0x2d2   :  { %5548 = vmatpush1.bf16.msra.mxu1 %v9838_v41 }
 0x2d3   :  { %5549 = vmatprep.subr.bf16.mxu1 %v9843_v42  ;;  %5677 = vmatpush1.bf16.msra.mxu0 %v9898_v12  ;;  %v503_v12 = vrot.slane %v11763_v24, %v502_v8 }
 0x2d4   :  { %5678 = vmatprep.subr.bf16.mxu0 %v9906_v13  ;;  %v9915_v13 = vld [vmem:[#allocation14 + $0x8f4] ss:$52 sps:$4 sm:$0xff]  }
 0x2d6   :  { %5550 = vmatpush1.bf16.msra.mxu1 %v9841_v43 }
 0x2d7   :  { %5551 = vmatprep.subr.bf16.mxu1 %v9846_v44  ;;  %5679 = vmatpush1.bf16.msra.mxu0 %v9904_v14  ;;  %v499_v14 = vrot.slane %v11763_v24, %v498_v9  ;;  %v9919_v24 = vld [vmem:[#allocation14 + $0x958] ss:$52 sps:$4 sm:$0xff]  }
 0x2d8   :  { %5680 = vmatprep.subr.bf16.mxu0 %v9912_v15 }
 0x2da   :  { %5552 = vmatpush1.bf16.msra.mxu1 %v9844_v45 }
 0x2db   :  { %5553 = vmatprep.subr.bf16.mxu1 %v9849_v46  ;;  %5681 = vmatpush1.bf16.msra.mxu0 %v9910_v16 }
 0x2dc   :  { %5682 = vmatprep.subr.bf16.mxu0 %v9918_v17  ;;  %v9913_v17 = vld [vmem:[#allocation14 + $0x8f0] ss:$52 sps:$4 sm:$0xff]  }
 0x2de   :  { %5554 = vmatpush1.bf16.msra.mxu1 %v9847_v47 }
 0x2df   :  { %5555 = vmatprep.subr.bf16.mxu1 %v9852_v48  ;;  %5683 = vmatpush1.bf16.msra.mxu0 %v9916_v18 }
 0x2e0   :  { %5883 = vmatprep.subr.bf16.mxu0 %v9924_v19 }
 0x2e2   :  { %5556 = vmatpush1.bf16.msra.mxu1 %v9850_v49 }
 0x2e3   :  { %5557 = vmatprep.subr.bf16.mxu1 %v9855_v50 }
 0x2e6   :  { %5558 = vmatpush1.bf16.msra.mxu1 %v9853_v51 }
 0x2e7   :  { %5559 = vmatprep.subr.bf16.mxu1 %v9858_v52 }
 0x2ea   :  { %5560 = vmatpush1.bf16.msra.mxu1 %v9856_v53 }
 0x2eb   :  { %5561 = vmatprep.subr.bf16.mxu1 %v9861_v54 }
 0x2ee   :  { %5562 = vmatpush1.bf16.msra.mxu1 %v9859_v55 }
 0x2ef   :  { %5563 = vmatprep.subr.bf16.mxu1 %v9864_v56 }
 0x2f2   :  { %5564 = vmatpush1.bf16.msra.mxu1 %v9862_v57 }
 0x2f3   :  { %5565 = vmatprep.subr.bf16.mxu1 %v9867_v58 }
 0x2f6   :  { %5566 = vmatpush1.bf16.msra.mxu1 %v9865_v59  ;;  %v9877_v59 = vld [vmem:[#allocation14 + $0x680] ss:$52 sps:$4 sm:$0xff]  }
 0x2f7   :  { %5567 = vmatprep.subr.bf16.mxu1 %v9870_v60  ;;  %v9885_v60 = vld [vmem:[#allocation14 + $0x6ec] ss:$52 sps:$4 sm:$0xff]  }
 0x2fa   :  { %5568 = vmatpush1.bf16.msra.mxu1 %v9868_v62  ;;  %v9883_v62 = vld [vmem:[#allocation14 + $0x6e8] ss:$52 sps:$4 sm:$0xff]  }
 0x2fb   :  { %5569 = vmatprep.subr.bf16.mxu1 %v9873_v63  ;;  %v9891_v63 = vld [vmem:[#allocation14 + $0x754] ss:$52 sps:$4 sm:$0xff]  }
 0x2fe   :  { %5570 = vmatpush1.bf16.msra.mxu1 %v9871_v1  ;;  %v9889_v1 = vld [vmem:[#allocation14 + $0x750] ss:$52 sps:$4 sm:$0xff]  }
 0x2ff   :  { %5582 = vmatprep.subr.bf16.mxu1 %v9879_v4  ;;  %v9903_v4 = vld [vmem:[#allocation14 + $0x824] ss:$52 sps:$4 sm:$0xff]  }
 0x374   :  { %v833_v31 = vpop.f32.mrb[4].mxu0  ;;  %v876_v32 = vpop.f32.mrb[4].mxu1 }
 0x375   :  { %v834_v33 = vadd.f32 %v833_v31, %v479_v27  ;;  %v877_v34 = vadd.f32 %v876_v32, %v487_v28  ;;  %v835_v35 = vpop.f32.mrb[5].mxu0  ;;  %v878_v36 = vpop.f32.mrb[5].mxu1 }
 0x376   :  { %v836_v37 = vadd.f32 %v835_v35, %v483_v29  ;;  %v879_v38 = vadd.f32 %v878_v36, %v491_v30  ;;  %v837_v39 = vpop.f32.mrb[6].mxu0  ;;  %v880_v40 = vpop.f32.mrb[6].mxu1 }
 0x377   :  { %v838_v41 = vadd.f32 %v837_v39, %v479_v27  ;;  %v881_v42 = vadd.f32 %v880_v40, %v487_v28  ;;  %v839_v43 = vpop.f32.mrb[7].mxu0  ;;  %v882_v44 = vpop.f32.mrb[7].mxu1  ;;  %v969_v47 = vmax.f32 %v834_v33, 0.0  ;;  %v971_v48 = vmax.f32 %v877_v34, 0.0  ;;  %v9921_v28 = vld [vmem:[#allocation14 + $0x95c] ss:$52 sps:$4 sm:$0xff]  }
 0x378   :  { %v840_v45 = vadd.f32 %v839_v43, %v483_v29  ;;  %v883_v46 = vadd.f32 %v882_v44, %v491_v30  ;;  %v970_v51 = vmax.f32 %v836_v37, 0.0  ;;  %v972_v52 = vmax.f32 %v879_v38, 0.0  ;;  %v9922_v44 = vld [vmem:[#allocation14 + $0x10] ss:$52 sps:$4 sm:$0xff]  }
 0x379   :  { %v976_v49 = vmax.f32 %v838_v41, 0.0  ;;  %v978_v50 = vmax.f32 %v881_v42, 0.0  ;;  %v9927_v41 = vld [vmem:[#allocation14 + $0x9c4] ss:$52 sps:$4 sm:$0xff]  }
 0x37a   :  { %v977_v53 = vmax.f32 %v840_v45, 0.0  ;;  %v979_v54 = vmax.f32 %v883_v46, 0.0 }
 0x37b   :  { %v11779_v55 = vpack.c.bf16 %v976_v49, %v969_v47  ;;  %v11781_v56 = vpack.c.bf16 %v978_v50, %v971_v48  ;;  %v9930_v47 = vld [vmem:[#allocation14 + $0x7c] ss:$52 sps:$4 sm:$0xff]   ;;  %v9925_v49 = vld [vmem:[#allocation14 + $0x9c0] ss:$52 sps:$4 sm:$0xff]  }
 0x37c   :  { %v11783_v57 = vpack.c.bf16 %v977_v53, %v970_v51  ;;  %v11785_v58 = vpack.c.bf16 %v979_v54, %v972_v52  ;;  %v9933_v50 = vld [vmem:[#allocation14 + $0xa2c] ss:$52 sps:$4 sm:$0xff]   ;;  %v9936_v52 = vld [vmem:[#allocation14 + $0xe4] ss:$52 sps:$4 sm:$0xff]   ;;  %v9931_v53 = vld [vmem:[#allocation14 + $0xa28] ss:$52 sps:$4 sm:$0xff]  }
 0x37d   :  { %v9928_v51 = vld [vmem:[#allocation14 + $0x78] ss:$52 sps:$4 sm:$0xff]   ;;  %v9939_v54 = vld [vmem:[#allocation14 + $0xa94] ss:$52 sps:$4 sm:$0xff]  }
 0x37e   :  { %5571 = vmatprep.mubr.bf16.mxu1 %v11783_v57 }
 0x37f   :  { %5572 = vmatmul.mubr.bf16.vlgmr.msra.gmra.mrb[12].mxu1 %v11779_v55 }
 0x380   :  { %5583 = vmatpush1.bf16.msra.mxu1 %v9877_v59  ;;  %5614 = vmatprep.mubr.bf16.mxu1 %v11785_v58  ;;  %v9934_v59 = vld [vmem:[#allocation14 + $0xe0] ss:$52 sps:$4 sm:$0xff]  }
 0x381   :  { %5584 = vmatprep.subr.bf16.mxu1 %v9885_v60  ;;  %v9942_v60 = vld [vmem:[#allocation14 + $0x14c] ss:$52 sps:$4 sm:$0xff]  }
 0x384   :  { %5585 = vmatpush1.bf16.msra.mxu1 %v9883_v62  ;;  %v9937_v62 = vld [vmem:[#allocation14 + $0xa90] ss:$52 sps:$4 sm:$0xff]  }
 0x385   :  { %5586 = vmatprep.subr.bf16.mxu1 %v9891_v63  ;;  %v9945_v63 = vld [vmem:[#allocation14 + $0xafc] ss:$52 sps:$4 sm:$0xff]  }
 0x388   :  { %5587 = vmatpush1.bf16.msra.mxu1 %v9889_v1  ;;  %v9940_v1 = vld [vmem:[#allocation14 + $0x148] ss:$52 sps:$4 sm:$0xff]  }
 0x389   :  { %5588 = vmatprep.subr.bf16.mxu1 %v9897_v2  ;;  %v9948_v2 = vld [vmem:[#allocation14 + $0x1b4] ss:$52 sps:$4 sm:$0xff]  }
 0x38c   :  { %5589 = vmatpush1.bf16.msra.mxu1 %v9895_v3  ;;  %v9943_v3 = vld [vmem:[#allocation14 + $0xaf8] ss:$52 sps:$4 sm:$0xff]  }
 0x38d   :  { %5590 = vmatprep.subr.bf16.mxu1 %v9903_v4  ;;  %v9951_v4 = vld [vmem:[#allocation14 + $0xb64] ss:$52 sps:$4 sm:$0xff]  }
 0x390   :  { %5591 = vmatpush1.bf16.msra.mxu1 %v9901_v5  ;;  %v9946_v5 = vld [vmem:[#allocation14 + $0x1b0] ss:$52 sps:$4 sm:$0xff]  }
 0x391   :  { %5592 = vmatprep.subr.bf16.mxu1 %v9909_v6  ;;  %v9954_v6 = vld [vmem:[#allocation14 + $0x21c] ss:$52 sps:$4 sm:$0xff]  }
 0x394   :  { %v919_v15 = vpop.f32.mrb[8].mxu0  ;;  %v962_v16 = vpop.f32.mrb[8].mxu1  ;;  %5593 = vmatpush1.bf16.msra.mxu1 %v9907_v10  ;;  %v9949_v10 = vld [vmem:[#allocation14 + $0xb60] ss:$52 sps:$4 sm:$0xff]  }
 0x395   :  { %v920_v18 = vadd.f32 %v919_v15, %v495_v11  ;;  %v963_v19 = vadd.f32 %v962_v16, %v503_v12  ;;  %v921_v20 = vpop.f32.mrb[9].mxu0  ;;  %v9559_v27 = vpop.f32.mrb[9].mxu1  ;;  %5594 = vmatprep.subr.bf16.mxu1 %v9915_v13  ;;  %v9960_v13 = vld [vmem:[#allocation14 + $0x284] ss:$52 sps:$4 sm:$0xff]   ;;  %v9963_v15 = vld [vmem:[#allocation14 + $0xc34] ss:$52 sps:$4 sm:$0xff]  }
 0x396   :  { %v922_v29 = vadd.f32 %v921_v20, %v499_v14  ;;  %v923_v30 = vpop.f32.mrb[10].mxu0  ;;  %v965_v31 = vpop.f32.mrb[10].mxu1  ;;  %v9958_v16 = vld [vmem:[#allocation14 + $0x280] ss:$52 sps:$4 sm:$0xff]   ;;  %v9964_v20 = vld [vmem:[#allocation14 + $0x2e8] ss:$52 sps:$4 sm:$0xff]  }
 0x397   :  { %v924_v32 = vadd.f32 %v923_v30, %v495_v11  ;;  %v966_v33 = vadd.f32 %v965_v31, %v503_v12  ;;  %v925_v34 = vpop.f32.mrb[11].mxu0  ;;  %v9560_v35 = vpop.f32.mrb[11].mxu1  ;;  %v973_v37 = vmax.f32 %v920_v18, 0.0  ;;  %v975_v38 = vmax.f32 %v963_v19, 0.0  ;;  %v9957_v11 = vld [vmem:[#allocation14 + $0xbcc] ss:$52 sps:$4 sm:$0xff]  }
 0x398   :  { %v926_v36 = vadd.f32 %v925_v34, %v499_v14  ;;  %5595 = vmatpush1.bf16.msra.mxu1 %v9913_v17  ;;  %v974_v42 = vmax.f32 %v922_v29, 0.0  ;;  %v9952_v12 = vld [vmem:[#allocation14 + $0x218] ss:$52 sps:$4 sm:$0xff]   ;;  %v9955_v14 = vld [vmem:[#allocation14 + $0xbc8] ss:$52 sps:$4 sm:$0xff]  }
 0x399   :  { %v980_v39 = vmax.f32 %v924_v32, 0.0  ;;  %v982_v40 = vmax.f32 %v966_v33, 0.0  ;;  %5596 = vmatprep.subr.bf16.mxu1 %v9921_v28  ;;  %v9966_v17 = vld [vmem:[#allocation14 + $0x2ec] ss:$52 sps:$4 sm:$0xff]   ;;  %v9961_v18 = vld [vmem:[#allocation14 + $0xc30] ss:$52 sps:$4 sm:$0xff]  }
 0x39a   :  { %v981_v43 = vmax.f32 %v926_v36, 0.0  ;;  %v9969_v19 = vld [vmem:[#allocation14 + $0xc9c] ss:$52 sps:$4 sm:$0xff]   ;;  %v9972_v27 = vld [vmem:[#allocation14 + $0x354] ss:$52 sps:$4 sm:$0xff]  }
 0x39b   :  { %v11803_v45 = vpack.c.bf16 %v980_v39, %v973_v37  ;;  %v11805_v46 = vpack.c.bf16 %v982_v40, %v975_v38  ;;  %v9967_v28 = vld [vmem:[#allocation14 + $0xc98] ss:$52 sps:$4 sm:$0xff]   ;;  %v9970_v30 = vld [vmem:[#allocation14 + $0x350] ss:$52 sps:$4 sm:$0xff]   ;;  %v9973_v32 = vld [vmem:[#allocation14 + $0xd00] ss:$52 sps:$4 sm:$0xff]  }
 0x39c   :  { %v11807_v48 = vpack.c.bf16 %v981_v43, %v974_v42  ;;  %5597 = vmatpush1.bf16.msra.mxu1 %v9919_v24  ;;  %v9975_v29 = vld [vmem:[#allocation14 + $0xd04] ss:$52 sps:$4 sm:$0xff]   ;;  %v9978_v31 = vld [vmem:[#allocation14 + $0x3bc] ss:$52 sps:$4 sm:$0xff]   ;;  %v9981_v33 = vld [vmem:[#allocation14 + $0xd6c] ss:$52 sps:$4 sm:$0xff]  }
 0x39d   :  { %5701 = vmatmul.mubr.bf16.vlgmr.msra.gmra.mrb[12].mxu0 %v11805_v46  ;;  %5598 = vmatprep.subr.bf16.mxu1 %v9927_v41  ;;  %v9976_v34 = vld [vmem:[#allocation14 + $0x3b8] ss:$52 sps:$4 sm:$0xff]   ;;  %v9979_v36 = vld [vmem:[#allocation14 + $0xd68] ss:$52 sps:$4 sm:$0xff]   ;;  %v9982_v37 = vld [vmem:[#allocation14 + $0x420] ss:$52 sps:$4 sm:$0xff]  }
 0x39e   :  { %5884 = vmatpush1.bf16.msra.mxu0 %v9922_v44  ;;  %5915 = vmatprep.mubr.bf16.mxu0 %v11783_v57  ;;  %v9984_v35 = vld [vmem:[#allocation14 + $0x424] ss:$52 sps:$4 sm:$0xff]   ;;  %v9987_v24 = vld [vmem:[#allocation14 + $0xdd4] ss:$52 sps:$4 sm:$0xff]   ;;  %v9990_v38 = vld [vmem:[#allocation14 + $0x48c] ss:$52 sps:$4 sm:$0xff]  }
 0x39f   :  { %5885 = vmatprep.subr.bf16.mxu0 %v9930_v47  ;;  %v9985_v39 = vld [vmem:[#allocation14 + $0xdd0] ss:$52 sps:$4 sm:$0xff]   ;;  %v9988_v41 = vld [vmem:[#allocation14 + $0x488] ss:$52 sps:$4 sm:$0xff]   ;;  %v9991_v43 = vld [vmem:[#allocation14 + $0xe38] ss:$52 sps:$4 sm:$0xff]  }
 0x3a0   :  { %5599 = vmatpush1.bf16.msra.mxu1 %v9925_v49  ;;  %v9993_v40 = vld [vmem:[#allocation14 + $0xe3c] ss:$52 sps:$4 sm:$0xff]   ;;  %v9996_v42 = vld [vmem:[#allocation14 + $0x4f4] ss:$52 sps:$4 sm:$0xff]   ;;  %v9999_v44 = vld [vmem:[#allocation14 + $0xea4] ss:$52 sps:$4 sm:$0xff]  }
 0x3a1   :  { %5600 = vmatprep.subr.bf16.mxu1 %v9933_v50  ;;  %v9994_v47 = vld [vmem:[#allocation14 + $0x4f0] ss:$52 sps:$4 sm:$0xff]   ;;  %v9997_v50 = vld [vmem:[#allocation14 + $0xea0] ss:$52 sps:$4 sm:$0xff]  }
 0x3a2   :  { %5886 = vmatpush1.bf16.msra.mxu0 %v9928_v51  ;;  %v10002_v49 = vld [vmem:[#allocation14 + $0x55c] ss:$52 sps:$4 sm:$0xff]   ;;  %v10005_v51 = vld [vmem:[#allocation14 + $0xf0c] ss:$52 sps:$4 sm:$0xff]  }
 0x3a3   :  { %5887 = vmatprep.subr.bf16.mxu0 %v9936_v52  ;;  %v10000_v52 = vld [vmem:[#allocation14 + $0x558] ss:$52 sps:$4 sm:$0xff]  }
 0x3a4   :  { %5601 = vmatpush1.bf16.msra.mxu1 %v9931_v53  ;;  %v10008_v53 = vld [vmem:[#allocation14 + $0x5c4] ss:$52 sps:$4 sm:$0xff]  }
 0x3a5   :  { %5602 = vmatprep.subr.bf16.mxu1 %v9939_v54  ;;  %v10003_v54 = vld [vmem:[#allocation14 + $0xf08] ss:$52 sps:$4 sm:$0xff]  }
 0x3a6   :  { %5888 = vmatpush1.bf16.msra.mxu0 %v9934_v59  ;;  %v10011_v59 = vld [vmem:[#allocation14 + $0xf74] ss:$52 sps:$4 sm:$0xff]  }
 0x3a7   :  { %5889 = vmatprep.subr.bf16.mxu0 %v9942_v60  ;;  %v10006_v60 = vld [vmem:[#allocation14 + $0x5c0] ss:$52 sps:$4 sm:$0xff]  }
 0x3a8   :  { %5603 = vmatpush1.bf16.msra.mxu1 %v9937_v62  ;;  %v10014_v62 = vld [vmem:[#allocation14 + $0x62c] ss:$52 sps:$4 sm:$0xff]  }
 0x3a9   :  { %5604 = vmatprep.subr.bf16.mxu1 %v9945_v63  ;;  %v10009_v63 = vld [vmem:[#allocation14 + $0xf70] ss:$52 sps:$4 sm:$0xff]  }
 0x3aa   :  { %5890 = vmatpush1.bf16.msra.mxu0 %v9940_v1  ;;  %v10017_v1 = vld [vmem:[#allocation14 + $0xfdc] ss:$52 sps:$4 sm:$0xff]  }
 0x3ab   :  { %5891 = vmatprep.subr.bf16.mxu0 %v9948_v2  ;;  %v10012_v2 = vld [vmem:[#allocation14 + $0x628] ss:$52 sps:$4 sm:$0xff]  }
 0x3ac   :  { %5605 = vmatpush1.bf16.msra.mxu1 %v9943_v3  ;;  %v10020_v3 = vld [vmem:[#allocation14 + $0x694] ss:$52 sps:$4 sm:$0xff]  }
 0x3ad   :  { %5606 = vmatprep.subr.bf16.mxu1 %v9951_v4  ;;  %v10015_v4 = vld [vmem:[#allocation14 + $0xfd8] ss:$52 sps:$4 sm:$0xff]  }
 0x3ae   :  { %5892 = vmatpush1.bf16.msra.mxu0 %v9946_v5  ;;  %v10023_v5 = vld [vmem:[#allocation14 + $0x1044] ss:$52 sps:$4 sm:$0xff]  }
 0x3af   :  { %5893 = vmatprep.subr.bf16.mxu0 %v9954_v6  ;;  %v10018_v6 = vld [vmem:[#allocation14 + $0x690] ss:$52 sps:$4 sm:$0xff]  }
 0x3b0   :  { %5607 = vmatpush1.bf16.msra.mxu1 %v9949_v10  ;;  %v10026_v10 = vld [vmem:[#allocation14 + $0x6fc] ss:$52 sps:$4 sm:$0xff]  }
 0x3b1   :  { %5608 = vmatprep.subr.bf16.mxu1 %v9957_v11  ;;  %v10021_v11 = vld [vmem:[#allocation14 + $0x1040] ss:$52 sps:$4 sm:$0xff]  }
 0x3b2   :  { %5894 = vmatpush1.bf16.msra.mxu0 %v9952_v12  ;;  %v10029_v12 = vld [vmem:[#allocation14 + $0x10ac] ss:$52 sps:$4 sm:$0xff]  }
 0x3b3   :  { %5895 = vmatprep.subr.bf16.mxu0 %v9960_v13  ;;  %v10024_v13 = vld [vmem:[#allocation14 + $0x6f8] ss:$52 sps:$4 sm:$0xff]  }
 0x3b4   :  { %5609 = vmatpush1.bf16.msra.mxu1 %v9955_v14  ;;  %v10032_v14 = vld [vmem:[#allocation14 + $0x764] ss:$52 sps:$4 sm:$0xff]  }
 0x3b5   :  { %5610 = vmatprep.subr.bf16.mxu1 %v9963_v15  ;;  %v10027_v15 = vld [vmem:[#allocation14 + $0x10a8] ss:$52 sps:$4 sm:$0xff]  }
 0x3b6   :  { %5896 = vmatpush1.bf16.msra.mxu0 %v9958_v16  ;;  %v10035_v16 = vld [vmem:[#allocation14 + $0x1114] ss:$52 sps:$4 sm:$0xff]  }
 0x3b7   :  { %5897 = vmatprep.subr.bf16.mxu0 %v9966_v17  ;;  %v10030_v17 = vld [vmem:[#allocation14 + $0x760] ss:$52 sps:$4 sm:$0xff]  }
 0x3b8   :  { %5611 = vmatpush1.bf16.msra.mxu1 %v9961_v18  ;;  %v10038_v18 = vld [vmem:[#allocation14 + $0x7cc] ss:$52 sps:$4 sm:$0xff]  }
 0x3b9   :  { %5612 = vmatprep.subr.bf16.mxu1 %v9969_v19  ;;  %v10033_v19 = vld [vmem:[#allocation14 + $0x1110] ss:$52 sps:$4 sm:$0xff]  }
 0x3ba   :  { %5898 = vmatpush1.bf16.msra.mxu0 %v9964_v20  ;;  %v10041_v20 = vld [vmem:[#allocation14 + $0x117c] ss:$52 sps:$4 sm:$0xff]  }
 0x3bb   :  { %5899 = vmatprep.subr.bf16.mxu0 %v9972_v27  ;;  %v10036_v27 = vld [vmem:[#allocation14 + $0x7c8] ss:$52 sps:$4 sm:$0xff]  }
 0x3bc   :  { %5613 = vmatpush1.bf16.msra.mxu1 %v9967_v28  ;;  %v10044_v28 = vld [vmem:[#allocation14 + $0x834] ss:$52 sps:$4 sm:$0xff]  }
 0x3bd   :  { %5625 = vmatprep.subr.bf16.mxu1 %v9975_v29  ;;  %v10039_v29 = vld [vmem:[#allocation14 + $0x1178] ss:$52 sps:$4 sm:$0xff]  }
 0x3be   :  { %5900 = vmatpush1.bf16.msra.mxu0 %v9970_v30  ;;  %v10047_v30 = vld [vmem:[#allocation14 + $0x11e4] ss:$52 sps:$4 sm:$0xff]  }
 0x3bf   :  { %5615 = vmatmul.mubr.bf16.vlgmr.msra.gmra.mrb[12].mxu1 %v11781_v56  ;;  %5901 = vmatprep.subr.bf16.mxu0 %v9978_v31  ;;  %v10042_v31 = vld [vmem:[#allocation14 + $0x830] ss:$52 sps:$4 sm:$0xff]  }
 0x3c0   :  { %5626 = vmatpush1.bf16.msra.mxu1 %v9973_v32  ;;  %5657 = vmatprep.mubr.bf16.mxu1 %v11807_v48  ;;  %v10050_v32 = vld [vmem:[#allocation14 + $0x89c] ss:$52 sps:$4 sm:$0xff]  }
 0x3c1   :  { %5627 = vmatprep.subr.bf16.mxu1 %v9981_v33  ;;  %v10045_v33 = vld [vmem:[#allocation14 + $0x11e0] ss:$52 sps:$4 sm:$0xff]  }
 0x3c2   :  { %5902 = vmatpush1.bf16.msra.mxu0 %v9976_v34  ;;  %v10053_v34 = vld [vmem:[#allocation14 + $0x124c] ss:$52 sps:$4 sm:$0xff]  }
 0x3c3   :  { %5903 = vmatprep.subr.bf16.mxu0 %v9984_v35  ;;  %v10048_v35 = vld [vmem:[#allocation14 + $0x898] ss:$52 sps:$4 sm:$0xff]  }
 0x3c4   :  { %5628 = vmatpush1.bf16.msra.mxu1 %v9979_v36  ;;  %v10056_v36 = vld [vmem:[#allocation14 + $0x904] ss:$52 sps:$4 sm:$0xff]  }
 0x3c5   :  { %5629 = vmatprep.subr.bf16.mxu1 %v9987_v24  ;;  %v10051_v24 = vld [vmem:[#allocation14 + $0x1248] ss:$52 sps:$4 sm:$0xff]  }
 0x3c6   :  { %5904 = vmatpush1.bf16.msra.mxu0 %v9982_v37  ;;  %v10059_v37 = vld [vmem:[#allocation14 + $0x12b4] ss:$52 sps:$4 sm:$0xff]  }
 0x3c7   :  { %5905 = vmatprep.subr.bf16.mxu0 %v9990_v38  ;;  %v10054_v38 = vld [vmem:[#allocation14 + $0x900] ss:$52 sps:$4 sm:$0xff]  }
 0x3c8   :  { %5630 = vmatpush1.bf16.msra.mxu1 %v9985_v39  ;;  %v10062_v39 = vld [vmem:[#allocation14 + $0x96c] ss:$52 sps:$4 sm:$0xff]  }
 0x3c9   :  { %5631 = vmatprep.subr.bf16.mxu1 %v9993_v40  ;;  %v10057_v40 = vld [vmem:[#allocation14 + $0x12b0] ss:$52 sps:$4 sm:$0xff]  }
 0x3ca   :  { %5906 = vmatpush1.bf16.msra.mxu0 %v9988_v41  ;;  %v10065_v41 = vld [vmem:[#allocation14 + $0x131c] ss:$52 sps:$4 sm:$0xff]  }
 0x3cb   :  { %5907 = vmatprep.subr.bf16.mxu0 %v9996_v42  ;;  %v10060_v42 = vld [vmem:[#allocation14 + $0x968] ss:$52 sps:$4 sm:$0xff]  }
 0x3cc   :  { %5632 = vmatpush1.bf16.msra.mxu1 %v9991_v43  ;;  %v10068_v43 = vld [vmem:[#allocation14 + $0x9d4] ss:$52 sps:$4 sm:$0xff]  }
 0x3cd   :  { %5633 = vmatprep.subr.bf16.mxu1 %v9999_v44  ;;  %v10063_v44 = vld [vmem:[#allocation14 + $0x1318] ss:$52 sps:$4 sm:$0xff]  }
 0x3ce   :  { %5908 = vmatpush1.bf16.msra.mxu0 %v9994_v47  ;;  %v10071_v47 = vld [vmem:[#allocation14 + $0xc] ss:$52 sps:$4 sm:$0xff]  }
 0x3cf   :  { %5909 = vmatprep.subr.bf16.mxu0 %v10002_v49  ;;  %v10066_v49 = vld [vmem:[#allocation14 + $0x9d0] ss:$52 sps:$4 sm:$0xff]  }
 0x3d0   :  { %5634 = vmatpush1.bf16.msra.mxu1 %v9997_v50  ;;  %v10074_v50 = vld [vmem:[#allocation14 + $0xa3c] ss:$52 sps:$4 sm:$0xff]  }
 0x3d1   :  { %5635 = vmatprep.subr.bf16.mxu1 %v10005_v51  ;;  %v10069_v51 = vld [vmem:[#allocation14 + $0x8] ss:$52 sps:$4 sm:$0xff]  }
 0x3d2   :  { %5910 = vmatpush1.bf16.msra.mxu0 %v10000_v52  ;;  %v10077_v52 = vld [vmem:[#allocation14 + $0x74] ss:$52 sps:$4 sm:$0xff]  }
 0x3d3   :  { %5911 = vmatprep.subr.bf16.mxu0 %v10008_v53  ;;  %v10072_v53 = vld [vmem:[#allocation14 + $0xa38] ss:$52 sps:$4 sm:$0xff]  }
 0x3d4   :  { %5636 = vmatpush1.bf16.msra.mxu1 %v10003_v54  ;;  %v10080_v54 = vld [vmem:[#allocation14 + $0xaa4] ss:$52 sps:$4 sm:$0xff]  }
 0x3d5   :  { %5637 = vmatprep.subr.bf16.mxu1 %v10011_v59  ;;  %v10075_v59 = vld [vmem:[#allocation14 + $0x70] ss:$52 sps:$4 sm:$0xff]  }
 0x3d6   :  { %5912 = vmatpush1.bf16.msra.mxu0 %v10006_v60  ;;  %v10083_v60 = vld [vmem:[#allocation14 + $0xdc] ss:$52 sps:$4 sm:$0xff]  }
 0x3d7   :  { %5913 = vmatprep.subr.bf16.mxu0 %v10014_v62  ;;  %v10078_v62 = vld [vmem:[#allocation14 + $0xaa0] ss:$52 sps:$4 sm:$0xff]  }
 0x3d8   :  { %5638 = vmatpush1.bf16.msra.mxu1 %v10009_v63  ;;  %v10086_v63 = vld [vmem:[#allocation14 + $0xb0c] ss:$52 sps:$4 sm:$0xff]  }
 0x3d9   :  { %5639 = vmatprep.subr.bf16.mxu1 %v10017_v1  ;;  %v10081_v1 = vld [vmem:[#allocation14 + $0xd8] ss:$52 sps:$4 sm:$0xff]  }
 0x3da   :  { %5914 = vmatpush1.bf16.msra.mxu0 %v10012_v2  ;;  %v10089_v2 = vld [vmem:[#allocation14 + $0x144] ss:$52 sps:$4 sm:$0xff]  }
 0x3db   :  { %5926 = vmatprep.subr.bf16.mxu0 %v10020_v3  ;;  %v10084_v3 = vld [vmem:[#allocation14 + $0xb08] ss:$52 sps:$4 sm:$0xff]  }
 0x3dc   :  { %5640 = vmatpush1.bf16.msra.mxu1 %v10015_v4  ;;  %v10092_v4 = vld [vmem:[#allocation14 + $0xb74] ss:$52 sps:$4 sm:$0xff]  }
 0x3dd   :  { %5916 = vmatmul.mubr.bf16.vlgmr.msra.gmra.mrb[16].mxu0 %v11779_v55  ;;  %5641 = vmatprep.subr.bf16.mxu1 %v10023_v5  ;;  %v10087_v5 = vld [vmem:[#allocation14 + $0x140] ss:$52 sps:$4 sm:$0xff]  }
 0x3de   :  { %5927 = vmatpush1.bf16.msra.mxu0 %v10018_v6  ;;  %5958 = vmatprep.mubr.bf16.mxu0 %v11785_v58  ;;  %v10095_v6 = vld [vmem:[#allocation14 + $0x1ac] ss:$52 sps:$4 sm:$0xff]  }
 0x3df   :  { %5928 = vmatprep.subr.bf16.mxu0 %v10026_v10  ;;  %v10090_v10 = vld [vmem:[#allocation14 + $0xb70] ss:$52 sps:$4 sm:$0xff]  }
 0x3e0   :  { %5642 = vmatpush1.bf16.msra.mxu1 %v10021_v11  ;;  %v10098_v11 = vld [vmem:[#allocation14 + $0xbdc] ss:$52 sps:$4 sm:$0xff]  }
 0x3e1   :  { %5643 = vmatprep.subr.bf16.mxu1 %v10029_v12  ;;  %v10093_v12 = vld [vmem:[#allocation14 + $0x1a8] ss:$52 sps:$4 sm:$0xff]  }
 0x3e2   :  { %5929 = vmatpush1.bf16.msra.mxu0 %v10024_v13  ;;  %v10101_v13 = vld [vmem:[#allocation14 + $0x214] ss:$52 sps:$4 sm:$0xff]  }
 0x3e3   :  { %5930 = vmatprep.subr.bf16.mxu0 %v10032_v14  ;;  %v10096_v14 = vld [vmem:[#allocation14 + $0xbd8] ss:$52 sps:$4 sm:$0xff]  }
 0x3e4   :  { %5644 = vmatpush1.bf16.msra.mxu1 %v10027_v15  ;;  %v10104_v15 = vld [vmem:[#allocation14 + $0xc44] ss:$52 sps:$4 sm:$0xff]  }
 0x3e5   :  { %5645 = vmatprep.subr.bf16.mxu1 %v10035_v16  ;;  %v10099_v16 = vld [vmem:[#allocation14 + $0x210] ss:$52 sps:$4 sm:$0xff]  }
 0x3e6   :  { %5931 = vmatpush1.bf16.msra.mxu0 %v10030_v17  ;;  %v10107_v17 = vld [vmem:[#allocation14 + $0x27c] ss:$52 sps:$4 sm:$0xff]  }
 0x3e7   :  { %5932 = vmatprep.subr.bf16.mxu0 %v10038_v18  ;;  %v10102_v18 = vld [vmem:[#allocation14 + $0xc40] ss:$52 sps:$4 sm:$0xff]  }
 0x3e8   :  { %5646 = vmatpush1.bf16.msra.mxu1 %v10033_v19  ;;  %v10110_v19 = vld [vmem:[#allocation14 + $0xcac] ss:$52 sps:$4 sm:$0xff]  }
 0x3e9   :  { %5647 = vmatprep.subr.bf16.mxu1 %v10041_v20  ;;  %v10105_v20 = vld [vmem:[#allocation14 + $0x278] ss:$52 sps:$4 sm:$0xff]  }
 0x3ea   :  { %5933 = vmatpush1.bf16.msra.mxu0 %v10036_v27  ;;  %v10113_v27 = vld [vmem:[#allocation14 + $0x2e4] ss:$52 sps:$4 sm:$0xff]  }
 0x3eb   :  { %5934 = vmatprep.subr.bf16.mxu0 %v10044_v28  ;;  %v10108_v28 = vld [vmem:[#allocation14 + $0xca8] ss:$52 sps:$4 sm:$0xff]  }
 0x3ec   :  { %5648 = vmatpush1.bf16.msra.mxu1 %v10039_v29  ;;  %v10116_v29 = vld [vmem:[#allocation14 + $0xd14] ss:$52 sps:$4 sm:$0xff]  }
 0x3ed   :  { %5649 = vmatprep.subr.bf16.mxu1 %v10047_v30  ;;  %v10111_v30 = vld [vmem:[#allocation14 + $0x2e0] ss:$52 sps:$4 sm:$0xff]  }
 0x3ee   :  { %5935 = vmatpush1.bf16.msra.mxu0 %v10042_v31  ;;  %v10119_v31 = vld [vmem:[#allocation14 + $0x34c] ss:$52 sps:$4 sm:$0xff]  }
 0x3ef   :  { %5936 = vmatprep.subr.bf16.mxu0 %v10050_v32  ;;  %v10114_v32 = vld [vmem:[#allocation14 + $0xd10] ss:$52 sps:$4 sm:$0xff]  }
 0x3f0   :  { %5650 = vmatpush1.bf16.msra.mxu1 %v10045_v33  ;;  %v10122_v33 = vld [vmem:[#allocation14 + $0xd7c] ss:$52 sps:$4 sm:$0xff]  }
 0x3f1   :  { %5651 = vmatprep.subr.bf16.mxu1 %v10053_v34  ;;  %v10117_v34 = vld [vmem:[#allocation14 + $0x348] ss:$52 sps:$4 sm:$0xff]  }
 0x3f2   :  { %5937 = vmatpush1.bf16.msra.mxu0 %v10048_v35  ;;  %v10125_v35 = vld [vmem:[#allocation14 + $0x3b4] ss:$52 sps:$4 sm:$0xff]  }
 0x3f3   :  { %5938 = vmatprep.subr.bf16.mxu0 %v10056_v36  ;;  %v10120_v36 = vld [vmem:[#allocation14 + $0xd78] ss:$52 sps:$4 sm:$0xff]  }
 0x3f4   :  { %5652 = vmatpush1.bf16.msra.mxu1 %v10051_v24  ;;  %v10128_v24 = vld [vmem:[#allocation14 + $0xde4] ss:$52 sps:$4 sm:$0xff]  }
 0x3f5   :  { %5653 = vmatprep.subr.bf16.mxu1 %v10059_v37  ;;  %v10123_v37 = vld [vmem:[#allocation14 + $0x3b0] ss:$52 sps:$4 sm:$0xff]  }
 0x3f6   :  { %5939 = vmatpush1.bf16.msra.mxu0 %v10054_v38  ;;  %v10131_v38 = vld [vmem:[#allocation14 + $0x41c] ss:$52 sps:$4 sm:$0xff]  }
 0x3f7   :  { %5940 = vmatprep.subr.bf16.mxu0 %v10062_v39  ;;  %v10126_v39 = vld [vmem:[#allocation14 + $0xde0] ss:$52 sps:$4 sm:$0xff]  }
 0x3f8   :  { %5654 = vmatpush1.bf16.msra.mxu1 %v10057_v40  ;;  %v10134_v40 = vld [vmem:[#allocation14 + $0xe4c] ss:$52 sps:$4 sm:$0xff]  }
 0x3f9   :  { %5655 = vmatprep.subr.bf16.mxu1 %v10065_v41  ;;  %v10129_v41 = vld [vmem:[#allocation14 + $0x418] ss:$52 sps:$4 sm:$0xff]  }
 0x3fa   :  { %5941 = vmatpush1.bf16.msra.mxu0 %v10060_v42  ;;  %v10137_v42 = vld [vmem:[#allocation14 + $0x484] ss:$52 sps:$4 sm:$0xff]  }
 0x3fb   :  { %5942 = vmatprep.subr.bf16.mxu0 %v10068_v43  ;;  %v10132_v43 = vld [vmem:[#allocation14 + $0xe48] ss:$52 sps:$4 sm:$0xff]  }
 0x3fc   :  { %5656 = vmatpush1.bf16.msra.mxu1 %v10063_v44  ;;  %v10140_v44 = vld [vmem:[#allocation14 + $0xeb4] ss:$52 sps:$4 sm:$0xff]  }
 0x3fd   :  { %5711 = vmatprep.subr.bf16.mxu1 %v10071_v47  ;;  %v10135_v47 = vld [vmem:[#allocation14 + $0x480] ss:$52 sps:$4 sm:$0xff]  }
 0x3fe   :  { %5943 = vmatpush1.bf16.msra.mxu0 %v10066_v49  ;;  %v10143_v49 = vld [vmem:[#allocation14 + $0x4ec] ss:$52 sps:$4 sm:$0xff]  }
 0x3ff   :  { %5658 = vmatmul.mubr.bf16.vlgmr.msra.gmra.mrb[12].mxu1 %v11803_v45  ;;  %5944 = vmatprep.subr.bf16.mxu0 %v10074_v50  ;;  %v10138_v50 = vld [vmem:[#allocation14 + $0xeb0] ss:$52 sps:$4 sm:$0xff]  }
 0x400   :  { %5712 = vmatpush1.bf16.msra.mxu1 %v10069_v51  ;;  %5743 = vmatprep.mubr.bf16.mxu1 %v11783_v57  ;;  %v10146_v51 = vld [vmem:[#allocation14 + $0xf1c] ss:$52 sps:$4 sm:$0xff]  }
 0x401   :  { %5713 = vmatprep.subr.bf16.mxu1 %v10077_v52  ;;  %v10141_v52 = vld [vmem:[#allocation14 + $0x4e8] ss:$52 sps:$4 sm:$0xff]  }
 0x402   :  { %5945 = vmatpush1.bf16.msra.mxu0 %v10072_v53  ;;  %v10149_v53 = vld [vmem:[#allocation14 + $0x554] ss:$52 sps:$4 sm:$0xff]  }
 0x403   :  { %5946 = vmatprep.subr.bf16.mxu0 %v10080_v54  ;;  %v10144_v54 = vld [vmem:[#allocation14 + $0xf18] ss:$52 sps:$4 sm:$0xff]  }
 0x404   :  { %5714 = vmatpush1.bf16.msra.mxu1 %v10075_v59  ;;  %v10152_v59 = vld [vmem:[#allocation14 + $0xf84] ss:$52 sps:$4 sm:$0xff]  }
 0x405   :  { %5715 = vmatprep.subr.bf16.mxu1 %v10083_v60  ;;  %v10147_v60 = vld [vmem:[#allocation14 + $0x550] ss:$52 sps:$4 sm:$0xff]  }
 0x406   :  { %5947 = vmatpush1.bf16.msra.mxu0 %v10078_v62  ;;  %v10155_v62 = vld [vmem:[#allocation14 + $0x5bc] ss:$52 sps:$4 sm:$0xff]  }
 0x407   :  { %5948 = vmatprep.subr.bf16.mxu0 %v10086_v63  ;;  %v10150_v63 = vld [vmem:[#allocation14 + $0xf80] ss:$52 sps:$4 sm:$0xff]  }
 0x408   :  { %5716 = vmatpush1.bf16.msra.mxu1 %v10081_v1  ;;  %v10158_v1 = vld [vmem:[#allocation14 + $0xfec] ss:$52 sps:$4 sm:$0xff]  }
 0x409   :  { %5717 = vmatprep.subr.bf16.mxu1 %v10089_v2  ;;  %v10153_v2 = vld [vmem:[#allocation14 + $0x5b8] ss:$52 sps:$4 sm:$0xff]  }
 0x40a   :  { %5949 = vmatpush1.bf16.msra.mxu0 %v10084_v3  ;;  %v10161_v3 = vld [vmem:[#allocation14 + $0x624] ss:$52 sps:$4 sm:$0xff]  }
 0x40b   :  { %5950 = vmatprep.subr.bf16.mxu0 %v10092_v4  ;;  %v10156_v4 = vld [vmem:[#allocation14 + $0xfe8] ss:$52 sps:$4 sm:$0xff]  }
 0x40c   :  { %5718 = vmatpush1.bf16.msra.mxu1 %v10087_v5  ;;  %v10164_v5 = vld [vmem:[#allocation14 + $0x1054] ss:$52 sps:$4 sm:$0xff]  }
 0x40d   :  { %5719 = vmatprep.subr.bf16.mxu1 %v10095_v6  ;;  %v10159_v6 = vld [vmem:[#allocation14 + $0x620] ss:$52 sps:$4 sm:$0xff]  }
 0x40e   :  { %5951 = vmatpush1.bf16.msra.mxu0 %v10090_v10  ;;  %v10167_v10 = vld [vmem:[#allocation14 + $0x68c] ss:$52 sps:$4 sm:$0xff]  }
 0x40f   :  { %5952 = vmatprep.subr.bf16.mxu0 %v10098_v11  ;;  %v10162_v11 = vld [vmem:[#allocation14 + $0x1050] ss:$52 sps:$4 sm:$0xff]  }
 0x410   :  { %5720 = vmatpush1.bf16.msra.mxu1 %v10093_v12  ;;  %v10170_v12 = vld [vmem:[#allocation14 + $0x10bc] ss:$52 sps:$4 sm:$0xff]  }
 0x411   :  { %5721 = vmatprep.subr.bf16.mxu1 %v10101_v13  ;;  %v10165_v13 = vld [vmem:[#allocation14 + $0x688] ss:$52 sps:$4 sm:$0xff]  }
 0x412   :  { %5953 = vmatpush1.bf16.msra.mxu0 %v10096_v14  ;;  %v10173_v14 = vld [vmem:[#allocation14 + $0x6f4] ss:$52 sps:$4 sm:$0xff]  }
 0x413   :  { %5954 = vmatprep.subr.bf16.mxu0 %v10104_v15  ;;  %v10168_v15 = vld [vmem:[#allocation14 + $0x10b8] ss:$52 sps:$4 sm:$0xff]  }
 0x414   :  { %5722 = vmatpush1.bf16.msra.mxu1 %v10099_v16  ;;  %v10176_v16 = vld [vmem:[#allocation14 + $0x1124] ss:$52 sps:$4 sm:$0xff]  }
 0x415   :  { %5723 = vmatprep.subr.bf16.mxu1 %v10107_v17  ;;  %v10171_v17 = vld [vmem:[#allocation14 + $0x6f0] ss:$52 sps:$4 sm:$0xff]  }
 0x416   :  { %5955 = vmatpush1.bf16.msra.mxu0 %v10102_v18  ;;  %v10179_v18 = vld [vmem:[#allocation14 + $0x75c] ss:$52 sps:$4 sm:$0xff]  }
 0x417   :  { %5956 = vmatprep.subr.bf16.mxu0 %v10110_v19  ;;  %v10174_v19 = vld [vmem:[#allocation14 + $0x1120] ss:$52 sps:$4 sm:$0xff]  }
 0x418   :  { %5724 = vmatpush1.bf16.msra.mxu1 %v10105_v20  ;;  %v10182_v20 = vld [vmem:[#allocation14 + $0x118c] ss:$52 sps:$4 sm:$0xff]  }
 0x419   :  { %5725 = vmatprep.subr.bf16.mxu1 %v10113_v27  ;;  %v10177_v27 = vld [vmem:[#allocation14 + $0x758] ss:$52 sps:$4 sm:$0xff]  }
 0x41a   :  { %5957 = vmatpush1.bf16.msra.mxu0 %v10108_v28  ;;  %v10185_v28 = vld [vmem:[#allocation14 + $0x7c4] ss:$52 sps:$4 sm:$0xff]  }
 0x41b   :  { %5969 = vmatprep.subr.bf16.mxu0 %v10116_v29  ;;  %v10180_v29 = vld [vmem:[#allocation14 + $0x1188] ss:$52 sps:$4 sm:$0xff]  }
 0x41c   :  { %5726 = vmatpush1.bf16.msra.mxu1 %v10111_v30  ;;  %v10188_v30 = vld [vmem:[#allocation14 + $0x11f4] ss:$52 sps:$4 sm:$0xff]  }
 0x41d   :  { %5959 = vmatmul.mubr.bf16.vlgmr.msra.gmra.mrb[16].mxu0 %v11781_v56  ;;  %5727 = vmatprep.subr.bf16.mxu1 %v10119_v31  ;;  %v10183_v31 = vld [vmem:[#allocation14 + $0x7c0] ss:$52 sps:$4 sm:$0xff]  }
 0x41e   :  { %5970 = vmatpush1.bf16.msra.mxu0 %v10114_v32  ;;  %6001 = vmatprep.mubr.bf16.mxu0 %v11807_v48  ;;  %v10191_v32 = vld [vmem:[#allocation14 + $0x82c] ss:$52 sps:$4 sm:$0xff]  }
 0x41f   :  { %5971 = vmatprep.subr.bf16.mxu0 %v10122_v33  ;;  %v10186_v33 = vld [vmem:[#allocation14 + $0x11f0] ss:$52 sps:$4 sm:$0xff]  }
 0x420   :  { %5728 = vmatpush1.bf16.msra.mxu1 %v10117_v34  ;;  %v10194_v34 = vld [vmem:[#allocation14 + $0x125c] ss:$52 sps:$4 sm:$0xff]  }
 0x421   :  { %5729 = vmatprep.subr.bf16.mxu1 %v10125_v35  ;;  %v10189_v35 = vld [vmem:[#allocation14 + $0x828] ss:$52 sps:$4 sm:$0xff]  }
 0x422   :  { %5972 = vmatpush1.bf16.msra.mxu0 %v10120_v36  ;;  %v10197_v36 = vld [vmem:[#allocation14 + $0x894] ss:$52 sps:$4 sm:$0xff]  }
 0x423   :  { %5973 = vmatprep.subr.bf16.mxu0 %v10128_v24  ;;  %v10192_v24 = vld [vmem:[#allocation14 + $0x1258] ss:$52 sps:$4 sm:$0xff]  }
 0x424   :  { %5730 = vmatpush1.bf16.msra.mxu1 %v10123_v37  ;;  %v10200_v37 = vld [vmem:[#allocation14 + $0x12c4] ss:$52 sps:$4 sm:$0xff]  }
 0x425   :  { %5731 = vmatprep.subr.bf16.mxu1 %v10131_v38  ;;  %v10195_v38 = vld [vmem:[#allocation14 + $0x890] ss:$52 sps:$4 sm:$0xff]  }
 0x426   :  { %5974 = vmatpush1.bf16.msra.mxu0 %v10126_v39  ;;  %v10203_v39 = vld [vmem:[#allocation14 + $0x8fc] ss:$52 sps:$4 sm:$0xff]  }
 0x427   :  { %5975 = vmatprep.subr.bf16.mxu0 %v10134_v40  ;;  %v10198_v40 = vld [vmem:[#allocation14 + $0x12c0] ss:$52 sps:$4 sm:$0xff]  }
 0x428   :  { %5732 = vmatpush1.bf16.msra.mxu1 %v10129_v41  ;;  %v10206_v41 = vld [vmem:[#allocation14 + $0x132c] ss:$52 sps:$4 sm:$0xff]  }
 0x429   :  { %5733 = vmatprep.subr.bf16.mxu1 %v10137_v42  ;;  %v10201_v42 = vld [vmem:[#allocation14 + $0x8f8] ss:$52 sps:$4 sm:$0xff]  }
 0x42a   :  { %5976 = vmatpush1.bf16.msra.mxu0 %v10132_v43  ;;  %v10209_v43 = vld [vmem:[#allocation14 + $0x964] ss:$52 sps:$4 sm:$0xff]  }
 0x42b   :  { %5977 = vmatprep.subr.bf16.mxu0 %v10140_v44  ;;  %v10204_v44 = vld [vmem:[#allocation14 + $0x1328] ss:$52 sps:$4 sm:$0xff]  }
 0x42c   :  { %5734 = vmatpush1.bf16.msra.mxu1 %v10135_v47  ;;  %v10212_v47 = vld [vmem:[#allocation14 + $0x1394] ss:$52 sps:$4 sm:$0xff]  }
 0x42d   :  { %5735 = vmatprep.subr.bf16.mxu1 %v10143_v49  ;;  %v10207_v49 = vld [vmem:[#allocation14 + $0x960] ss:$52 sps:$4 sm:$0xff]  }
 0x42e   :  { %5978 = vmatpush1.bf16.msra.mxu0 %v10138_v50  ;;  %v10215_v50 = vld [vmem:[#allocation14 + $0x9cc] ss:$52 sps:$4 sm:$0xff]  }
 0x42f   :  { %5979 = vmatprep.subr.bf16.mxu0 %v10146_v51  ;;  %v10210_v51 = vld [vmem:[#allocation14 + $0x1390] ss:$52 sps:$4 sm:$0xff]  }
 0x430   :  { %5736 = vmatpush1.bf16.msra.mxu1 %v10141_v52  ;;  %v10218_v52 = vld [vmem:[#allocation14 + $0x13fc] ss:$52 sps:$4 sm:$0xff]  }
 0x431   :  { %5737 = vmatprep.subr.bf16.mxu1 %v10149_v53  ;;  %v10213_v53 = vld [vmem:[#allocation14 + $0x9c8] ss:$52 sps:$4 sm:$0xff]  }
 0x432   :  { %5980 = vmatpush1.bf16.msra.mxu0 %v10144_v54  ;;  %v10221_v54 = vld [vmem:[#allocation14 + $0xa34] ss:$52 sps:$4 sm:$0xff]  }
 0x433   :  { %5981 = vmatprep.subr.bf16.mxu0 %v10152_v59  ;;  %v10216_v59 = vld [vmem:[#allocation14 + $0x13f8] ss:$52 sps:$4 sm:$0xff]  }
 0x434   :  { %5738 = vmatpush1.bf16.msra.mxu1 %v10147_v60  ;;  %v10224_v60 = vld [vmem:[#allocation14 + $0x1464] ss:$52 sps:$4 sm:$0xff]  }
 0x435   :  { %5739 = vmatprep.subr.bf16.mxu1 %v10155_v62  ;;  %v10219_v62 = vld [vmem:[#allocation14 + $0xa30] ss:$52 sps:$4 sm:$0xff]  }
 0x436   :  { %5982 = vmatpush1.bf16.msra.mxu0 %v10150_v63  ;;  %v10227_v63 = vld [vmem:[#allocation14 + $0xa9c] ss:$52 sps:$4 sm:$0xff]  }
 0x437   :  { %5983 = vmatprep.subr.bf16.mxu0 %v10158_v1  ;;  %v10222_v1 = vld [vmem:[#allocation14 + $0x1460] ss:$52 sps:$4 sm:$0xff]  }
 0x438   :  { %5740 = vmatpush1.bf16.msra.mxu1 %v10153_v2  ;;  %v10230_v2 = vld [vmem:[#allocation14 + $0x14cc] ss:$52 sps:$4 sm:$0xff]  }
 0x439   :  { %5741 = vmatprep.subr.bf16.mxu1 %v10161_v3  ;;  %v10225_v3 = vld [vmem:[#allocation14 + $0xa98] ss:$52 sps:$4 sm:$0xff]  }
 0x43a   :  { %5984 = vmatpush1.bf16.msra.mxu0 %v10156_v4  ;;  %v10233_v4 = vld [vmem:[#allocation14 + $0xb04] ss:$52 sps:$4 sm:$0xff]  }
 0x43b   :  { %5985 = vmatprep.subr.bf16.mxu0 %v10164_v5  ;;  %v10228_v5 = vld [vmem:[#allocation14 + $0x14c8] ss:$52 sps:$4 sm:$0xff]  }
 0x43c   :  { %5742 = vmatpush1.bf16.msra.mxu1 %v10159_v6  ;;  %v10236_v6 = vld [vmem:[#allocation14 + $0x1534] ss:$52 sps:$4 sm:$0xff]  }
 0x43d   :  { %5754 = vmatprep.subr.bf16.mxu1 %v10167_v10  ;;  %v10231_v10 = vld [vmem:[#allocation14 + $0xb00] ss:$52 sps:$4 sm:$0xff]  }
 0x43e   :  { %5986 = vmatpush1.bf16.msra.mxu0 %v10162_v11  ;;  %v10239_v11 = vld [vmem:[#allocation14 + $0xb6c] ss:$52 sps:$4 sm:$0xff]  }
 0x43f   :  { %5744 = vmatmul.mubr.bf16.vlgmr.msra.gmra.mrb[16].mxu1 %v11779_v55  ;;  %5987 = vmatprep.subr.bf16.mxu0 %v10170_v12  ;;  %v10234_v12 = vld [vmem:[#allocation14 + $0x1530] ss:$52 sps:$4 sm:$0xff]  }
 0x440   :  { %5755 = vmatpush1.bf16.msra.mxu1 %v10165_v13  ;;  %5786 = vmatprep.mubr.bf16.mxu1 %v11785_v58  ;;  %v10242_v13 = vld [vmem:[#allocation14 + $0x159c] ss:$52 sps:$4 sm:$0xff]  }
 0x441   :  { %5756 = vmatprep.subr.bf16.mxu1 %v10173_v14  ;;  %v10237_v14 = vld [vmem:[#allocation14 + $0xb68] ss:$52 sps:$4 sm:$0xff]  }
 0x442   :  { %5988 = vmatpush1.bf16.msra.mxu0 %v10168_v15  ;;  %v10245_v15 = vld [vmem:[#allocation14 + $0xbd4] ss:$52 sps:$4 sm:$0xff]  }
 0x443   :  { %5989 = vmatprep.subr.bf16.mxu0 %v10176_v16  ;;  %v10240_v16 = vld [vmem:[#allocation14 + $0x1598] ss:$52 sps:$4 sm:$0xff]  }
 0x444   :  { %5757 = vmatpush1.bf16.msra.mxu1 %v10171_v17  ;;  %v10248_v17 = vld [vmem:[#allocation14 + $0x1604] ss:$52 sps:$4 sm:$0xff]  }
 0x445   :  { %5758 = vmatprep.subr.bf16.mxu1 %v10179_v18 }
 0x446   :  { %5990 = vmatpush1.bf16.msra.mxu0 %v10174_v19  ;;  %v10243_v19 = vld [vmem:[#allocation14 + $0xbd0] ss:$52 sps:$4 sm:$0xff]  }
 0x447   :  { %5991 = vmatprep.subr.bf16.mxu0 %v10182_v20 }
 0x448   :  { %5759 = vmatpush1.bf16.msra.mxu1 %v10177_v27  ;;  %v10251_v27 = vld [vmem:[#allocation14 + $0xc3c] ss:$52 sps:$4 sm:$0xff]  }
 0x449   :  { %5760 = vmatprep.subr.bf16.mxu1 %v10185_v28 }
 0x44a   :  { %5992 = vmatpush1.bf16.msra.mxu0 %v10180_v29  ;;  %v10246_v29 = vld [vmem:[#allocation14 + $0x1600] ss:$52 sps:$4 sm:$0xff]  }
 0x44b   :  { %5993 = vmatprep.subr.bf16.mxu0 %v10188_v30 }
 0x44c   :  { %5761 = vmatpush1.bf16.msra.mxu1 %v10183_v31  ;;  %v10254_v31 = vld [vmem:[#allocation14 + $0x166c] ss:$52 sps:$4 sm:$0xff]  }
 0x44d   :  { %5762 = vmatprep.subr.bf16.mxu1 %v10191_v32  ;;  %v10249_v32 = vld [vmem:[#allocation14 + $0xc38] ss:$52 sps:$4 sm:$0xff]  }
 0x44e   :  { %5994 = vmatpush1.bf16.msra.mxu0 %v10186_v33  ;;  %v10257_v33 = vld [vmem:[#allocation14 + $0xca4] ss:$52 sps:$4 sm:$0xff]  }
 0x44f   :  { %5995 = vmatprep.subr.bf16.mxu0 %v10194_v34  ;;  %v10252_v34 = vld [vmem:[#allocation14 + $0x1668] ss:$52 sps:$4 sm:$0xff]  }
 0x450   :  { %5763 = vmatpush1.bf16.msra.mxu1 %v10189_v35  ;;  %v10260_v35 = vld [vmem:[#allocation14 + $0x24] ss:$52 sps:$4 sm:$0xff]  }
 0x451   :  { %5764 = vmatprep.subr.bf16.mxu1 %v10197_v36  ;;  %v10255_v36 = vld [vmem:[#allocation14 + $0xca0] ss:$52 sps:$4 sm:$0xff]  }
 0x452   :  { %5996 = vmatpush1.bf16.msra.mxu0 %v10192_v24  ;;  %v10263_v24 = vld [vmem:[#allocation14 + $0xd0c] ss:$52 sps:$4 sm:$0xff]  }
 0x453   :  { %5997 = vmatprep.subr.bf16.mxu0 %v10200_v37  ;;  %v10258_v37 = vld [vmem:[#allocation14 + $0x20] ss:$52 sps:$4 sm:$0xff]  }
 0x454   :  { %5765 = vmatpush1.bf16.msra.mxu1 %v10195_v38  ;;  %v10266_v38 = vld [vmem:[#allocation14 + $0x8c] ss:$52 sps:$4 sm:$0xff]  }
 0x455   :  { %5766 = vmatprep.subr.bf16.mxu1 %v10203_v39  ;;  %v10261_v39 = vld [vmem:[#allocation14 + $0xd08] ss:$52 sps:$4 sm:$0xff]  }
 0x456   :  { %5998 = vmatpush1.bf16.msra.mxu0 %v10198_v40  ;;  %v10269_v40 = vld [vmem:[#allocation14 + $0xd74] ss:$52 sps:$4 sm:$0xff]  }
 0x457   :  { %5999 = vmatprep.subr.bf16.mxu0 %v10206_v41  ;;  %v10264_v41 = vld [vmem:[#allocation14 + $0x88] ss:$52 sps:$4 sm:$0xff]  }
 0x458   :  { %5767 = vmatpush1.bf16.msra.mxu1 %v10201_v42  ;;  %v10272_v42 = vld [vmem:[#allocation14 + $0xf4] ss:$52 sps:$4 sm:$0xff]  }
 0x459   :  { %5768 = vmatprep.subr.bf16.mxu1 %v10209_v43  ;;  %v10267_v43 = vld [vmem:[#allocation14 + $0xd70] ss:$52 sps:$4 sm:$0xff]  }
 0x45a   :  { %6000 = vmatpush1.bf16.msra.mxu0 %v10204_v44  ;;  %v10275_v44 = vld [vmem:[#allocation14 + $0xddc] ss:$52 sps:$4 sm:$0xff]  }
 0x45b   :  { %6012 = vmatprep.subr.bf16.mxu0 %v10212_v47  ;;  %v10270_v47 = vld [vmem:[#allocation14 + $0xf0] ss:$52 sps:$4 sm:$0xff]  }
 0x45c   :  { %5769 = vmatpush1.bf16.msra.mxu1 %v10207_v49  ;;  %v10278_v49 = vld [vmem:[#allocation14 + $0x15c] ss:$52 sps:$4 sm:$0xff]  }
 0x45d   :  { %6002 = vmatmul.mubr.bf16.vlgmr.msra.gmra.mrb[16].mxu0 %v11803_v45  ;;  %5770 = vmatprep.subr.bf16.mxu1 %v10215_v50  ;;  %v10273_v50 = vld [vmem:[#allocation14 + $0xdd8] ss:$52 sps:$4 sm:$0xff]  }
 0x45e   :  { %6013 = vmatpush1.bf16.msra.mxu0 %v10210_v51  ;;  %6044 = vmatprep.mubr.bf16.mxu0 %v11518_v61  ;;  %v10281_v51 = vld [vmem:[#allocation14 + $0xe44] ss:$52 sps:$4 sm:$0xff]  }
 0x45f   :  { %6014 = vmatprep.subr.bf16.mxu0 %v10218_v52  ;;  %v10276_v52 = vld [vmem:[#allocation14 + $0x158] ss:$52 sps:$4 sm:$0xff]  }
 0x460   :  { %5771 = vmatpush1.bf16.msra.mxu1 %v10213_v53  ;;  %v10284_v53 = vld [vmem:[#allocation14 + $0x1c4] ss:$52 sps:$4 sm:$0xff]  }
 0x461   :  { %5772 = vmatprep.subr.bf16.mxu1 %v10221_v54  ;;  %v10279_v54 = vld [vmem:[#allocation14 + $0xe40] ss:$52 sps:$4 sm:$0xff]  }
 0x462   :  { %6015 = vmatpush1.bf16.msra.mxu0 %v10216_v59  ;;  %v10287_v59 = vld [vmem:[#allocation14 + $0xeac] ss:$52 sps:$4 sm:$0xff]  }
 0x463   :  { %6016 = vmatprep.subr.bf16.mxu0 %v10224_v60  ;;  %v10282_v60 = vld [vmem:[#allocation14 + $0x1c0] ss:$52 sps:$4 sm:$0xff]  }
 0x464   :  { %5773 = vmatpush1.bf16.msra.mxu1 %v10219_v62  ;;  %v10290_v62 = vld [vmem:[#allocation14 + $0x22c] ss:$52 sps:$4 sm:$0xff]  }
 0x465   :  { %5774 = vmatprep.subr.bf16.mxu1 %v10227_v63  ;;  %v10285_v63 = vld [vmem:[#allocation14 + $0xea8] ss:$52 sps:$4 sm:$0xff]  }
 0x466   :  { %6017 = vmatpush1.bf16.msra.mxu0 %v10222_v1  ;;  %v10293_v1 = vld [vmem:[#allocation14 + $0xf14] ss:$52 sps:$4 sm:$0xff]  }
 0x467   :  { %6018 = vmatprep.subr.bf16.mxu0 %v10230_v2  ;;  %v10288_v2 = vld [vmem:[#allocation14 + $0x228] ss:$52 sps:$4 sm:$0xff]  }
 0x468   :  { %5775 = vmatpush1.bf16.msra.mxu1 %v10225_v3  ;;  %v10296_v3 = vld [vmem:[#allocation14 + $0x294] ss:$52 sps:$4 sm:$0xff]  }
 0x469   :  { %5776 = vmatprep.subr.bf16.mxu1 %v10233_v4  ;;  %v10291_v4 = vld [vmem:[#allocation14 + $0xf10] ss:$52 sps:$4 sm:$0xff]  }
 0x46a   :  { %6019 = vmatpush1.bf16.msra.mxu0 %v10228_v5  ;;  %v10299_v5 = vld [vmem:[#allocation14 + $0xf7c] ss:$52 sps:$4 sm:$0xff]  }
 0x46b   :  { %6020 = vmatprep.subr.bf16.mxu0 %v10236_v6  ;;  %v10294_v6 = vld [vmem:[#allocation14 + $0x290] ss:$52 sps:$4 sm:$0xff]  }
 0x46c   :  { %5777 = vmatpush1.bf16.msra.mxu1 %v10231_v10  ;;  %v10302_v10 = vld [vmem:[#allocation14 + $0x2fc] ss:$52 sps:$4 sm:$0xff]  }
 0x46d   :  { %5778 = vmatprep.subr.bf16.mxu1 %v10239_v11  ;;  %v10297_v11 = vld [vmem:[#allocation14 + $0xf78] ss:$52 sps:$4 sm:$0xff]  }
 0x46e   :  { %6021 = vmatpush1.bf16.msra.mxu0 %v10234_v12  ;;  %v10305_v12 = vld [vmem:[#allocation14 + $0xfe4] ss:$52 sps:$4 sm:$0xff]  }
 0x46f   :  { %6022 = vmatprep.subr.bf16.mxu0 %v10242_v13  ;;  %v10300_v13 = vld [vmem:[#allocation14 + $0x2f8] ss:$52 sps:$4 sm:$0xff]  }
 0x470   :  { %v11823_v18 = vpop.f32.mrb[12].mxu0  ;;  %5779 = vmatpush1.bf16.msra.mxu1 %v10237_v14  ;;  %v10308_v14 = vld [vmem:[#allocation14 + $0x364] ss:$52 sps:$4 sm:$0xff]  }
 0x471   :  { %v11825_v20 = vpop.f32.mrb[13].mxu0  ;;  %5780 = vmatprep.subr.bf16.mxu1 %v10245_v15  ;;  %v10303_v15 = vld [vmem:[#allocation14 + $0xfe0] ss:$52 sps:$4 sm:$0xff]  }
 0x472   :  { %6023 = vmatpush1.bf16.msra.mxu0 %v10240_v16  ;;  %v11827_v28 = vpop.f32.mrb[14].mxu0  ;;  %v10311_v16 = vld [vmem:[#allocation14 + $0x104c] ss:$52 sps:$4 sm:$0xff]  }
 0x473   :  { %v11829_v30 = vpop.f32.mrb[15].mxu0  ;;  %6024 = vmatprep.subr.bf16.mxu0 %v10248_v17  ;;  %v10306_v17 = vld [vmem:[#allocation14 + $0x360] ss:$52 sps:$4 sm:$0xff]  }
 0x474   :  { %5781 = vmatpush1.bf16.msra.mxu1 %v10243_v19  ;;  %v10314_v19 = vld [vmem:[#allocation14 + $0x3cc] ss:$52 sps:$4 sm:$0xff]  }
 0x475   :  { %5782 = vmatprep.subr.bf16.mxu1 %v10251_v27  ;;  %v10309_v27 = vld [vmem:[#allocation14 + $0x1048] ss:$52 sps:$4 sm:$0xff]  }
 0x476   :  { %6025 = vmatpush1.bf16.msra.mxu0 %v10246_v29  ;;  %v10317_v29 = vld [vmem:[#allocation14 + $0x10b4] ss:$52 sps:$4 sm:$0xff]  }
 0x477   :  { %6026 = vmatprep.subr.bf16.mxu0 %v10254_v31  ;;  %v10312_v31 = vld [vmem:[#allocation14 + $0x3c8] ss:$52 sps:$4 sm:$0xff]  }
 0x478   :  { %5783 = vmatpush1.bf16.msra.mxu1 %v10249_v32  ;;  %v10320_v32 = vld [vmem:[#allocation14 + $0x434] ss:$52 sps:$4 sm:$0xff]  }
 0x479   :  { %5784 = vmatprep.subr.bf16.mxu1 %v10257_v33  ;;  %v10315_v33 = vld [vmem:[#allocation14 + $0x10b0] ss:$52 sps:$4 sm:$0xff]  }
 0x47a   :  { %6027 = vmatpush1.bf16.msra.mxu0 %v10252_v34  ;;  %v10323_v34 = vld [vmem:[#allocation14 + $0x111c] ss:$52 sps:$4 sm:$0xff]  }
 0x47b   :  { %6227 = vmatprep.subr.bf16.mxu0 %v10260_v35  ;;  %v10318_v35 = vld [vmem:[#allocation14 + $0x430] ss:$52 sps:$4 sm:$0xff]  }
 0x47c   :  { %5785 = vmatpush1.bf16.msra.mxu1 %v10255_v36  ;;  %v10326_v36 = vld [vmem:[#allocation14 + $0x49c] ss:$52 sps:$4 sm:$0xff]  }
 0x47d   :  { %6045 = vmatmul.mubr.bf16.vlgmr.msra.gmra.mrb[16].mxu0 %v11805_v46  ;;  %5797 = vmatprep.subr.bf16.mxu1 %v10263_v24  ;;  %v10321_v24 = vld [vmem:[#allocation14 + $0x1118] ss:$52 sps:$4 sm:$0xff]  }
 0x47e   :  { %6228 = vmatpush1.bf16.msra.mxu0 %v10258_v37  ;;  %6259 = vmatprep.mubr.bf16.mxu0 %v11783_v57  ;;  %v10329_v37 = vld [vmem:[#allocation14 + $0x1184] ss:$52 sps:$4 sm:$0xff]  }
 0x47f   :  { %5787 = vmatmul.mubr.bf16.vlgmr.msra.gmra.mrb[16].mxu1 %v11781_v56  ;;  %6229 = vmatprep.subr.bf16.mxu0 %v10266_v38  ;;  %v10324_v38 = vld [vmem:[#allocation14 + $0x498] ss:$52 sps:$4 sm:$0xff]  }
 0x480   :  { %5798 = vmatpush1.bf16.msra.mxu1 %v10261_v39  ;;  %5829 = vmatprep.mubr.bf16.mxu1 %v11807_v48  ;;  %v10332_v39 = vld [vmem:[#allocation14 + $0x504] ss:$52 sps:$4 sm:$0xff]  }
 0x481   :  { %5799 = vmatprep.subr.bf16.mxu1 %v10269_v40  ;;  %v10327_v40 = vld [vmem:[#allocation14 + $0x1180] ss:$52 sps:$4 sm:$0xff]  }
 0x482   :  { %6230 = vmatpush1.bf16.msra.mxu0 %v10264_v41  ;;  %v10335_v41 = vld [vmem:[#allocation14 + $0x11ec] ss:$52 sps:$4 sm:$0xff]  }
 0x483   :  { %6231 = vmatprep.subr.bf16.mxu0 %v10272_v42  ;;  %v10330_v42 = vld [vmem:[#allocation14 + $0x500] ss:$52 sps:$4 sm:$0xff]  }
 0x484   :  { %5800 = vmatpush1.bf16.msra.mxu1 %v10267_v43  ;;  %v10338_v43 = vld [vmem:[#allocation14 + $0x56c] ss:$52 sps:$4 sm:$0xff]  }
 0x485   :  { %5801 = vmatprep.subr.bf16.mxu1 %v10275_v44  ;;  %v10333_v44 = vld [vmem:[#allocation14 + $0x11e8] ss:$52 sps:$4 sm:$0xff]  }
 0x486   :  { %6232 = vmatpush1.bf16.msra.mxu0 %v10270_v47  ;;  %v10341_v47 = vld [vmem:[#allocation14 + $0x1254] ss:$52 sps:$4 sm:$0xff]  }
 0x487   :  { %6233 = vmatprep.subr.bf16.mxu0 %v10278_v49  ;;  %v10336_v49 = vld [vmem:[#allocation14 + $0x568] ss:$52 sps:$4 sm:$0xff]  }
 0x488   :  { %5802 = vmatpush1.bf16.msra.mxu1 %v10273_v50  ;;  %v10344_v50 = vld [vmem:[#allocation14 + $0x5d4] ss:$52 sps:$4 sm:$0xff]  }
 0x489   :  { %5803 = vmatprep.subr.bf16.mxu1 %v10281_v51  ;;  %v10339_v51 = vld [vmem:[#allocation14 + $0x1250] ss:$52 sps:$4 sm:$0xff]  }
 0x48a   :  { %6234 = vmatpush1.bf16.msra.mxu0 %v10276_v52  ;;  %v10347_v52 = vld [vmem:[#allocation14 + $0x12bc] ss:$52 sps:$4 sm:$0xff]  }
 0x48b   :  { %6235 = vmatprep.subr.bf16.mxu0 %v10284_v53  ;;  %v10342_v53 = vld [vmem:[#allocation14 + $0x5d0] ss:$52 sps:$4 sm:$0xff]  }
 0x48c   :  { %5804 = vmatpush1.bf16.msra.mxu1 %v10279_v54  ;;  %v10350_v54 = vld [vmem:[#allocation14 + $0x63c] ss:$52 sps:$4 sm:$0xff]  }
 0x48d   :  { %5805 = vmatprep.subr.bf16.mxu1 %v10287_v59  ;;  %v10345_v59 = vld [vmem:[#allocation14 + $0x12b8] ss:$52 sps:$4 sm:$0xff]  }
 0x48e   :  { %6236 = vmatpush1.bf16.msra.mxu0 %v10282_v60  ;;  %v10353_v60 = vld [vmem:[#allocation14 + $0x1324] ss:$52 sps:$4 sm:$0xff]  }
 0x48f   :  { %6237 = vmatprep.subr.bf16.mxu0 %v10290_v62  ;;  %v10348_v62 = vld [vmem:[#allocation14 + $0x638] ss:$52 sps:$4 sm:$0xff]  }
 0x490   :  { %5806 = vmatpush1.bf16.msra.mxu1 %v10285_v63  ;;  %v10356_v63 = vld [vmem:[#allocation14 + $0x6a4] ss:$52 sps:$4 sm:$0xff]  }
 0x491   :  { %5807 = vmatprep.subr.bf16.mxu1 %v10293_v1  ;;  %v10351_v1 = vld [vmem:[#allocation14 + $0x1320] ss:$52 sps:$4 sm:$0xff]  }
 0x492   :  { %6238 = vmatpush1.bf16.msra.mxu0 %v10288_v2  ;;  %v10359_v2 = vld [vmem:[#allocation14 + $0x138c] ss:$52 sps:$4 sm:$0xff]  }
 0x493   :  { %6239 = vmatprep.subr.bf16.mxu0 %v10296_v3  ;;  %v10354_v3 = vld [vmem:[#allocation14 + $0x6a0] ss:$52 sps:$4 sm:$0xff]  }
 0x494   :  { %5808 = vmatpush1.bf16.msra.mxu1 %v10291_v4  ;;  %v10362_v4 = vld [vmem:[#allocation14 + $0x70c] ss:$52 sps:$4 sm:$0xff]  }
 0x495   :  { %5809 = vmatprep.subr.bf16.mxu1 %v10299_v5  ;;  %v10357_v5 = vld [vmem:[#allocation14 + $0x1388] ss:$52 sps:$4 sm:$0xff]  }
 0x496   :  { %6240 = vmatpush1.bf16.msra.mxu0 %v10294_v6  ;;  %v10365_v6 = vld [vmem:[#allocation14 + $0x13f4] ss:$52 sps:$4 sm:$0xff]  }
 0x497   :  { %6241 = vmatprep.subr.bf16.mxu0 %v10302_v10  ;;  %v10360_v10 = vld [vmem:[#allocation14 + $0x708] ss:$52 sps:$4 sm:$0xff]  }
 0x498   :  { %5810 = vmatpush1.bf16.msra.mxu1 %v10297_v11  ;;  %v10368_v11 = vld [vmem:[#allocation14 + $0x774] ss:$52 sps:$4 sm:$0xff]  }
 0x499   :  { %5811 = vmatprep.subr.bf16.mxu1 %v10305_v12  ;;  %v10363_v12 = vld [vmem:[#allocation14 + $0x13f0] ss:$52 sps:$4 sm:$0xff]  }
 0x49a   :  { %6242 = vmatpush1.bf16.msra.mxu0 %v10300_v13  ;;  %v10371_v13 = vld [vmem:[#allocation14 + $0x145c] ss:$52 sps:$4 sm:$0xff]  }
 0x49b   :  { %6243 = vmatprep.subr.bf16.mxu0 %v10308_v14  ;;  %v10366_v14 = vld [vmem:[#allocation14 + $0x770] ss:$52 sps:$4 sm:$0xff]  }
 0x49c   :  { %5812 = vmatpush1.bf16.msra.mxu1 %v10303_v15  ;;  %v10374_v15 = vld [vmem:[#allocation14 + $0x7dc] ss:$52 sps:$4 sm:$0xff]  }
 0x49d   :  { %5813 = vmatprep.subr.bf16.mxu1 %v10311_v16  ;;  %v10369_v16 = vld [vmem:[#allocation14 + $0x1458] ss:$52 sps:$4 sm:$0xff]  }
 0x49e   :  { %6244 = vmatpush1.bf16.msra.mxu0 %v10306_v17  ;;  %v10377_v17 = vld [vmem:[#allocation14 + $0x14c4] ss:$52 sps:$4 sm:$0xff]  }
 0x49f   :  { %6245 = vmatprep.subr.bf16.mxu0 %v10314_v19  ;;  %v10372_v19 = vld [vmem:[#allocation14 + $0x7d8] ss:$52 sps:$4 sm:$0xff]  }
 0x4a0   :  { %5814 = vmatpush1.bf16.msra.mxu1 %v10309_v27  ;;  %v10380_v27 = vld [vmem:[#allocation14 + $0x844] ss:$52 sps:$4 sm:$0xff]  }
 0x4a1   :  { %5815 = vmatprep.subr.bf16.mxu1 %v10317_v29  ;;  %v10375_v29 = vld [vmem:[#allocation14 + $0x14c0] ss:$52 sps:$4 sm:$0xff]  }
 0x4a2   :  { %6246 = vmatpush1.bf16.msra.mxu0 %v10312_v31  ;;  %v10383_v31 = vld [vmem:[#allocation14 + $0x152c] ss:$52 sps:$4 sm:$0xff]  }
 0x4a3   :  { %6247 = vmatprep.subr.bf16.mxu0 %v10320_v32  ;;  %v10378_v32 = vld [vmem:[#allocation14 + $0x840] ss:$52 sps:$4 sm:$0xff]  }
 0x4a4   :  { %5816 = vmatpush1.bf16.msra.mxu1 %v10315_v33  ;;  %v10386_v33 = vld [vmem:[#allocation14 + $0x8ac] ss:$52 sps:$4 sm:$0xff]  }
 0x4a5   :  { %5817 = vmatprep.subr.bf16.mxu1 %v10323_v34  ;;  %v10381_v34 = vld [vmem:[#allocation14 + $0x1528] ss:$52 sps:$4 sm:$0xff]  }
 0x4a6   :  { %6248 = vmatpush1.bf16.msra.mxu0 %v10318_v35  ;;  %v11839_v35 = vld [vmem:[#allocation16] sm:$0xff] }
 0x4a7   :  { %6249 = vmatprep.subr.bf16.mxu0 %v10326_v36  ;;  %v10389_v36 = vld [vmem:[#allocation14 + $0x1594] ss:$52 sps:$4 sm:$0xff]  }
 0x4a8   :  { %5818 = vmatpush1.bf16.msra.mxu1 %v10321_v24  ;;  %v10384_v24 = vld [vmem:[#allocation14 + $0x8a8] ss:$52 sps:$4 sm:$0xff]  }
 0x4a9   :  { %5819 = vmatprep.subr.bf16.mxu1 %v10329_v37  ;;  %v1781_v37 = vrot.slane %v11839_v35, %v11758_v22 }
 0x4aa   :  { %6250 = vmatpush1.bf16.msra.mxu0 %v10324_v38  ;;  %v10392_v38 = vld [vmem:[#allocation14 + $0x914] ss:$52 sps:$4 sm:$0xff]  }
 0x4ab   :  { %6251 = vmatprep.subr.bf16.mxu0 %v10332_v39  ;;  %v1785_v39 = vrot.slane %v11839_v35, %v11766_v25 }
 0x4ac   :  { %5820 = vmatpush1.bf16.msra.mxu1 %v10327_v40  ;;  %v10387_v40 = vld [vmem:[#allocation14 + $0x1590] ss:$52 sps:$4 sm:$0xff]  }
 0x4ad   :  { %5821 = vmatprep.subr.bf16.mxu1 %v10335_v41  ;;  %v10395_v41 = vld [vmem:[#allocation14 + $0x15fc] ss:$52 sps:$4 sm:$0xff]  }
 0x4ae   :  { %6252 = vmatpush1.bf16.msra.mxu0 %v10330_v42 }
 0x4af   :  { %6253 = vmatprep.subr.bf16.mxu0 %v10338_v43  ;;  %v10390_v43 = vld [vmem:[#allocation14 + $0x910] ss:$52 sps:$4 sm:$0xff]  }
 0x4b0   :  { %5822 = vmatpush1.bf16.msra.mxu1 %v10333_v44 }
 0x4b1   :  { %5823 = vmatprep.subr.bf16.mxu1 %v10341_v47 }
 0x4b2   :  { %6254 = vmatpush1.bf16.msra.mxu0 %v10336_v49  ;;  %v10398_v49 = vld [vmem:[#allocation14 + $0x97c] ss:$52 sps:$4 sm:$0xff]  }
 0x4b3   :  { %6255 = vmatprep.subr.bf16.mxu0 %v10344_v50 }
 0x4b4   :  { %5824 = vmatpush1.bf16.msra.mxu1 %v10339_v51 }
 0x4b5   :  { %5825 = vmatprep.subr.bf16.mxu1 %v10347_v52  ;;  %v10393_v52 = vld [vmem:[#allocation14 + $0x15f8] ss:$52 sps:$4 sm:$0xff]  }
 0x4b6   :  { %6256 = vmatpush1.bf16.msra.mxu0 %v10342_v53 }
 0x4b7   :  { %6257 = vmatprep.subr.bf16.mxu0 %v10350_v54 }
 0x4b8   :  { %5826 = vmatpush1.bf16.msra.mxu1 %v10345_v59 }
 0x4b9   :  { %5827 = vmatprep.subr.bf16.mxu1 %v10353_v60  ;;  %v10401_v60 = vld [vmem:[#allocation14 + $0x1664] ss:$52 sps:$4 sm:$0xff]  }
 0x4ba   :  { %6258 = vmatpush1.bf16.msra.mxu0 %v10348_v62 }
 0x4bb   :  { %6270 = vmatprep.subr.bf16.mxu0 %v10356_v63 }
 0x4bc   :  { %5828 = vmatpush1.bf16.msra.mxu1 %v10351_v1  ;;  %v10396_v1 = vld [vmem:[#allocation14 + $0x978] ss:$52 sps:$4 sm:$0xff]  }
 0x4bd   :  { %6260 = vmatmul.mubr.bf16.vlgmr.msra.gmra.mrb[20].mxu0 %v11779_v55  ;;  %5840 = vmatprep.subr.bf16.mxu1 %v10359_v2 }
 0x4be   :  { %6271 = vmatpush1.bf16.msra.mxu0 %v10354_v3  ;;  %6302 = vmatprep.mubr.bf16.mxu0 %v11785_v58  ;;  %v10404_v3 = vld [vmem:[#allocation14 + $0x9e4] ss:$52 sps:$4 sm:$0xff]  }
 0x4bf   :  { %5830 = vmatmul.mubr.bf16.vlgmr.msra.gmra.mrb[16].mxu1 %v11803_v45  ;;  %6272 = vmatprep.subr.bf16.mxu0 %v10362_v4 }
 0x4c0   :  { %5841 = vmatpush1.bf16.msra.mxu1 %v10357_v5  ;;  %5872 = vmatprep.mubr.bf16.mxu1 %v11518_v61  ;;  %v10399_v5 = vld [vmem:[#allocation14 + $0x1660] ss:$52 sps:$4 sm:$0xff]  }
 0x4c1   :  { %5842 = vmatprep.subr.bf16.mxu1 %v10365_v6 }
 0x4c2   :  { %6273 = vmatpush1.bf16.msra.mxu0 %v10360_v10 }
 0x4c3   :  { %6274 = vmatprep.subr.bf16.mxu0 %v10368_v11 }
 0x4c4   :  { %5843 = vmatpush1.bf16.msra.mxu1 %v10363_v12 }
 0x4c5   :  { %5844 = vmatprep.subr.bf16.mxu1 %v10371_v13  ;;  %v10402_v13 = vld [vmem:[#allocation14 + $0x9e0] ss:$52 sps:$4 sm:$0xff]  }
 0x4c6   :  { %6275 = vmatpush1.bf16.msra.mxu0 %v10366_v14  ;;  %v10410_v14 = vld [vmem:[#allocation14 + $0xa4c] ss:$52 sps:$4 sm:$0xff]  }
 0x4c7   :  { %6276 = vmatprep.subr.bf16.mxu0 %v10374_v15 }
 0x4c8   :  { %5845 = vmatpush1.bf16.msra.mxu1 %v10369_v16  ;;  %v10408_v16 = vld [vmem:[#allocation14 + $0xa48] ss:$52 sps:$4 sm:$0xff]  }
 0x4c9   :  { %5846 = vmatprep.subr.bf16.mxu1 %v10377_v17  ;;  %v10416_v17 = vld [vmem:[#allocation14 + $0xab4] ss:$52 sps:$4 sm:$0xff]  }
 0x4ca   :  { %6277 = vmatpush1.bf16.msra.mxu0 %v10372_v19  ;;  %v10411_v19 = vld [vmem:[#allocation14 + $0x80] ss:$52 sps:$4 sm:$0xff]  }
 0x4cb   :  { %6278 = vmatprep.subr.bf16.mxu0 %v10380_v27  ;;  %v10419_v27 = vld [vmem:[#allocation14 + $0xec] ss:$52 sps:$4 sm:$0xff]  }
 0x4cc   :  { %5847 = vmatpush1.bf16.msra.mxu1 %v10375_v29  ;;  %v10414_v29 = vld [vmem:[#allocation14 + $0xab0] ss:$52 sps:$4 sm:$0xff]  }
 0x4cd   :  { %5848 = vmatprep.subr.bf16.mxu1 %v10383_v31  ;;  %v10422_v31 = vld [vmem:[#allocation14 + $0xb1c] ss:$52 sps:$4 sm:$0xff]  }
 0x4ce   :  { %6279 = vmatpush1.bf16.msra.mxu0 %v10378_v32  ;;  %v10417_v32 = vld [vmem:[#allocation14 + $0xe8] ss:$52 sps:$4 sm:$0xff]  }
 0x4cf   :  { %6280 = vmatprep.subr.bf16.mxu0 %v10386_v33  ;;  %v10425_v33 = vld [vmem:[#allocation14 + $0x154] ss:$52 sps:$4 sm:$0xff]  }
 0x4d0   :  { %5849 = vmatpush1.bf16.msra.mxu1 %v10381_v34  ;;  %v10420_v34 = vld [vmem:[#allocation14 + $0xb18] ss:$52 sps:$4 sm:$0xff]  }
 0x4d1   :  { %5850 = vmatprep.subr.bf16.mxu1 %v10389_v36  ;;  %v10428_v36 = vld [vmem:[#allocation14 + $0xb84] ss:$52 sps:$4 sm:$0xff]  }
 0x4d2   :  { %6281 = vmatpush1.bf16.msra.mxu0 %v10384_v24  ;;  %v5659_v42 = vpop.f32.mrb[12].mxu1  ;;  %v10423_v24 = vld [vmem:[#allocation14 + $0x150] ss:$52 sps:$4 sm:$0xff]  }
 0x4d3   :  { %v9581_v44 = vadd.f32 %v5659_v42, %v1781_v37  ;;  %v5661_v47 = vpop.f32.mrb[13].mxu1  ;;  %6282 = vmatprep.subr.bf16.mxu0 %v10392_v38  ;;  %v10426_v38 = vld [vmem:[#allocation14 + $0xb80] ss:$52 sps:$4 sm:$0xff]   ;;  %v10432_v42 = vld [vmem:[#allocation14 + $0xbe8] ss:$52 sps:$4 sm:$0xff]  }
 0x4d4   :  { %v9583_v50 = vadd.f32 %v5661_v47, %v1785_v39  ;;  %v5663_v51 = vpop.f32.mrb[14].mxu1  ;;  %5851 = vmatpush1.bf16.msra.mxu1 %v10387_v40  ;;  %v10429_v40 = vld [vmem:[#allocation14 + $0x1b8] ss:$52 sps:$4 sm:$0xff]  }
 0x4d5   :  { %v9582_v53 = vadd.f32 %v9581_v44, %v11823_v18  ;;  %v9585_v54 = vadd.f32 %v5663_v51, %v1781_v37  ;;  %v5665_v59 = vpop.f32.mrb[15].mxu1  ;;  %5852 = vmatprep.subr.bf16.mxu1 %v10395_v41  ;;  %v10407_v18 = vld [vmem:[#allocation14 + $0x1c] ss:$52 sps:$4 sm:$0xff]   ;;  %v10437_v41 = vld [vmem:[#allocation14 + $0x224] ss:$52 sps:$4 sm:$0xff]  }
 0x4d6   :  { %v9584_v62 = vadd.f32 %v9583_v50, %v11825_v20  ;;  %v9587_v63 = vadd.f32 %v5665_v59, %v1785_v39  ;;  %6283 = vmatpush1.bf16.msra.mxu0 %v10390_v43  ;;  %v10431_v37 = vld [vmem:[#allocation14 + $0x1bc] ss:$52 sps:$4 sm:$0xff]   ;;  %v10434_v39 = vld [vmem:[#allocation14 + $0xbec] ss:$52 sps:$4 sm:$0xff]   ;;  %v10440_v43 = vld [vmem:[#allocation14 + $0xc54] ss:$52 sps:$4 sm:$0xff]  }
 0x4d7   :  { %v9586_v2 = vadd.f32 %v9585_v54, %v11827_v28  ;;  %6284 = vmatprep.subr.bf16.mxu0 %v10398_v49  ;;  %v6735_v6 = vmax.f32 %v9582_v53, 0.0  ;;  %v10405_v28 = vld [vmem:[#allocation14 + $0x18] ss:$52 sps:$4 sm:$0xff]   ;;  %v10435_v44 = vld [vmem:[#allocation14 + $0x220] ss:$52 sps:$4 sm:$0xff]  }
 0x4d8   :  { %v9588_v4 = vadd.f32 %v9587_v63, %v11829_v30  ;;  %5853 = vmatpush1.bf16.msra.mxu1 %v10393_v52  ;;  %v6736_v11 = vmax.f32 %v9584_v62, 0.0  ;;  %v10413_v30 = vld [vmem:[#allocation14 + $0x84] ss:$52 sps:$4 sm:$0xff]   ;;  %v10443_v47 = vld [vmem:[#allocation14 + $0x28c] ss:$52 sps:$4 sm:$0xff]  }
 0x4d9   :  { %v6748_v10 = vmax.f32 %v9586_v2, 0.0  ;;  %5854 = vmatprep.subr.bf16.mxu1 %v10401_v60  ;;  %v10438_v49 = vld [vmem:[#allocation14 + $0xc50] ss:$52 sps:$4 sm:$0xff]   ;;  %v10441_v51 = vld [vmem:[#allocation14 + $0x288] ss:$52 sps:$4 sm:$0xff]  }
 0x4da   :  { %v6749_v12 = vmax.f32 %v9588_v4, 0.0  ;;  %6285 = vmatpush1.bf16.msra.mxu0 %v10396_v1  ;;  %v10446_v50 = vld [vmem:[#allocation14 + $0xcbc] ss:$52 sps:$4 sm:$0xff]   ;;  %v10449_v52 = vld [vmem:[#allocation14 + $0x2f4] ss:$52 sps:$4 sm:$0xff]  }
 0x4db   :  { %v11849_v20 = vpack.c.bf16 %v6748_v10, %v6735_v6  ;;  %6286 = vmatprep.subr.bf16.mxu0 %v10404_v3  ;;  %v10444_v53 = vld [vmem:[#allocation14 + $0xcb8] ss:$52 sps:$4 sm:$0xff]   ;;  %v10447_v59 = vld [vmem:[#allocation14 + $0x2f0] ss:$52 sps:$4 sm:$0xff]   ;;  %v10450_v62 = vld [vmem:[#allocation14 + $0xd20] ss:$52 sps:$4 sm:$0xff]  }
 0x4dc   :  { %5855 = vmatpush1.bf16.msra.mxu1 %v10399_v5  ;;  %v11851_v15 = vpack.c.bf16 %v6749_v12, %v6736_v11  ;;  %v10452_v54 = vld [vmem:[#allocation14 + $0xd24] ss:$52 sps:$4 sm:$0xff]   ;;  %v10455_v60 = vld [vmem:[#allocation14 + $0x35c] ss:$52 sps:$4 sm:$0xff]   ;;  %v10458_v63 = vld [vmem:[#allocation14 + $0xd8c] ss:$52 sps:$4 sm:$0xff]  }
 0x4dd   :  { %6055 = vmatprep.subr.bf16.mxu1 %v10407_v18  ;;  %v10453_v1 = vld [vmem:[#allocation14 + $0x358] ss:$52 sps:$4 sm:$0xff]   ;;  %v10456_v3 = vld [vmem:[#allocation14 + $0xd88] ss:$52 sps:$4 sm:$0xff]   ;;  %v10459_v5 = vld [vmem:[#allocation14 + $0x3c0] ss:$52 sps:$4 sm:$0xff]  }
 0x4de   :  { %6287 = vmatpush1.bf16.msra.mxu0 %v10402_v13  ;;  %v10461_v2 = vld [vmem:[#allocation14 + $0x3c4] ss:$52 sps:$4 sm:$0xff]   ;;  %v10464_v4 = vld [vmem:[#allocation14 + $0xdf4] ss:$52 sps:$4 sm:$0xff]   ;;  %v10467_v6 = vld [vmem:[#allocation14 + $0x42c] ss:$52 sps:$4 sm:$0xff]  }
 0x4df   :  { %5873 = vmatmul.mubr.bf16.vlgmr.msra.gmra.mrb[16].mxu1 %v11805_v46  ;;  %6288 = vmatprep.subr.bf16.mxu0 %v10410_v14  ;;  %v10462_v10 = vld [vmem:[#allocation14 + $0xdf0] ss:$52 sps:$4 sm:$0xff]   ;;  %v10465_v11 = vld [vmem:[#allocation14 + $0x428] ss:$52 sps:$4 sm:$0xff]   ;;  %v10468_v13 = vld [vmem:[#allocation14 + $0xe58] ss:$52 sps:$4 sm:$0xff]  }
 0x4e0   :  { %6056 = vmatpush1.bf16.msra.mxu1 %v10405_v28  ;;  %6087 = vmatprep.mubr.bf16.mxu1 %v11783_v57  ;;  %v10470_v18 = vld [vmem:[#allocation14 + $0xe5c] ss:$52 sps:$4 sm:$0xff]   ;;  %v10473_v12 = vld [vmem:[#allocation14 + $0x494] ss:$52 sps:$4 sm:$0xff]   ;;  %v10476_v14 = vld [vmem:[#allocation14 + $0xec4] ss:$52 sps:$4 sm:$0xff]  }
 0x4e1   :  { %6057 = vmatprep.subr.bf16.mxu1 %v10413_v30  ;;  %v10471_v28 = vld [vmem:[#allocation14 + $0x490] ss:$52 sps:$4 sm:$0xff]  }
 0x4e2   :  { %6289 = vmatpush1.bf16.msra.mxu0 %v10408_v16  ;;  %v10479_v30 = vld [vmem:[#allocation14 + $0x4fc] ss:$52 sps:$4 sm:$0xff]   ;;  %v10474_v16 = vld [vmem:[#allocation14 + $0xec0] ss:$52 sps:$4 sm:$0xff]  }
 0x4e3   :  { %6290 = vmatprep.subr.bf16.mxu0 %v10416_v17  ;;  %v10482_v17 = vld [vmem:[#allocation14 + $0xf2c] ss:$52 sps:$4 sm:$0xff]  }
 0x4e4   :  { %6058 = vmatpush1.bf16.msra.mxu1 %v10411_v19  ;;  %v10477_v19 = vld [vmem:[#allocation14 + $0x4f8] ss:$52 sps:$4 sm:$0xff]  }
 0x4e5   :  { %6059 = vmatprep.subr.bf16.mxu1 %v10419_v27  ;;  %v10485_v27 = vld [vmem:[#allocation14 + $0x564] ss:$52 sps:$4 sm:$0xff]  }
 0x4e6   :  { %6291 = vmatpush1.bf16.msra.mxu0 %v10414_v29  ;;  %v10480_v29 = vld [vmem:[#allocation14 + $0xf28] ss:$52 sps:$4 sm:$0xff]  }
 0x4e7   :  { %6292 = vmatprep.subr.bf16.mxu0 %v10422_v31  ;;  %v10488_v31 = vld [vmem:[#allocation14 + $0xf94] ss:$52 sps:$4 sm:$0xff]  }
 0x4e8   :  { %6060 = vmatpush1.bf16.msra.mxu1 %v10417_v32  ;;  %v10483_v32 = vld [vmem:[#allocation14 + $0x560] ss:$52 sps:$4 sm:$0xff]  }
 0x4e9   :  { %6061 = vmatprep.subr.bf16.mxu1 %v10425_v33  ;;  %v10491_v33 = vld [vmem:[#allocation14 + $0x5cc] ss:$52 sps:$4 sm:$0xff]  }
 0x4ea   :  { %6293 = vmatpush1.bf16.msra.mxu0 %v10420_v34  ;;  %v10486_v34 = vld [vmem:[#allocation14 + $0xf90] ss:$52 sps:$4 sm:$0xff]  }
 0x4eb   :  { %6294 = vmatprep.subr.bf16.mxu0 %v10428_v36  ;;  %v10494_v36 = vld [vmem:[#allocation14 + $0xffc] ss:$52 sps:$4 sm:$0xff]  }
 0x4ec   :  { %6062 = vmatpush1.bf16.msra.mxu1 %v10423_v24  ;;  %v10489_v24 = vld [vmem:[#allocation14 + $0x5c8] ss:$52 sps:$4 sm:$0xff]  }
 0x4ed   :  { %6063 = vmatprep.subr.bf16.mxu1 %v10431_v37  ;;  %v10497_v37 = vld [vmem:[#allocation14 + $0x634] ss:$52 sps:$4 sm:$0xff]  }
 0x4ee   :  { %6295 = vmatpush1.bf16.msra.mxu0 %v10426_v38  ;;  %v10492_v38 = vld [vmem:[#allocation14 + $0xff8] ss:$52 sps:$4 sm:$0xff]  }
 0x4ef   :  { %6296 = vmatprep.subr.bf16.mxu0 %v10434_v39  ;;  %v10500_v39 = vld [vmem:[#allocation14 + $0x1064] ss:$52 sps:$4 sm:$0xff]  }
 0x4f0   :  { %6064 = vmatpush1.bf16.msra.mxu1 %v10429_v40  ;;  %v10495_v40 = vld [vmem:[#allocation14 + $0x630] ss:$52 sps:$4 sm:$0xff]  }
 0x4f1   :  { %6065 = vmatprep.subr.bf16.mxu1 %v10437_v41  ;;  %v10503_v41 = vld [vmem:[#allocation14 + $0x69c] ss:$52 sps:$4 sm:$0xff]  }
 0x4f2   :  { %6297 = vmatpush1.bf16.msra.mxu0 %v10432_v42  ;;  %v10498_v42 = vld [vmem:[#allocation14 + $0x1060] ss:$52 sps:$4 sm:$0xff]  }
 0x4f3   :  { %6298 = vmatprep.subr.bf16.mxu0 %v10440_v43  ;;  %v10506_v43 = vld [vmem:[#allocation14 + $0x10cc] ss:$52 sps:$4 sm:$0xff]  }
 0x4f4   :  { %6066 = vmatpush1.bf16.msra.mxu1 %v10435_v44  ;;  %v10501_v44 = vld [vmem:[#allocation14 + $0x698] ss:$52 sps:$4 sm:$0xff]  }
 0x4f5   :  { %6067 = vmatprep.subr.bf16.mxu1 %v10443_v47  ;;  %v10509_v47 = vld [vmem:[#allocation14 + $0x704] ss:$52 sps:$4 sm:$0xff]  }
 0x4f6   :  { %6299 = vmatpush1.bf16.msra.mxu0 %v10438_v49  ;;  %v10504_v49 = vld [vmem:[#allocation14 + $0x10c8] ss:$52 sps:$4 sm:$0xff]  }
 0x4f7   :  { %6300 = vmatprep.subr.bf16.mxu0 %v10446_v50  ;;  %v10512_v50 = vld [vmem:[#allocation14 + $0x1134] ss:$52 sps:$4 sm:$0xff]  }
 0x4f8   :  { %6068 = vmatpush1.bf16.msra.mxu1 %v10441_v51  ;;  %v10507_v51 = vld [vmem:[#allocation14 + $0x700] ss:$52 sps:$4 sm:$0xff]  }
 0x4f9   :  { %6069 = vmatprep.subr.bf16.mxu1 %v10449_v52  ;;  %v10515_v52 = vld [vmem:[#allocation14 + $0x76c] ss:$52 sps:$4 sm:$0xff]  }
 0x4fa   :  { %6301 = vmatpush1.bf16.msra.mxu0 %v10444_v53  ;;  %v10510_v53 = vld [vmem:[#allocation14 + $0x1130] ss:$52 sps:$4 sm:$0xff]  }
 0x4fb   :  { %6313 = vmatprep.subr.bf16.mxu0 %v10452_v54  ;;  %v10518_v54 = vld [vmem:[#allocation14 + $0x119c] ss:$52 sps:$4 sm:$0xff]  }
 0x4fc   :  { %6070 = vmatpush1.bf16.msra.mxu1 %v10447_v59  ;;  %v10513_v59 = vld [vmem:[#allocation14 + $0x768] ss:$52 sps:$4 sm:$0xff]  }
 0x4fd   :  { %6303 = vmatmul.mubr.bf16.vlgmr.msra.gmra.mrb[20].mxu0 %v11781_v56  ;;  %6071 = vmatprep.subr.bf16.mxu1 %v10455_v60  ;;  %v10521_v60 = vld [vmem:[#allocation14 + $0x7d4] ss:$52 sps:$4 sm:$0xff]  }
 0x4fe   :  { %6314 = vmatpush1.bf16.msra.mxu0 %v10450_v62  ;;  %6345 = vmatprep.mubr.bf16.mxu0 %v11807_v48  ;;  %v10516_v62 = vld [vmem:[#allocation14 + $0x1198] ss:$52 sps:$4 sm:$0xff]  }
 0x4ff   :  { %6315 = vmatprep.subr.bf16.mxu0 %v10458_v63  ;;  %v10524_v63 = vld [vmem:[#allocation14 + $0x1204] ss:$52 sps:$4 sm:$0xff]  }
 0x500   :  { %6072 = vmatpush1.bf16.msra.mxu1 %v10453_v1  ;;  %v10519_v1 = vld [vmem:[#allocation14 + $0x7d0] ss:$52 sps:$4 sm:$0xff]  }
 0x501   :  { %6073 = vmatprep.subr.bf16.mxu1 %v10461_v2  ;;  %v10527_v2 = vld [vmem:[#allocation14 + $0x83c] ss:$52 sps:$4 sm:$0xff]  }
 0x502   :  { %6316 = vmatpush1.bf16.msra.mxu0 %v10456_v3  ;;  %v10522_v3 = vld [vmem:[#allocation14 + $0x1200] ss:$52 sps:$4 sm:$0xff]  }
 0x503   :  { %6317 = vmatprep.subr.bf16.mxu0 %v10464_v4  ;;  %v10530_v4 = vld [vmem:[#allocation14 + $0x126c] ss:$52 sps:$4 sm:$0xff]  }
 0x504   :  { %6074 = vmatpush1.bf16.msra.mxu1 %v10459_v5  ;;  %v10525_v5 = vld [vmem:[#allocation14 + $0x838] ss:$52 sps:$4 sm:$0xff]  }
 0x505   :  { %6075 = vmatprep.subr.bf16.mxu1 %v10467_v6  ;;  %v10533_v6 = vld [vmem:[#allocation14 + $0x8a4] ss:$52 sps:$4 sm:$0xff]  }
 0x506   :  { %6318 = vmatpush1.bf16.msra.mxu0 %v10462_v10  ;;  %v10528_v10 = vld [vmem:[#allocation14 + $0x1268] ss:$52 sps:$4 sm:$0xff]  }
 0x507   :  { %6319 = vmatprep.subr.bf16.mxu0 %v10470_v18  ;;  %v10536_v18 = vld [vmem:[#allocation14 + $0x12d4] ss:$52 sps:$4 sm:$0xff]  }
 0x508   :  { %6076 = vmatpush1.bf16.msra.mxu1 %v10465_v11  ;;  %v10531_v11 = vld [vmem:[#allocation14 + $0x8a0] ss:$52 sps:$4 sm:$0xff]  }
 0x509   :  { %6077 = vmatprep.subr.bf16.mxu1 %v10473_v12  ;;  %v10539_v12 = vld [vmem:[#allocation14 + $0x90c] ss:$52 sps:$4 sm:$0xff]  }
 0x50a   :  { %6320 = vmatpush1.bf16.msra.mxu0 %v10468_v13  ;;  %v10534_v13 = vld [vmem:[#allocation14 + $0x12d0] ss:$52 sps:$4 sm:$0xff]  }
 0x50b   :  { %6321 = vmatprep.subr.bf16.mxu0 %v10476_v14  ;;  %v10542_v14 = vld [vmem:[#allocation14 + $0x133c] ss:$52 sps:$4 sm:$0xff]  }
 0x50c   :  { %6078 = vmatpush1.bf16.msra.mxu1 %v10471_v28  ;;  %v10537_v28 = vld [vmem:[#allocation14 + $0x908] ss:$52 sps:$4 sm:$0xff]  }
 0x50d   :  { %6079 = vmatprep.subr.bf16.mxu1 %v10479_v30  ;;  %v10545_v30 = vld [vmem:[#allocation14 + $0x974] ss:$52 sps:$4 sm:$0xff]  }
 0x50e   :  { %6322 = vmatpush1.bf16.msra.mxu0 %v10474_v16  ;;  %v10540_v16 = vld [vmem:[#allocation14 + $0x1338] ss:$52 sps:$4 sm:$0xff]  }
 0x50f   :  { %6323 = vmatprep.subr.bf16.mxu0 %v10482_v17  ;;  %v10548_v17 = vld [vmem:[#allocation14 + $0x13a4] ss:$52 sps:$4 sm:$0xff]  }
 0x510   :  { %6080 = vmatpush1.bf16.msra.mxu1 %v10477_v19  ;;  %v10543_v19 = vld [vmem:[#allocation14 + $0x970] ss:$52 sps:$4 sm:$0xff]  }
 0x511   :  { %6081 = vmatprep.subr.bf16.mxu1 %v10485_v27  ;;  %v10551_v27 = vld [vmem:[#allocation14 + $0x9dc] ss:$52 sps:$4 sm:$0xff]  }
 0x512   :  { %6324 = vmatpush1.bf16.msra.mxu0 %v10480_v29  ;;  %v10546_v29 = vld [vmem:[#allocation14 + $0x13a0] ss:$52 sps:$4 sm:$0xff]  }
 0x513   :  { %6325 = vmatprep.subr.bf16.mxu0 %v10488_v31  ;;  %v10554_v31 = vld [vmem:[#allocation14 + $0x140c] ss:$52 sps:$4 sm:$0xff]  }
 0x514   :  { %6082 = vmatpush1.bf16.msra.mxu1 %v10483_v32  ;;  %v10549_v32 = vld [vmem:[#allocation14 + $0x9d8] ss:$52 sps:$4 sm:$0xff]  }
 0x515   :  { %6083 = vmatprep.subr.bf16.mxu1 %v10491_v33  ;;  %v10557_v33 = vld [vmem:[#allocation14 + $0xa44] ss:$52 sps:$4 sm:$0xff]  }
 0x516   :  { %6326 = vmatpush1.bf16.msra.mxu0 %v10486_v34  ;;  %v10552_v34 = vld [vmem:[#allocation14 + $0x1408] ss:$52 sps:$4 sm:$0xff]  }
 0x517   :  { %6327 = vmatprep.subr.bf16.mxu0 %v10494_v36  ;;  %v10560_v36 = vld [vmem:[#allocation14 + $0x1474] ss:$52 sps:$4 sm:$0xff]  }
 0x518   :  { %6084 = vmatpush1.bf16.msra.mxu1 %v10489_v24  ;;  %v10555_v24 = vld [vmem:[#allocation14 + $0xa40] ss:$52 sps:$4 sm:$0xff]  }
 0x519   :  { %6085 = vmatprep.subr.bf16.mxu1 %v10497_v37  ;;  %v10563_v37 = vld [vmem:[#allocation14 + $0xaac] ss:$52 sps:$4 sm:$0xff]  }
 0x51a   :  { %6328 = vmatpush1.bf16.msra.mxu0 %v10492_v38  ;;  %v10558_v38 = vld [vmem:[#allocation14 + $0x1470] ss:$52 sps:$4 sm:$0xff]  }
 0x51b   :  { %6329 = vmatprep.subr.bf16.mxu0 %v10500_v39  ;;  %v10566_v39 = vld [vmem:[#allocation14 + $0x14dc] ss:$52 sps:$4 sm:$0xff]  }
 0x51c   :  { %6086 = vmatpush1.bf16.msra.mxu1 %v10495_v40  ;;  %v10561_v40 = vld [vmem:[#allocation14 + $0xaa8] ss:$52 sps:$4 sm:$0xff]  }
 0x51d   :  { %6098 = vmatprep.subr.bf16.mxu1 %v10503_v41  ;;  %v10569_v41 = vld [vmem:[#allocation14 + $0xb14] ss:$52 sps:$4 sm:$0xff]  }
 0x51e   :  { %6330 = vmatpush1.bf16.msra.mxu0 %v10498_v42  ;;  %v10564_v42 = vld [vmem:[#allocation14 + $0x14d8] ss:$52 sps:$4 sm:$0xff]  }
 0x51f   :  { %6088 = vmatmul.mubr.bf16.vlgmr.msra.gmra.mrb[20].mxu1 %v11779_v55  ;;  %6331 = vmatprep.subr.bf16.mxu0 %v10506_v43  ;;  %v10572_v43 = vld [vmem:[#allocation14 + $0x1544] ss:$52 sps:$4 sm:$0xff]  }
 0x520   :  { %6099 = vmatpush1.bf16.msra.mxu1 %v10501_v44  ;;  %6130 = vmatprep.mubr.bf16.mxu1 %v11785_v58  ;;  %v10567_v44 = vld [vmem:[#allocation14 + $0xb10] ss:$52 sps:$4 sm:$0xff]  }
 0x521   :  { %6100 = vmatprep.subr.bf16.mxu1 %v10509_v47  ;;  %v10575_v47 = vld [vmem:[#allocation14 + $0xb7c] ss:$52 sps:$4 sm:$0xff]  }
 0x522   :  { %6332 = vmatpush1.bf16.msra.mxu0 %v10504_v49  ;;  %v10570_v49 = vld [vmem:[#allocation14 + $0x1540] ss:$52 sps:$4 sm:$0xff]  }
 0x523   :  { %6333 = vmatprep.subr.bf16.mxu0 %v10512_v50  ;;  %v10578_v50 = vld [vmem:[#allocation14 + $0x15ac] ss:$52 sps:$4 sm:$0xff]  }
 0x524   :  { %6101 = vmatpush1.bf16.msra.mxu1 %v10507_v51  ;;  %v10573_v51 = vld [vmem:[#allocation14 + $0xb78] ss:$52 sps:$4 sm:$0xff]  }
 0x525   :  { %6102 = vmatprep.subr.bf16.mxu1 %v10515_v52  ;;  %v1797_v52 = vrot.slane %v11839_v35, %v11791_v7 }
 0x526   :  { %6334 = vmatpush1.bf16.msra.mxu0 %v10510_v53  ;;  %v10581_v53 = vld [vmem:[#allocation14 + $0xbe4] ss:$52 sps:$4 sm:$0xff]  }
 0x527   :  { %6335 = vmatprep.subr.bf16.mxu0 %v10518_v54  ;;  %v1801_v54 = vrot.slane %v11839_v35, %v498_v9  ;;  %v10585_v9 = vld [vmem:[#allocation14 + $0xc48] ss:$52 sps:$4 sm:$0xff]  }
 0x528   :  { %6103 = vmatpush1.bf16.msra.mxu1 %v10513_v59  ;;  %v10576_v59 = vld [vmem:[#allocation14 + $0x15a8] ss:$52 sps:$4 sm:$0xff]  }
 0x529   :  { %6104 = vmatprep.subr.bf16.mxu1 %v10521_v60  ;;  %v10584_v60 = vld [vmem:[#allocation14 + $0x1614] ss:$52 sps:$4 sm:$0xff]  }
 0x52a   :  { %6336 = vmatpush1.bf16.msra.mxu0 %v10516_v62 }
 0x52b   :  { %6337 = vmatprep.subr.bf16.mxu0 %v10524_v63  ;;  %v10579_v63 = vld [vmem:[#allocation14 + $0xbe0] ss:$52 sps:$4 sm:$0xff]  }
 0x52c   :  { %6105 = vmatpush1.bf16.msra.mxu1 %v10519_v1 }
 0x52d   :  { %6106 = vmatprep.subr.bf16.mxu1 %v10527_v2 }
 0x52e   :  { %6338 = vmatpush1.bf16.msra.mxu0 %v10522_v3  ;;  %v10587_v3 = vld [vmem:[#allocation14 + $0xc4c] ss:$52 sps:$4 sm:$0xff]  }
 0x52f   :  { %6339 = vmatprep.subr.bf16.mxu0 %v10530_v4 }
 0x530   :  { %6107 = vmatpush1.bf16.msra.mxu1 %v10525_v5 }
 0x531   :  { %6108 = vmatprep.subr.bf16.mxu1 %v10533_v6  ;;  %v10582_v6 = vld [vmem:[#allocation14 + $0x1610] ss:$52 sps:$4 sm:$0xff]  }
 0x532   :  { %6340 = vmatpush1.bf16.msra.mxu0 %v10528_v10 }
 0x533   :  { %6341 = vmatprep.subr.bf16.mxu0 %v10536_v18 }
 0x534   :  { %6109 = vmatpush1.bf16.msra.mxu1 %v10531_v11  ;;  %v10590_v11 = vld [vmem:[#allocation14 + $0x167c] ss:$52 sps:$4 sm:$0xff]  }
 0x535   :  { %6110 = vmatprep.subr.bf16.mxu1 %v10539_v12 }
 0x536   :  { %6342 = vmatpush1.bf16.msra.mxu0 %v10534_v13 }
 0x537   :  { %6343 = vmatprep.subr.bf16.mxu0 %v10542_v14 }
 0x538   :  { %6111 = vmatpush1.bf16.msra.mxu1 %v10537_v28  ;;  %v10593_v28 = vld [vmem:[#allocation14 + $0xcb4] ss:$52 sps:$4 sm:$0xff]  }
 0x539   :  { %6112 = vmatprep.subr.bf16.mxu1 %v10545_v30 }
 0x53a   :  { %6344 = vmatpush1.bf16.msra.mxu0 %v10540_v16 }
 0x53b   :  { %6356 = vmatprep.subr.bf16.mxu0 %v10548_v17  ;;  %v10588_v17 = vld [vmem:[#allocation14 + $0x1678] ss:$52 sps:$4 sm:$0xff]  }
 0x53c   :  { %6113 = vmatpush1.bf16.msra.mxu1 %v10543_v19 }
 0x53d   :  { %6346 = vmatmul.mubr.bf16.vlgmr.msra.gmra.mrb[20].mxu0 %v11803_v45  ;;  %6114 = vmatprep.subr.bf16.mxu1 %v10551_v27  ;;  %v10594_v27 = vld [vmem:[#allocation14 + $0x370] ss:$52 sps:$4 sm:$0xff]  }
 0x53e   :  { %6357 = vmatpush1.bf16.msra.mxu0 %v10546_v29  ;;  %6388 = vmatprep.mubr.bf16.mxu0 %v11518_v61 }
 0x53f   :  { %6358 = vmatprep.subr.bf16.mxu0 %v10554_v31  ;;  %v10591_v31 = vld [vmem:[#allocation14 + $0xcb0] ss:$52 sps:$4 sm:$0xff]  }
 0x540   :  { %6115 = vmatpush1.bf16.msra.mxu1 %v10549_v32  ;;  %v10598_v32 = vld [vmem:[#allocation14 + $0xd1c] ss:$52 sps:$4 sm:$0xff]  }
 0x541   :  { %6116 = vmatprep.subr.bf16.mxu1 %v10557_v33  ;;  %v10595_v33 = vld [vmem:[#allocation14 + $0x30] ss:$52 sps:$4 sm:$0xff]  }
 0x542   :  { %6359 = vmatpush1.bf16.msra.mxu0 %v10552_v34  ;;  %v10599_v34 = vld [vmem:[#allocation14 + $0x3d8] ss:$52 sps:$4 sm:$0xff]  }
 0x543   :  { %6360 = vmatprep.subr.bf16.mxu0 %v10560_v36  ;;  %v10596_v36 = vld [vmem:[#allocation14 + $0xd18] ss:$52 sps:$4 sm:$0xff]  }
 0x544   :  { %6117 = vmatpush1.bf16.msra.mxu1 %v10555_v24  ;;  %v10603_v24 = vld [vmem:[#allocation14 + $0xd84] ss:$52 sps:$4 sm:$0xff]  }
 0x545   :  { %6118 = vmatprep.subr.bf16.mxu1 %v10563_v37  ;;  %v10600_v37 = vld [vmem:[#allocation14 + $0x98] ss:$52 sps:$4 sm:$0xff]  }
 0x546   :  { %6361 = vmatpush1.bf16.msra.mxu0 %v10558_v38  ;;  %v10604_v38 = vld [vmem:[#allocation14 + $0x440] ss:$52 sps:$4 sm:$0xff]  }
 0x547   :  { %6362 = vmatprep.subr.bf16.mxu0 %v10566_v39  ;;  %v10601_v39 = vld [vmem:[#allocation14 + $0xd80] ss:$52 sps:$4 sm:$0xff]  }
 0x548   :  { %6119 = vmatpush1.bf16.msra.mxu1 %v10561_v40  ;;  %v10608_v40 = vld [vmem:[#allocation14 + $0xdec] ss:$52 sps:$4 sm:$0xff]  }
 0x549   :  { %6120 = vmatprep.subr.bf16.mxu1 %v10569_v41  ;;  %v10605_v41 = vld [vmem:[#allocation14 + $0x100] ss:$52 sps:$4 sm:$0xff]  }
 0x54a   :  { %6363 = vmatpush1.bf16.msra.mxu0 %v10564_v42  ;;  %v10609_v42 = vld [vmem:[#allocation14 + $0x4a8] ss:$52 sps:$4 sm:$0xff]  }
 0x54b   :  { %6364 = vmatprep.subr.bf16.mxu0 %v10572_v43  ;;  %v10606_v43 = vld [vmem:[#allocation14 + $0xde8] ss:$52 sps:$4 sm:$0xff]  }
 0x54c   :  { %6121 = vmatpush1.bf16.msra.mxu1 %v10567_v44  ;;  %v10613_v44 = vld [vmem:[#allocation14 + $0xe54] ss:$52 sps:$4 sm:$0xff]  }
 0x54d   :  { %6122 = vmatprep.subr.bf16.mxu1 %v10575_v47  ;;  %v10610_v47 = vld [vmem:[#allocation14 + $0x168] ss:$52 sps:$4 sm:$0xff]  }
 0x54e   :  { %6365 = vmatpush1.bf16.msra.mxu0 %v10570_v49  ;;  %v10614_v49 = vld [vmem:[#allocation14 + $0x510] ss:$52 sps:$4 sm:$0xff]  }
 0x54f   :  { %6366 = vmatprep.subr.bf16.mxu0 %v10578_v50  ;;  %v10611_v50 = vld [vmem:[#allocation14 + $0xe50] ss:$52 sps:$4 sm:$0xff]  }
 0x550   :  { %v6046_v62 = vpop.f32.mrb[16].mxu0  ;;  %6123 = vmatpush1.bf16.msra.mxu1 %v10573_v51  ;;  %v10618_v51 = vld [vmem:[#allocation14 + $0xebc] ss:$52 sps:$4 sm:$0xff]  }
 0x551   :  { %v9593_v1 = vadd.f32 %v6046_v62, %v1797_v52  ;;  %v6048_v2 = vpop.f32.mrb[17].mxu0  ;;  %6124 = vmatprep.subr.bf16.mxu1 %v10581_v53  ;;  %v10619_v53 = vld [vmem:[#allocation14 + $0x578] ss:$52 sps:$4 sm:$0xff]   ;;  %v10624_v62 = vld [vmem:[#allocation14 + $0x5e0] ss:$52 sps:$4 sm:$0xff]  }
 0x552   :  { %v9594_v4 = vadd.f32 %v6048_v2, %v1801_v54  ;;  %v6050_v5 = vpop.f32.mrb[18].mxu0  ;;  %6367 = vmatpush1.bf16.msra.mxu0 %v10576_v59  ;;  %v10623_v59 = vld [vmem:[#allocation14 + $0xf24] ss:$52 sps:$4 sm:$0xff]   ;;  %v10625_v2 = vld [vmem:[#allocation14 + $0x2a0] ss:$52 sps:$4 sm:$0xff]  }
 0x553   :  { %v9595_v10 = vadd.f32 %v6050_v5, %v1797_v52  ;;  %v6052_v18 = vpop.f32.mrb[19].mxu0  ;;  %6368 = vmatprep.subr.bf16.mxu0 %v10584_v60  ;;  %v6739_v13 = vmax.f32 %v9593_v1, 0.0  ;;  %v10615_v52 = vld [vmem:[#allocation14 + $0x1d0] ss:$52 sps:$4 sm:$0xff]   ;;  %v10620_v60 = vld [vmem:[#allocation14 + $0x238] ss:$52 sps:$4 sm:$0xff]  }
 0x554   :  { %v9596_v12 = vadd.f32 %v6052_v18, %v1801_v54  ;;  %6125 = vmatpush1.bf16.msra.mxu1 %v10579_v63  ;;  %v6740_v30 = vmax.f32 %v9594_v4, 0.0  ;;  %v10616_v54 = vld [vmem:[#allocation14 + $0xeb8] ss:$52 sps:$4 sm:$0xff]   ;;  %v10621_v63 = vld [vmem:[#allocation14 + $0xf20] ss:$52 sps:$4 sm:$0xff]  }
 0x555   :  { %v6752_v14 = vmax.f32 %v9595_v10, 0.0  ;;  %6126 = vmatprep.subr.bf16.mxu1 %v10587_v3  ;;  %v10628_v1 = vld [vmem:[#allocation14 + $0xf8c] ss:$52 sps:$4 sm:$0xff]   ;;  %v10629_v3 = vld [vmem:[#allocation14 + $0x648] ss:$52 sps:$4 sm:$0xff]  }
 0x556   :  { %v6753_v16 = vmax.f32 %v9596_v12, 0.0  ;;  %6369 = vmatpush1.bf16.msra.mxu0 %v10582_v6  ;;  %v10626_v4 = vld [vmem:[#allocation14 + $0xf88] ss:$52 sps:$4 sm:$0xff]   ;;  %v10634_v10 = vld [vmem:[#allocation14 + $0x1070] ss:$52 sps:$4 sm:$0xff]  }
 0x557   :  { %v11866_v19 = vpack.c.bf16 %v6752_v14, %v6739_v13  ;;  %6370 = vmatprep.subr.bf16.mxu0 %v10590_v11  ;;  %v10633_v5 = vld [vmem:[#allocation14 + $0xff4] ss:$52 sps:$4 sm:$0xff]   ;;  %v10631_v18 = vld [vmem:[#allocation14 + $0xff0] ss:$52 sps:$4 sm:$0xff]   ;;  %v10636_v13 = vld [vmem:[#allocation14 + $0x1058] ss:$52 sps:$4 sm:$0xff]  }
 0x558   :  { %v11868_v29 = vpack.c.bf16 %v6753_v16, %v6740_v30  ;;  %6127 = vmatpush1.bf16.msra.mxu1 %v10585_v9  ;;  %v10630_v6 = vld [vmem:[#allocation14 + $0x308] ss:$52 sps:$4 sm:$0xff]   ;;  %v10635_v12 = vld [vmem:[#allocation14 + $0xd30] ss:$52 sps:$4 sm:$0xff]   ;;  %v10639_v9 = vld [vmem:[#allocation14 + $0x10d8] ss:$52 sps:$4 sm:$0xff]  }
 0x559   :  { %6128 = vmatprep.subr.bf16.mxu1 %v10593_v28  ;;  %v10638_v11 = vld [vmem:[#allocation14 + $0x105c] ss:$52 sps:$4 sm:$0xff]   ;;  %v10643_v14 = vld [vmem:[#allocation14 + $0x10c4] ss:$52 sps:$4 sm:$0xff]   ;;  %v10644_v30 = vld [vmem:[#allocation14 + $0x1140] ss:$52 sps:$4 sm:$0xff]  }
 0x55a   :  { %6371 = vmatpush1.bf16.msra.mxu0 %v10588_v17  ;;  %v10640_v28 = vld [vmem:[#allocation14 + $0xd98] ss:$52 sps:$4 sm:$0xff]   ;;  %v10641_v16 = vld [vmem:[#allocation14 + $0x10c0] ss:$52 sps:$4 sm:$0xff]  }
 0x55b   :  { %9426 = vmatprep.subr.bf16.mxu0 %v10594_v27  ;;  %v10648_v17 = vld [vmem:[#allocation14 + $0x112c] ss:$52 sps:$4 sm:$0xff]  }
 0x55c   :  { %6129 = vmatpush1.bf16.msra.mxu1 %v10591_v31  ;;  %v10645_v27 = vld [vmem:[#allocation14 + $0xe00] ss:$52 sps:$4 sm:$0xff]   ;;  %v10649_v31 = vld [vmem:[#allocation14 + $0x11a8] ss:$52 sps:$4 sm:$0xff]  }
 0x55d   :  { %6389 = vmatmul.mubr.bf16.vlgmr.msra.gmra.mrb[20].mxu0 %v11805_v46  ;;  %6141 = vmatprep.subr.bf16.mxu1 %v10598_v32  ;;  %v10646_v32 = vld [vmem:[#allocation14 + $0x1128] ss:$52 sps:$4 sm:$0xff]  }
 0x55e   :  { %9427 = vmatpush3.bf16.msra.mxu0 %v10595_v33  ;;  %6603 = vmatprep.mubr.bf16.mxu0 %v11783_v57  ;;  %v10653_v33 = vld [vmem:[#allocation14 + $0x1194] ss:$52 sps:$4 sm:$0xff]  }
 0x55f   :  { %6131 = vmatmul.mubr.bf16.vlgmr.msra.gmra.mrb[20].mxu1 %v11781_v56  ;;  %9428 = vmatprep.subr.bf16.mxu0 %v10599_v34  ;;  %v10650_v34 = vld [vmem:[#allocation14 + $0xe68] ss:$52 sps:$4 sm:$0xff]  }
 0x560   :  { %6142 = vmatpush1.bf16.msra.mxu1 %v10596_v36  ;;  %6173 = vmatprep.mubr.bf16.mxu1 %v11807_v48  ;;  %v10654_v36 = vld [vmem:[#allocation14 + $0x1210] ss:$52 sps:$4 sm:$0xff]  }
 0x561   :  { %6143 = vmatprep.subr.bf16.mxu1 %v10603_v24  ;;  %v10651_v24 = vld [vmem:[#allocation14 + $0x1190] ss:$52 sps:$4 sm:$0xff]  }
 0x562   :  { %9429 = vmatpush3.bf16.msra.mxu0 %v10600_v37  ;;  %v10658_v37 = vld [vmem:[#allocation14 + $0x11fc] ss:$52 sps:$4 sm:$0xff]  }
 0x563   :  { %9430 = vmatprep.subr.bf16.mxu0 %v10604_v38  ;;  %v10655_v38 = vld [vmem:[#allocation14 + $0xed0] ss:$52 sps:$4 sm:$0xff]  }
 0x564   :  { %6144 = vmatpush1.bf16.msra.mxu1 %v10601_v39  ;;  %v10659_v39 = vld [vmem:[#allocation14 + $0x1278] ss:$52 sps:$4 sm:$0xff]  }
 0x565   :  { %6145 = vmatprep.subr.bf16.mxu1 %v10608_v40  ;;  %v10656_v40 = vld [vmem:[#allocation14 + $0x11f8] ss:$52 sps:$4 sm:$0xff]  }
 0x566   :  { %9431 = vmatpush3.bf16.msra.mxu0 %v10605_v41  ;;  %v10663_v41 = vld [vmem:[#allocation14 + $0x1264] ss:$52 sps:$4 sm:$0xff]  }
 0x567   :  { %9432 = vmatprep.subr.bf16.mxu0 %v10609_v42  ;;  %v10660_v42 = vld [vmem:[#allocation14 + $0xf38] ss:$52 sps:$4 sm:$0xff]  }
 0x568   :  { %6146 = vmatpush1.bf16.msra.mxu1 %v10606_v43  ;;  %v10664_v43 = vld [vmem:[#allocation14 + $0x12e0] ss:$52 sps:$4 sm:$0xff]  }
 0x569   :  { %6147 = vmatprep.subr.bf16.mxu1 %v10613_v44  ;;  %v10661_v44 = vld [vmem:[#allocation14 + $0x1260] ss:$52 sps:$4 sm:$0xff]  }
 0x56a   :  { %9433 = vmatpush3.bf16.msra.mxu0 %v10610_v47  ;;  %v10668_v47 = vld [vmem:[#allocation14 + $0x12cc] ss:$52 sps:$4 sm:$0xff]  }
 0x56b   :  { %9434 = vmatprep.subr.bf16.mxu0 %v10614_v49  ;;  %v10665_v49 = vld [vmem:[#allocation14 + $0xfa0] ss:$52 sps:$4 sm:$0xff]  }
 0x56c   :  { %6148 = vmatpush1.bf16.msra.mxu1 %v10611_v50  ;;  %v10669_v50 = vld [vmem:[#allocation14 + $0x1348] ss:$52 sps:$4 sm:$0xff]  }
 0x56d   :  { %6149 = vmatprep.subr.bf16.mxu1 %v10618_v51  ;;  %v10666_v51 = vld [vmem:[#allocation14 + $0x12c8] ss:$52 sps:$4 sm:$0xff]  }
 0x56e   :  { %9435 = vmatpush3.bf16.msra.mxu0 %v10615_v52  ;;  %v10673_v52 = vld [vmem:[#allocation14 + $0x1334] ss:$52 sps:$4 sm:$0xff]  }
 0x56f   :  { %9436 = vmatprep.subr.bf16.mxu0 %v10619_v53  ;;  %v10670_v53 = vld [vmem:[#allocation14 + $0x1008] ss:$52 sps:$4 sm:$0xff]  }
 0x570   :  { %6150 = vmatpush1.bf16.msra.mxu1 %v10616_v54  ;;  %v10676_v54 = vld [vmem:[#allocation17 + $0x4] ss:$8 sps:$4 sm:$0xff]  }
 0x571   :  { %6151 = vmatprep.subr.bf16.mxu1 %v10623_v59  ;;  %v10671_v59 = vld [vmem:[#allocation14 + $0x1330] ss:$52 sps:$4 sm:$0xff]  }
 0x572   :  { %9437 = vmatpush3.bf16.msra.mxu0 %v10620_v60  ;;  %v10679_v60 = vld [vmem:[#allocation14 + $0x139c] ss:$52 sps:$4 sm:$0xff]  }
 0x573   :  { %9438 = vmatprep.subr.bf16.mxu0 %v10624_v62  ;;  %v10674_v62 = vld [vmem:[#allocation17] ss:$8 sps:$4 sm:$0xff]  }
 0x574   :  { %6152 = vmatpush1.bf16.msra.mxu1 %v10621_v63  ;;  %v10682_v63 = vld [vmem:[#allocation17 + $0x14] ss:$8 sps:$4 sm:$0xff]  }
 0x575   :  { %6153 = vmatprep.subr.bf16.mxu1 %v10628_v1  ;;  %v10677_v1 = vld [vmem:[#allocation14 + $0x1398] ss:$52 sps:$4 sm:$0xff]  }
 0x576   :  { %9439 = vmatpush3.bf16.msra.mxu0 %v10625_v2  ;;  %v10685_v2 = vld [vmem:[#allocation14 + $0x1404] ss:$52 sps:$4 sm:$0xff]  }
 0x577   :  { %9440 = vmatprep.subr.bf16.mxu0 %v10629_v3  ;;  %v10680_v3 = vld [vmem:[#allocation17 + $0x10] ss:$8 sps:$4 sm:$0xff]  }
 0x578   :  { %6154 = vmatpush1.bf16.msra.mxu1 %v10626_v4  ;;  %v10688_v4 = vld [vmem:[#allocation17 + $0x24] ss:$8 sps:$4 sm:$0xff]  }
 0x579   :  { %6155 = vmatprep.subr.bf16.mxu1 %v10633_v5  ;;  %v10683_v5 = vld [vmem:[#allocation14 + $0x1400] ss:$52 sps:$4 sm:$0xff]  }
 0x57a   :  { %9441 = vmatpush3.bf16.msra.mxu0 %v10630_v6  ;;  %v10691_v6 = vld [vmem:[#allocation14 + $0x146c] ss:$52 sps:$4 sm:$0xff]  }
 0x57b   :  { %9470 = vmatprep.subr.bf16.mxu0 %v10634_v10  ;;  %v10686_v10 = vld [vmem:[#allocation17 + $0x20] ss:$8 sps:$4 sm:$0xff]  }
 0x57c   :  { %6156 = vmatpush1.bf16.msra.mxu1 %v10631_v18  ;;  %v10694_v18 = vld [vmem:[#allocation17 + $0x34] ss:$8 sps:$4 sm:$0xff]  }
 0x57d   :  { %6604 = vmatmul.mubr.bf16.vlgmr.msra.gmra.mrb[24].mxu0 %v11779_v55  ;;  %6157 = vmatprep.subr.bf16.mxu1 %v10638_v11  ;;  %v10689_v11 = vld [vmem:[#allocation14 + $0x1468] ss:$52 sps:$4 sm:$0xff]  }
 0x57e   :  { %9471 = vmatpush3.bf16.msra.mxu0 %v10635_v12  ;;  %6685 = vmatprep.mubr.bf16.mxu0 %v11807_v48  ;;  %v10697_v12 = vld [vmem:[#allocation14 + $0x14d4] ss:$52 sps:$4 sm:$0xff]  }
 0x57f   :  { %9472 = vmatprep.subr.bf16.mxu0 %v10639_v9  ;;  %v10700_v9 = vld [vmem:[#allocation17 + $0x44] ss:$8 sps:$4 sm:$0xff]  }
 0x580   :  { %6158 = vmatpush1.bf16.msra.mxu1 %v10636_v13  ;;  %v10695_v13 = vld [vmem:[#allocation14 + $0x14d0] ss:$52 sps:$4 sm:$0xff]  }
 0x581   :  { %6159 = vmatprep.subr.bf16.mxu1 %v10643_v14  ;;  %v10703_v14 = vld [vmem:[#allocation14 + $0x153c] ss:$52 sps:$4 sm:$0xff]  }
 0x582   :  { %9473 = vmatpush3.bf16.msra.mxu0 %v10640_v28  ;;  %v10698_v28 = vld [vmem:[#allocation17 + $0x40] ss:$8 sps:$4 sm:$0xff]  }
 0x583   :  { %9474 = vmatprep.subr.bf16.mxu0 %v10644_v30  ;;  %v10706_v30 = vld [vmem:[#allocation17 + $0x54] ss:$8 sps:$4 sm:$0xff]  }
 0x584   :  { %6160 = vmatpush1.bf16.msra.mxu1 %v10641_v16  ;;  %v10701_v16 = vld [vmem:[#allocation14 + $0x1538] ss:$52 sps:$4 sm:$0xff]  }
 0x585   :  { %6161 = vmatprep.subr.bf16.mxu1 %v10648_v17  ;;  %v10709_v17 = vld [vmem:[#allocation14 + $0x15a4] ss:$52 sps:$4 sm:$0xff]  }
 0x586   :  { %9475 = vmatpush3.bf16.msra.mxu0 %v10645_v27  ;;  %v10704_v27 = vld [vmem:[#allocation17 + $0x50] ss:$8 sps:$4 sm:$0xff]  }
 0x587   :  { %9476 = vmatprep.subr.bf16.mxu0 %v10649_v31  ;;  %v1789_v31 = vrot.slane %v11839_v35, %v11761_v23 }
 0x588   :  { %6162 = vmatpush1.bf16.msra.mxu1 %v10646_v32  ;;  %v10712_v32 = vld [vmem:[#allocation17 + $0x64] ss:$8 sps:$4 sm:$0xff]  }
 0x589   :  { %6163 = vmatprep.subr.bf16.mxu1 %v10653_v33  ;;  %v1793_v33 = vrot.slane %v11839_v35, %v11769_v26  ;;  %v10716_v35 = vld [vmem:[#allocation17 + $0x70] ss:$8 sps:$4 sm:$0xff]  }
 0x58a   :  { %9477 = vmatpush3.bf16.msra.mxu0 %v10650_v34  ;;  %v10707_v34 = vld [vmem:[#allocation14 + $0x15a0] ss:$52 sps:$4 sm:$0xff]  }
 0x58b   :  { %9478 = vmatprep.subr.bf16.mxu0 %v10654_v36  ;;  %v10715_v36 = vld [vmem:[#allocation14 + $0x160c] ss:$52 sps:$4 sm:$0xff]  }
 0x58c   :  { %6164 = vmatpush1.bf16.msra.mxu1 %v10651_v24 }
 0x58d   :  { %6165 = vmatprep.subr.bf16.mxu1 %v10658_v37  ;;  %v10710_v37 = vld [vmem:[#allocation17 + $0x60] ss:$8 sps:$4 sm:$0xff]  }
 0x58e   :  { %9479 = vmatpush3.bf16.msra.mxu0 %v10655_v38 }
 0x58f   :  { %9480 = vmatprep.subr.bf16.mxu0 %v10659_v39 }
 0x590   :  { %6166 = vmatpush1.bf16.msra.mxu1 %v10656_v40  ;;  %v10718_v40 = vld [vmem:[#allocation17 + $0x74] ss:$8 sps:$4 sm:$0xff]  }
 0x591   :  { %6167 = vmatprep.subr.bf16.mxu1 %v10663_v41 }
 0x592   :  { %9481 = vmatpush3.bf16.msra.mxu0 %v10660_v42 }
 0x593   :  { %9482 = vmatprep.subr.bf16.mxu0 %v10664_v43  ;;  %v10713_v43 = vld [vmem:[#allocation14 + $0x1608] ss:$52 sps:$4 sm:$0xff]  }
 0x594   :  { %6168 = vmatpush1.bf16.msra.mxu1 %v10661_v44 }
 0x595   :  { %6169 = vmatprep.subr.bf16.mxu1 %v10668_v47 }
 0x596   :  { %9483 = vmatpush3.bf16.msra.mxu0 %v10665_v49  ;;  %v10721_v49 = vld [vmem:[#allocation14 + $0x1674] ss:$52 sps:$4 sm:$0xff]  }
 0x597   :  { %9484 = vmatprep.subr.bf16.mxu0 %v10669_v50 }
 0x598   :  { %6170 = vmatpush1.bf16.msra.mxu1 %v10666_v51 }
 0x599   :  { %6171 = vmatprep.subr.bf16.mxu1 %v10673_v52 }
 0x59a   :  { %9485 = vmatpush3.bf16.msra.mxu0 %v10670_v53  ;;  %v10724_v53 = vld [vmem:[#allocation17 + $0x84] ss:$8 sps:$4 sm:$0xff]  }
 0x59b   :  { %8034 = vmatprep.subr.bf16.mxu0 %v10676_v54 }
 0x59c   :  { %6172 = vmatpush1.bf16.msra.mxu1 %v10671_v59 }
 0x59d   :  { %6686 = vmatmul.mubr.bf16.vlgmr.msra.gmra.mrb[28].mxu0 %v11803_v45  ;;  %6184 = vmatprep.subr.bf16.mxu1 %v10679_v60  ;;  %v10719_v60 = vld [vmem:[#allocation14 + $0x1670] ss:$52 sps:$4 sm:$0xff]  }
 0x59e   :  { %8035 = vmatpush1.bf16.msra.mxu0 %v10674_v62  ;;  %8066 = vmatprep.mubr.bf16.mxu0 %v11851_v15  ;;  %v10692_v15 = vld [vmem:[#allocation17 + $0x30] ss:$8 sps:$4 sm:$0xff]  }
 0x59f   :  { %6174 = vmatmul.mubr.bf16.vlgmr.msra.gmra.mrb[20].mxu1 %v11803_v45  ;;  %8036 = vmatprep.subr.bf16.mxu0 %v10682_v63  ;;  %v10727_v63 = vld [vmem:[#allocation14 + $0x2c] ss:$52 sps:$4 sm:$0xff]  }
 0x5a0   :  { %6185 = vmatpush1.bf16.msra.mxu1 %v10677_v1  ;;  %6216 = vmatprep.mubr.bf16.mxu1 %v11518_v61 }
 0x5a1   :  { %6186 = vmatprep.subr.bf16.mxu1 %v10685_v2  ;;  %v10722_v2 = vld [vmem:[#allocation17 + $0x80] ss:$8 sps:$4 sm:$0xff]  }
 0x5a2   :  { %8037 = vmatpush1.bf16.msra.mxu0 %v10680_v3  ;;  %v10730_v3 = vld [vmem:[#allocation17 + $0x94] ss:$8 sps:$4 sm:$0xff]  }
 0x5a3   :  { %8038 = vmatprep.subr.bf16.mxu0 %v10688_v4  ;;  %v10725_v4 = vld [vmem:[#allocation14 + $0x28] ss:$52 sps:$4 sm:$0xff]  }
 0x5a4   :  { %6187 = vmatpush1.bf16.msra.mxu1 %v10683_v5  ;;  %v10733_v5 = vld [vmem:[#allocation14 + $0x94] ss:$52 sps:$4 sm:$0xff]  }
 0x5a5   :  { %6188 = vmatprep.subr.bf16.mxu1 %v10691_v6  ;;  %v10728_v6 = vld [vmem:[#allocation17 + $0x90] ss:$8 sps:$4 sm:$0xff]  }
 0x5a6   :  { %8039 = vmatpush1.bf16.msra.mxu0 %v10686_v10  ;;  %v10736_v10 = vld [vmem:[#allocation17 + $0xa4] ss:$8 sps:$4 sm:$0xff]  }
 0x5a7   :  { %8040 = vmatprep.subr.bf16.mxu0 %v10694_v18  ;;  %v10731_v18 = vld [vmem:[#allocation14 + $0x90] ss:$52 sps:$4 sm:$0xff]  }
 0x5a8   :  { %6189 = vmatpush1.bf16.msra.mxu1 %v10689_v11  ;;  %v10739_v11 = vld [vmem:[#allocation14 + $0xfc] ss:$52 sps:$4 sm:$0xff]  }
 0x5a9   :  { %6190 = vmatprep.subr.bf16.mxu1 %v10697_v12  ;;  %v10734_v12 = vld [vmem:[#allocation17 + $0xa0] ss:$8 sps:$4 sm:$0xff]  }
 0x5aa   :  { %8041 = vmatpush1.bf16.msra.mxu0 %v10692_v15  ;;  %v10742_v15 = vld [vmem:[#allocation17 + $0xb4] ss:$8 sps:$4 sm:$0xff]  }
 0x5ab   :  { %8042 = vmatprep.subr.bf16.mxu0 %v10700_v9  ;;  %v10737_v9 = vld [vmem:[#allocation14 + $0xf8] ss:$52 sps:$4 sm:$0xff]  }
 0x5ac   :  { %6191 = vmatpush1.bf16.msra.mxu1 %v10695_v13  ;;  %v10745_v13 = vld [vmem:[#allocation14 + $0x164] ss:$52 sps:$4 sm:$0xff]  }
 0x5ad   :  { %6192 = vmatprep.subr.bf16.mxu1 %v10703_v14  ;;  %v10740_v14 = vld [vmem:[#allocation17 + $0xb0] ss:$8 sps:$4 sm:$0xff]  }
 0x5ae   :  { %8043 = vmatpush1.bf16.msra.mxu0 %v10698_v28  ;;  %v10748_v28 = vld [vmem:[#allocation17 + $0xc4] ss:$8 sps:$4 sm:$0xff]  }
 0x5af   :  { %8044 = vmatprep.subr.bf16.mxu0 %v10706_v30  ;;  %v10743_v30 = vld [vmem:[#allocation14 + $0x160] ss:$52 sps:$4 sm:$0xff]  }
 0x5b0   :  { %6193 = vmatpush1.bf16.msra.mxu1 %v10701_v16  ;;  %v10751_v16 = vld [vmem:[#allocation14 + $0x1cc] ss:$52 sps:$4 sm:$0xff]  }
 0x5b1   :  { %6194 = vmatprep.subr.bf16.mxu1 %v10709_v17  ;;  %v10754_v17 = vld [vmem:[#allocation17 + $0xd4] ss:$8 sps:$4 sm:$0xff]  }
 0x5b2   :  { %8045 = vmatpush1.bf16.msra.mxu0 %v10704_v27  ;;  %v5874_v24 = vpop.f32.mrb[16].mxu1  ;;  %v10749_v27 = vld [vmem:[#allocation14 + $0x1c8] ss:$52 sps:$4 sm:$0xff]  }
 0x5b3   :  { %v9589_v38 = vadd.f32 %v5874_v24, %v1789_v31  ;;  %v5876_v39 = vpop.f32.mrb[17].mxu1  ;;  %8046 = vmatprep.subr.bf16.mxu0 %v10712_v32  ;;  %v10752_v32 = vld [vmem:[#allocation17 + $0xd0] ss:$8 sps:$4 sm:$0xff]   ;;  %v10758_v24 = vld [vmem:[#allocation17 + $0xe0] ss:$8 sps:$4 sm:$0xff]  }
 0x5b4   :  { %v9590_v41 = vadd.f32 %v5876_v39, %v1793_v33  ;;  %v5878_v42 = vpop.f32.mrb[18].mxu1  ;;  %6195 = vmatpush1.bf16.msra.mxu1 %v10707_v34  ;;  %v10755_v34 = vld [vmem:[#allocation14 + $0x230] ss:$52 sps:$4 sm:$0xff]  }
 0x5b5   :  { %v9591_v44 = vadd.f32 %v5878_v42, %v1789_v31  ;;  %v5880_v47 = vpop.f32.mrb[19].mxu1  ;;  %6196 = vmatprep.subr.bf16.mxu1 %v10715_v36  ;;  %v6737_v51 = vmax.f32 %v9589_v38, 0.0  ;;  %v10757_v31 = vld [vmem:[#allocation14 + $0x234] ss:$52 sps:$4 sm:$0xff]   ;;  %v10763_v36 = vld [vmem:[#allocation14 + $0x29c] ss:$52 sps:$4 sm:$0xff]  }
 0x5b6   :  { %v9592_v50 = vadd.f32 %v5880_v47, %v1793_v33  ;;  %8047 = vmatpush1.bf16.msra.mxu0 %v10710_v37  ;;  %v6738_v54 = vmax.f32 %v9590_v41, 0.0  ;;  %v10760_v33 = vld [vmem:[#allocation17 + $0xe4] ss:$8 sps:$4 sm:$0xff]   ;;  %v10766_v37 = vld [vmem:[#allocation17 + $0xf4] ss:$8 sps:$4 sm:$0xff]  }
 0x5b7   :  { %v6750_v52 = vmax.f32 %v9591_v44, 0.0  ;;  %8048 = vmatprep.subr.bf16.mxu0 %v10718_v40  ;;  %v10761_v38 = vld [vmem:[#allocation14 + $0x298] ss:$52 sps:$4 sm:$0xff]   ;;  %v10764_v40 = vld [vmem:[#allocation17 + $0xf0] ss:$8 sps:$4 sm:$0xff]  }
 0x5b8   :  { %v6751_v59 = vmax.f32 %v9592_v50, 0.0  ;;  %6197 = vmatpush1.bf16.msra.mxu1 %v10713_v43  ;;  %v10769_v39 = vld [vmem:[#allocation14 + $0x304] ss:$52 sps:$4 sm:$0xff]   ;;  %v10767_v42 = vld [vmem:[#allocation14 + $0x300] ss:$52 sps:$4 sm:$0xff]  }
 0x5b9   :  { %v11884_v62 = vpack.c.bf16 %v6750_v52, %v6737_v51  ;;  %6198 = vmatprep.subr.bf16.mxu1 %v10721_v49  ;;  %v10772_v41 = vld [vmem:[#allocation17 + $0x104] ss:$8 sps:$4 sm:$0xff]   ;;  %v10775_v43 = vld [vmem:[#allocation14 + $0x36c] ss:$52 sps:$4 sm:$0xff]  }
 0x5ba   :  { %v11886_v1 = vpack.c.bf16 %v6751_v59, %v6738_v54  ;;  %8049 = vmatpush1.bf16.msra.mxu0 %v10716_v35  ;;  %v10770_v44 = vld [vmem:[#allocation17 + $0x100] ss:$8 sps:$4 sm:$0xff]   ;;  %v10778_v47 = vld [vmem:[#allocation17 + $0x114] ss:$8 sps:$4 sm:$0xff]   ;;  %v10776_v35 = vld [vmem:[#allocation17 + $0x110] ss:$8 sps:$4 sm:$0xff]  }
 0x5bb   :  { %8050 = vmatprep.subr.bf16.mxu0 %v10724_v53  ;;  %v10773_v49 = vld [vmem:[#allocation14 + $0x368] ss:$52 sps:$4 sm:$0xff]   ;;  %v10779_v52 = vld [vmem:[#allocation14 + $0x3d0] ss:$52 sps:$4 sm:$0xff]  }
 0x5bc   :  { %6199 = vmatpush1.bf16.msra.mxu1 %v10719_v60  ;;  %v10781_v50 = vld [vmem:[#allocation14 + $0x3d4] ss:$52 sps:$4 sm:$0xff]   ;;  %v10787_v53 = vld [vmem:[#allocation14 + $0x43c] ss:$52 sps:$4 sm:$0xff]   ;;  %v10785_v60 = vld [vmem:[#allocation14 + $0x438] ss:$52 sps:$4 sm:$0xff]  }
 0x5bd   :  { %6399 = vmatprep.subr.bf16.mxu1 %v10727_v63  ;;  %v10784_v51 = vld [vmem:[#allocation17 + $0x124] ss:$8 sps:$4 sm:$0xff]   ;;  %v10782_v54 = vld [vmem:[#allocation17 + $0x120] ss:$8 sps:$4 sm:$0xff]   ;;  %v10790_v59 = vld [vmem:[#allocation17 + $0x134] ss:$8 sps:$4 sm:$0xff]  }
 0x5be   :  { %8051 = vmatpush1.bf16.msra.mxu0 %v10722_v2  ;;  %v10788_v63 = vld [vmem:[#allocation17 + $0x130] ss:$8 sps:$4 sm:$0xff]   ;;  %v10796_v2 = vld [vmem:[#allocation17 + $0x144] ss:$8 sps:$4 sm:$0xff]  }
 0x5bf   :  { %6217 = vmatmul.mubr.bf16.vlgmr.msra.gmra.mrb[20].mxu1 %v11805_v46  ;;  %8052 = vmatprep.subr.bf16.mxu0 %v10730_v3  ;;  %v10799_v3 = vld [vmem:[#allocation14 + $0x50c] ss:$52 sps:$4 sm:$0xff]  }
 0x5c0   :  { %6400 = vmatpush1.bf16.msra.mxu1 %v10725_v4  ;;  %6431 = vmatprep.mubr.bf16.mxu1 %v11783_v57  ;;  %v10746_v57 = vld [vmem:[#allocation17 + $0xc0] ss:$8 sps:$4 sm:$0xff]  }
 0x5c1   :  { %6401 = vmatprep.subr.bf16.mxu1 %v10733_v5  ;;  %v10794_v4 = vld [vmem:[#allocation17 + $0x140] ss:$8 sps:$4 sm:$0xff]   ;;  %v10802_v5 = vld [vmem:[#allocation17 + $0x154] ss:$8 sps:$4 sm:$0xff]  }
 0x5c2   :  { %8053 = vmatpush1.bf16.msra.mxu0 %v10728_v6  ;;  %v10797_v6 = vld [vmem:[#allocation14 + $0x508] ss:$52 sps:$4 sm:$0xff]  }
 0x5c3   :  { %8054 = vmatprep.subr.bf16.mxu0 %v10736_v10  ;;  %v10805_v10 = vld [vmem:[#allocation14 + $0x574] ss:$52 sps:$4 sm:$0xff]  }
 0x5c4   :  { %6402 = vmatpush1.bf16.msra.mxu1 %v10731_v18  ;;  %v10800_v18 = vld [vmem:[#allocation17 + $0x150] ss:$8 sps:$4 sm:$0xff]  }
 0x5c5   :  { %6403 = vmatprep.subr.bf16.mxu1 %v10739_v11  ;;  %v10808_v11 = vld [vmem:[#allocation17 + $0x164] ss:$8 sps:$4 sm:$0xff]  }
 0x5c6   :  { %8055 = vmatpush1.bf16.msra.mxu0 %v10734_v12  ;;  %v10803_v12 = vld [vmem:[#allocation14 + $0x570] ss:$52 sps:$4 sm:$0xff]  }
 0x5c7   :  { %8056 = vmatprep.subr.bf16.mxu0 %v10742_v15  ;;  %v10811_v15 = vld [vmem:[#allocation14 + $0x5dc] ss:$52 sps:$4 sm:$0xff]  }
 0x5c8   :  { %6404 = vmatpush1.bf16.msra.mxu1 %v10737_v9  ;;  %v10806_v9 = vld [vmem:[#allocation17 + $0x160] ss:$8 sps:$4 sm:$0xff]  }
 0x5c9   :  { %6405 = vmatprep.subr.bf16.mxu1 %v10745_v13  ;;  %v10814_v13 = vld [vmem:[#allocation17 + $0x174] ss:$8 sps:$4 sm:$0xff]  }
 0x5ca   :  { %8057 = vmatpush1.bf16.msra.mxu0 %v10740_v14  ;;  %v10809_v14 = vld [vmem:[#allocation14 + $0x5d8] ss:$52 sps:$4 sm:$0xff]  }
 0x5cb   :  { %8058 = vmatprep.subr.bf16.mxu0 %v10748_v28  ;;  %v10817_v28 = vld [vmem:[#allocation14 + $0x644] ss:$52 sps:$4 sm:$0xff]  }
 0x5cc   :  { %6406 = vmatpush1.bf16.msra.mxu1 %v10743_v30  ;;  %v10812_v30 = vld [vmem:[#allocation17 + $0x170] ss:$8 sps:$4 sm:$0xff]  }
 0x5cd   :  { %6407 = vmatprep.subr.bf16.mxu1 %v10751_v16  ;;  %v10820_v16 = vld [vmem:[#allocation17 + $0x184] ss:$8 sps:$4 sm:$0xff]  }
 0x5ce   :  { %8059 = vmatpush1.bf16.msra.mxu0 %v10746_v57  ;;  %v10815_v57 = vld [vmem:[#allocation14 + $0x640] ss:$52 sps:$4 sm:$0xff]  }
 0x5cf   :  { %8060 = vmatprep.subr.bf16.mxu0 %v10754_v17  ;;  %v10823_v17 = vld [vmem:[#allocation14 + $0x6ac] ss:$52 sps:$4 sm:$0xff]  }
 0x5d0   :  { %6408 = vmatpush1.bf16.msra.mxu1 %v10749_v27  ;;  %v10818_v27 = vld [vmem:[#allocation17 + $0x180] ss:$8 sps:$4 sm:$0xff]  }
 0x5d1   :  { %6409 = vmatprep.subr.bf16.mxu1 %v10757_v31  ;;  %v10826_v31 = vld [vmem:[#allocation17 + $0x194] ss:$8 sps:$4 sm:$0xff]  }
 0x5d2   :  { %8061 = vmatpush1.bf16.msra.mxu0 %v10752_v32  ;;  %v10821_v32 = vld [vmem:[#allocation14 + $0x6a8] ss:$52 sps:$4 sm:$0xff]  }
 0x5d3   :  { %8062 = vmatprep.subr.bf16.mxu0 %v10760_v33  ;;  %v10829_v33 = vld [vmem:[#allocation14 + $0x714] ss:$52 sps:$4 sm:$0xff]  }
 0x5d4   :  { %6410 = vmatpush1.bf16.msra.mxu1 %v10755_v34  ;;  %v10824_v34 = vld [vmem:[#allocation17 + $0x190] ss:$8 sps:$4 sm:$0xff]  }
 0x5d5   :  { %6411 = vmatprep.subr.bf16.mxu1 %v10763_v36  ;;  %v10832_v36 = vld [vmem:[#allocation17 + $0x1a4] ss:$8 sps:$4 sm:$0xff]  }
 0x5d6   :  { %8063 = vmatpush1.bf16.msra.mxu0 %v10758_v24  ;;  %v10827_v24 = vld [vmem:[#allocation14 + $0x710] ss:$52 sps:$4 sm:$0xff]  }
 0x5d7   :  { %8064 = vmatprep.subr.bf16.mxu0 %v10766_v37  ;;  %v10835_v37 = vld [vmem:[#allocation14 + $0x77c] ss:$52 sps:$4 sm:$0xff]  }
 0x5d8   :  { %6412 = vmatpush1.bf16.msra.mxu1 %v10761_v38  ;;  %v10830_v38 = vld [vmem:[#allocation17 + $0x1a0] ss:$8 sps:$4 sm:$0xff]  }
 0x5d9   :  { %6413 = vmatprep.subr.bf16.mxu1 %v10769_v39  ;;  %v10838_v39 = vld [vmem:[#allocation17 + $0x1b4] ss:$8 sps:$4 sm:$0xff]  }
 0x5da   :  { %8065 = vmatpush1.bf16.msra.mxu0 %v10764_v40  ;;  %v10833_v40 = vld [vmem:[#allocation14 + $0x778] ss:$52 sps:$4 sm:$0xff]  }
 0x5db   :  { %8077 = vmatprep.subr.bf16.mxu0 %v10772_v41  ;;  %v10841_v41 = vld [vmem:[#allocation14 + $0x7e4] ss:$52 sps:$4 sm:$0xff]  }
 0x5dc   :  { %6414 = vmatpush1.bf16.msra.mxu1 %v10767_v42  ;;  %v10836_v42 = vld [vmem:[#allocation17 + $0x1b0] ss:$8 sps:$4 sm:$0xff]  }
 0x5dd   :  { %8067 = vmatmul.mubr.bf16.vlgmr.msra.gmra.mrb[32].mxu0 %v11849_v20  ;;  %6415 = vmatprep.subr.bf16.mxu1 %v10775_v43  ;;  %v10793_v20 = vld [vmem:[#allocation14 + $0x4a4] ss:$52 sps:$4 sm:$0xff]   ;;  %v10839_v43 = vld [vmem:[#allocation14 + $0x7e0] ss:$52 sps:$4 sm:$0xff]  }
 0x5de   :  { %8078 = vmatpush1.bf16.msra.mxu0 %v10770_v44  ;;  %8109 = vmatprep.mubr.bf16.mxu0 %v11886_v1  ;;  %v10791_v1 = vld [vmem:[#allocation14 + $0x4a0] ss:$52 sps:$4 sm:$0xff]  }
 0x5df   :  { %8079 = vmatprep.subr.bf16.mxu0 %v10778_v47  ;;  %v10847_v44 = vld [vmem:[#allocation14 + $0x84c] ss:$52 sps:$4 sm:$0xff]  }
 0x5e0   :  { %6416 = vmatpush1.bf16.msra.mxu1 %v10773_v49  ;;  %v10842_v47 = vld [vmem:[#allocation17 + $0x1c0] ss:$8 sps:$4 sm:$0xff]   ;;  %v10850_v49 = vld [vmem:[#allocation17 + $0x1d4] ss:$8 sps:$4 sm:$0xff]  }
 0x5e1   :  { %6417 = vmatprep.subr.bf16.mxu1 %v10781_v50  ;;  %v10845_v50 = vld [vmem:[#allocation14 + $0x848] ss:$52 sps:$4 sm:$0xff]  }
 0x5e2   :  { %8080 = vmatpush1.bf16.msra.mxu0 %v10776_v35  ;;  %v10853_v35 = vld [vmem:[#allocation14 + $0x8b4] ss:$52 sps:$4 sm:$0xff]  }
 0x5e3   :  { %8081 = vmatprep.subr.bf16.mxu0 %v10784_v51  ;;  %v10848_v51 = vld [vmem:[#allocation17 + $0x1d0] ss:$8 sps:$4 sm:$0xff]  }
 0x5e4   :  { %6418 = vmatpush1.bf16.msra.mxu1 %v10779_v52  ;;  %v10856_v52 = vld [vmem:[#allocation17 + $0x1e4] ss:$8 sps:$4 sm:$0xff]  }
 0x5e5   :  { %6419 = vmatprep.subr.bf16.mxu1 %v10787_v53  ;;  %v10851_v53 = vld [vmem:[#allocation14 + $0x8b0] ss:$52 sps:$4 sm:$0xff]  }
 0x5e6   :  { %8082 = vmatpush1.bf16.msra.mxu0 %v10782_v54  ;;  %v10859_v54 = vld [vmem:[#allocation14 + $0x91c] ss:$52 sps:$4 sm:$0xff]  }
 0x5e7   :  { %8083 = vmatprep.subr.bf16.mxu0 %v10790_v59  ;;  %v10854_v59 = vld [vmem:[#allocation17 + $0x1e0] ss:$8 sps:$4 sm:$0xff]  }
 0x5e8   :  { %6420 = vmatpush1.bf16.msra.mxu1 %v10785_v60  ;;  %v10862_v60 = vld [vmem:[#allocation17 + $0x1f4] ss:$8 sps:$4 sm:$0xff]  }
 0x5e9   :  { %6421 = vmatprep.subr.bf16.mxu1 %v10793_v20  ;;  %v10857_v20 = vld [vmem:[#allocation14 + $0x918] ss:$52 sps:$4 sm:$0xff]  }
 0x5ea   :  { %8084 = vmatpush1.bf16.msra.mxu0 %v10788_v63  ;;  %v10865_v63 = vld [vmem:[#allocation14 + $0x984] ss:$52 sps:$4 sm:$0xff]  }
 0x5eb   :  { %8085 = vmatprep.subr.bf16.mxu0 %v10796_v2  ;;  %v10860_v2 = vld [vmem:[#allocation17 + $0x1f0] ss:$8 sps:$4 sm:$0xff]  }
 0x5ec   :  { %6422 = vmatpush1.bf16.msra.mxu1 %v10791_v1  ;;  %v10868_v1 = vld [vmem:[#allocation17 + $0x204] ss:$8 sps:$4 sm:$0xff]  }
 0x5ed   :  { %6423 = vmatprep.subr.bf16.mxu1 %v10799_v3  ;;  %v10863_v3 = vld [vmem:[#allocation14 + $0x980] ss:$52 sps:$4 sm:$0xff]  }
 0x5ee   :  { %8086 = vmatpush1.bf16.msra.mxu0 %v10794_v4  ;;  %v10871_v4 = vld [vmem:[#allocation14 + $0x9ec] ss:$52 sps:$4 sm:$0xff]  }
 0x5ef   :  { %8087 = vmatprep.subr.bf16.mxu0 %v10802_v5  ;;  %v10866_v5 = vld [vmem:[#allocation17 + $0x200] ss:$8 sps:$4 sm:$0xff]  }
 0x5f0   :  { %6424 = vmatpush1.bf16.msra.mxu1 %v10797_v6  ;;  %v10874_v6 = vld [vmem:[#allocation17 + $0x214] ss:$8 sps:$4 sm:$0xff]  }
 0x5f1   :  { %6425 = vmatprep.subr.bf16.mxu1 %v10805_v10  ;;  %v10869_v10 = vld [vmem:[#allocation14 + $0x9e8] ss:$52 sps:$4 sm:$0xff]  }
 0x5f2   :  { %8088 = vmatpush1.bf16.msra.mxu0 %v10800_v18  ;;  %v10877_v18 = vld [vmem:[#allocation14 + $0xa54] ss:$52 sps:$4 sm:$0xff]  }
 0x5f3   :  { %8089 = vmatprep.subr.bf16.mxu0 %v10808_v11  ;;  %v10872_v11 = vld [vmem:[#allocation17 + $0x210] ss:$8 sps:$4 sm:$0xff]  }
 0x5f4   :  { %6426 = vmatpush1.bf16.msra.mxu1 %v10803_v12  ;;  %v10880_v12 = vld [vmem:[#allocation17 + $0x224] ss:$8 sps:$4 sm:$0xff]  }
 0x5f5   :  { %6427 = vmatprep.subr.bf16.mxu1 %v10811_v15  ;;  %v10875_v15 = vld [vmem:[#allocation14 + $0xa50] ss:$52 sps:$4 sm:$0xff]  }
 0x5f6   :  { %8090 = vmatpush1.bf16.msra.mxu0 %v10806_v9  ;;  %v10883_v9 = vld [vmem:[#allocation14 + $0xabc] ss:$52 sps:$4 sm:$0xff]  }
 0x5f7   :  { %8091 = vmatprep.subr.bf16.mxu0 %v10814_v13  ;;  %v10878_v13 = vld [vmem:[#allocation17 + $0x220] ss:$8 sps:$4 sm:$0xff]  }
 0x5f8   :  { %6428 = vmatpush1.bf16.msra.mxu1 %v10809_v14  ;;  %v10886_v14 = vld [vmem:[#allocation17 + $0x234] ss:$8 sps:$4 sm:$0xff]  }
 0x5f9   :  { %6429 = vmatprep.subr.bf16.mxu1 %v10817_v28  ;;  %v10881_v28 = vld [vmem:[#allocation14 + $0xab8] ss:$52 sps:$4 sm:$0xff]  }
 0x5fa   :  { %8092 = vmatpush1.bf16.msra.mxu0 %v10812_v30  ;;  %v10884_v30 = vld [vmem:[#allocation17 + $0x230] ss:$8 sps:$4 sm:$0xff]  }
 0x5fb   :  { %8093 = vmatprep.subr.bf16.mxu0 %v10820_v16  ;;  %v10892_v16 = vld [vmem:[#allocation17 + $0x244] ss:$8 sps:$4 sm:$0xff]  }
 0x5fc   :  { %6430 = vmatpush1.bf16.msra.mxu1 %v10815_v57  ;;  %v10895_v57 = vld [vmem:[#allocation14 + $0xb8c] ss:$52 sps:$4 sm:$0xff]  }
 0x5fd   :  { %6442 = vmatprep.subr.bf16.mxu1 %v10823_v17  ;;  %v10890_v17 = vld [vmem:[#allocation17 + $0x240] ss:$8 sps:$4 sm:$0xff]  }
 0x5fe   :  { %8094 = vmatpush1.bf16.msra.mxu0 %v10818_v27  ;;  %v11896_v27 = vld [vmem:[#allocation16 + $0x8] sm:$0x1f] }
 0x5ff   :  { %6432 = vmatmul.mubr.bf16.vlgmr.msra.gmra.mrb[24].mxu1 %v11779_v55  ;;  %8095 = vmatprep.subr.bf16.mxu0 %v10826_v31  ;;  %v10844_v55 = vld [vmem:[#allocation17 + $0x1c4] ss:$8 sps:$4 sm:$0xff]   ;;  %v10898_v31 = vld [vmem:[#allocation17 + $0x254] ss:$8 sps:$4 sm:$0xff]  }
 0x600   :  { %6443 = vmatpush1.bf16.msra.mxu1 %v10821_v32  ;;  %6474 = vmatprep.mubr.bf16.mxu1 %v11785_v58  ;;  %v10893_v32 = vld [vmem:[#allocation14 + $0xb88] ss:$52 sps:$4 sm:$0xff]  }
 0x601   :  { %6444 = vmatprep.subr.bf16.mxu1 %v10829_v33  ;;  %v1813_v33 = vrot.slane %v11896_v27, %v11758_v22 }
 0x602   :  { %8096 = vmatpush1.bf16.msra.mxu0 %v10824_v34  ;;  %v10901_v34 = vld [vmem:[#allocation14 + $0xbf4] ss:$52 sps:$4 sm:$0xff]  }
 0x603   :  { %8097 = vmatprep.subr.bf16.mxu0 %v10832_v36  ;;  %v1817_v36 = vrot.slane %v11896_v27, %v11766_v25 }
 0x604   :  { %6445 = vmatpush1.bf16.msra.mxu1 %v10827_v24  ;;  %v10896_v24 = vld [vmem:[#allocation17 + $0x250] ss:$8 sps:$4 sm:$0xff]  }
 0x605   :  { %6446 = vmatprep.subr.bf16.mxu1 %v10835_v37  ;;  %v10904_v37 = vld [vmem:[#allocation17 + $0x264] ss:$8 sps:$4 sm:$0xff]  }
 0x606   :  { %8098 = vmatpush1.bf16.msra.mxu0 %v10830_v38 }
 0x607   :  { %8099 = vmatprep.subr.bf16.mxu0 %v10838_v39  ;;  %v10899_v39 = vld [vmem:[#allocation14 + $0xbf0] ss:$52 sps:$4 sm:$0xff]  }
 0x608   :  { %6447 = vmatpush1.bf16.msra.mxu1 %v10833_v40 }
 0x609   :  { %6448 = vmatprep.subr.bf16.mxu1 %v10841_v41 }
 0x60a   :  { %8100 = vmatpush1.bf16.msra.mxu0 %v10836_v42  ;;  %v10907_v42 = vld [vmem:[#allocation14 + $0xc5c] ss:$52 sps:$4 sm:$0xff]  }
 0x60b   :  { %8101 = vmatprep.subr.bf16.mxu0 %v10844_v55 }
 0x60c   :  { %6449 = vmatpush1.bf16.msra.mxu1 %v10839_v43 }
 0x60d   :  { %6450 = vmatprep.subr.bf16.mxu1 %v10847_v44  ;;  %v10902_v44 = vld [vmem:[#allocation17 + $0x260] ss:$8 sps:$4 sm:$0xff]  }
 0x60e   :  { %8102 = vmatpush1.bf16.msra.mxu0 %v10842_v47 }
 0x60f   :  { %8103 = vmatprep.subr.bf16.mxu0 %v10850_v49 }
 0x610   :  { %6451 = vmatpush1.bf16.msra.mxu1 %v10845_v50  ;;  %v10910_v50 = vld [vmem:[#allocation17 + $0x274] ss:$8 sps:$4 sm:$0xff]  }
 0x611   :  { %6452 = vmatprep.subr.bf16.mxu1 %v10853_v35 }
 0x612   :  { %8104 = vmatpush1.bf16.msra.mxu0 %v10848_v51  ;;  %v10905_v51 = vld [vmem:[#allocation14 + $0xc58] ss:$52 sps:$4 sm:$0xff]  }
 0x613   :  { %8105 = vmatprep.subr.bf16.mxu0 %v10856_v52 }
 0x614   :  { %6453 = vmatpush1.bf16.msra.mxu1 %v10851_v53 }
 0x615   :  { %6454 = vmatprep.subr.bf16.mxu1 %v10859_v54  ;;  %v10913_v54 = vld [vmem:[#allocation14 + $0xcc4] ss:$52 sps:$4 sm:$0xff]  }
 0x616   :  { %8106 = vmatpush1.bf16.msra.mxu0 %v10854_v59 }
 0x617   :  { %8107 = vmatprep.subr.bf16.mxu0 %v10862_v60 }
 0x618   :  { %6455 = vmatpush1.bf16.msra.mxu1 %v10857_v20  ;;  %v10908_v20 = vld [vmem:[#allocation17 + $0x270] ss:$8 sps:$4 sm:$0xff]  }
 0x619   :  { %6456 = vmatprep.subr.bf16.mxu1 %v10865_v63 }
 0x61a   :  { %8108 = vmatpush1.bf16.msra.mxu0 %v10860_v2  ;;  %v10916_v2 = vld [vmem:[#allocation17 + $0x284] ss:$8 sps:$4 sm:$0xff]  }
 0x61b   :  { %8120 = vmatprep.subr.bf16.mxu0 %v10868_v1 }
 0x61c   :  { %6457 = vmatpush1.bf16.msra.mxu1 %v10863_v3  ;;  %v10911_v3 = vld [vmem:[#allocation14 + $0xcc0] ss:$52 sps:$4 sm:$0xff]  }
 0x61d   :  { %8110 = vmatmul.mubr.bf16.vlgmr.msra.gmra.mrb[32].mxu0 %v11884_v62  ;;  %6458 = vmatprep.subr.bf16.mxu1 %v10871_v4  ;;  %v10889_v62 = vld [vmem:[#allocation14 + $0xb24] ss:$52 sps:$4 sm:$0xff]   ;;  %v10919_v4 = vld [vmem:[#allocation14 + $0xd2c] ss:$52 sps:$4 sm:$0xff]  }
 0x61e   :  { %8121 = vmatpush1.bf16.msra.mxu0 %v10866_v5  ;;  %8152 = vmatprep.mubr.bf16.mxu0 %v11868_v29  ;;  %v10887_v29 = vld [vmem:[#allocation14 + $0xb20] ss:$52 sps:$4 sm:$0xff]  }
 0x61f   :  { %8122 = vmatprep.subr.bf16.mxu0 %v10874_v6  ;;  %v10914_v5 = vld [vmem:[#allocation17 + $0x280] ss:$8 sps:$4 sm:$0xff]   ;;  %v10922_v6 = vld [vmem:[#allocation17 + $0x294] ss:$8 sps:$4 sm:$0xff]  }
 0x620   :  { %6459 = vmatpush1.bf16.msra.mxu1 %v10869_v10  ;;  %v10917_v10 = vld [vmem:[#allocation14 + $0xd28] ss:$52 sps:$4 sm:$0xff]  }
 0x621   :  { %6460 = vmatprep.subr.bf16.mxu1 %v10877_v18  ;;  %v10925_v18 = vld [vmem:[#allocation14 + $0xd94] ss:$52 sps:$4 sm:$0xff]  }
 0x622   :  { %8123 = vmatpush1.bf16.msra.mxu0 %v10872_v11  ;;  %v10920_v11 = vld [vmem:[#allocation17 + $0x290] ss:$8 sps:$4 sm:$0xff]  }
 0x623   :  { %8124 = vmatprep.subr.bf16.mxu0 %v10880_v12  ;;  %v10928_v12 = vld [vmem:[#allocation17 + $0x2a4] ss:$8 sps:$4 sm:$0xff]  }
 0x624   :  { %6461 = vmatpush1.bf16.msra.mxu1 %v10875_v15  ;;  %v10923_v15 = vld [vmem:[#allocation14 + $0xd90] ss:$52 sps:$4 sm:$0xff]  }
 0x625   :  { %6462 = vmatprep.subr.bf16.mxu1 %v10883_v9  ;;  %v10931_v9 = vld [vmem:[#allocation14 + $0xdfc] ss:$52 sps:$4 sm:$0xff]  }
 0x626   :  { %8125 = vmatpush1.bf16.msra.mxu0 %v10878_v13  ;;  %v10926_v13 = vld [vmem:[#allocation17 + $0x2a0] ss:$8 sps:$4 sm:$0xff]  }
 0x627   :  { %8126 = vmatprep.subr.bf16.mxu0 %v10886_v14  ;;  %v10934_v14 = vld [vmem:[#allocation17 + $0x2b4] ss:$8 sps:$4 sm:$0xff]  }
 0x628   :  { %6463 = vmatpush1.bf16.msra.mxu1 %v10881_v28  ;;  %v10929_v28 = vld [vmem:[#allocation14 + $0xdf8] ss:$52 sps:$4 sm:$0xff]  }
 0x629   :  { %6464 = vmatprep.subr.bf16.mxu1 %v10889_v62  ;;  %v10937_v62 = vld [vmem:[#allocation14 + $0xe64] ss:$52 sps:$4 sm:$0xff]  }
 0x62a   :  { %8127 = vmatpush1.bf16.msra.mxu0 %v10884_v30  ;;  %v10932_v30 = vld [vmem:[#allocation17 + $0x2b0] ss:$8 sps:$4 sm:$0xff]  }
 0x62b   :  { %8128 = vmatprep.subr.bf16.mxu0 %v10892_v16  ;;  %v10940_v16 = vld [vmem:[#allocation17 + $0x2c4] ss:$8 sps:$4 sm:$0xff]  }
 0x62c   :  { %6465 = vmatpush1.bf16.msra.mxu1 %v10887_v29  ;;  %v10935_v29 = vld [vmem:[#allocation14 + $0xe60] ss:$52 sps:$4 sm:$0xff]  }
 0x62d   :  { %6466 = vmatprep.subr.bf16.mxu1 %v10895_v57  ;;  %v10943_v57 = vld [vmem:[#allocation14 + $0xecc] ss:$52 sps:$4 sm:$0xff]  }
 0x62e   :  { %8129 = vmatpush1.bf16.msra.mxu0 %v10890_v17  ;;  %v10946_v17 = vld [vmem:[#allocation17 + $0x2d4] ss:$8 sps:$4 sm:$0xff]  }
 0x62f   :  { %8130 = vmatprep.subr.bf16.mxu0 %v10898_v31  ;;  %v10941_v31 = vld [vmem:[#allocation14 + $0xec8] ss:$52 sps:$4 sm:$0xff]  }
 0x630   :  { %v6390_v38 = vpop.f32.mrb[20].mxu0  ;;  %6467 = vmatpush1.bf16.msra.mxu1 %v10893_v32  ;;  %v10949_v32 = vld [vmem:[#allocation14 + $0xf34] ss:$52 sps:$4 sm:$0xff]  }
 0x631   :  { %v9601_v40 = vadd.f32 %v6390_v38, %v1813_v33  ;;  %v6392_v41 = vpop.f32.mrb[21].mxu0  ;;  %6468 = vmatprep.subr.bf16.mxu1 %v10901_v34  ;;  %v10952_v34 = vld [vmem:[#allocation17 + $0x2e4] ss:$8 sps:$4 sm:$0xff]  }
 0x632   :  { %v9602_v55 = vadd.f32 %v6392_v41, %v1817_v36  ;;  %v6394_v43 = vpop.f32.mrb[22].mxu0  ;;  %8131 = vmatpush1.bf16.msra.mxu0 %v10896_v24  ;;  %v10947_v24 = vld [vmem:[#allocation14 + $0xf30] ss:$52 sps:$4 sm:$0xff]  }
 0x633   :  { %v9603_v47 = vadd.f32 %v6394_v43, %v1813_v33  ;;  %v6396_v49 = vpop.f32.mrb[23].mxu0  ;;  %8132 = vmatprep.subr.bf16.mxu0 %v10904_v37  ;;  %v6743_v52 = vmax.f32 %v9601_v40, 0.0  ;;  %v10944_v33 = vld [vmem:[#allocation17 + $0x2d0] ss:$8 sps:$4 sm:$0xff]   ;;  %v10950_v41 = vld [vmem:[#allocation17 + $0x2e0] ss:$8 sps:$4 sm:$0xff]  }
 0x634   :  { %v9604_v35 = vadd.f32 %v6396_v49, %v1817_v36  ;;  %6469 = vmatpush1.bf16.msra.mxu1 %v10899_v39  ;;  %v6744_v59 = vmax.f32 %v9602_v55, 0.0  ;;  %v10955_v38 = vld [vmem:[#allocation14 + $0xf9c] ss:$52 sps:$4 sm:$0xff]   ;;  %v10958_v55 = vld [vmem:[#allocation17 + $0x2f4] ss:$8 sps:$4 sm:$0xff]  }
 0x635   :  { %v6756_v53 = vmax.f32 %v9603_v47, 0.0  ;;  %6470 = vmatprep.subr.bf16.mxu1 %v10907_v42  ;;  %v10961_v47 = vld [vmem:[#allocation14 + $0x1004] ss:$52 sps:$4 sm:$0xff]  }
 0x636   :  { %v6757_v60 = vmax.f32 %v9604_v35, 0.0  ;;  %8133 = vmatpush1.bf16.msra.mxu0 %v10902_v44  ;;  %v10953_v44 = vld [vmem:[#allocation14 + $0xf98] ss:$52 sps:$4 sm:$0xff]   ;;  %v10956_v49 = vld [vmem:[#allocation17 + $0x2f0] ss:$8 sps:$4 sm:$0xff]  }
 0x637   :  { %v11902_v63 = vpack.c.bf16 %v6756_v53, %v6743_v52  ;;  %8134 = vmatprep.subr.bf16.mxu0 %v10910_v50  ;;  %v10964_v50 = vld [vmem:[#allocation17 + $0x304] ss:$8 sps:$4 sm:$0xff]   ;;  %v10962_v52 = vld [vmem:[#allocation17 + $0x300] ss:$8 sps:$4 sm:$0xff]   ;;  %v10970_v53 = vld [vmem:[#allocation17 + $0x314] ss:$8 sps:$4 sm:$0xff]  }
 0x638   :  { %v11904_v1 = vpack.c.bf16 %v6757_v60, %v6744_v59  ;;  %6471 = vmatpush1.bf16.msra.mxu1 %v10905_v51  ;;  %v10959_v35 = vld [vmem:[#allocation14 + $0x1000] ss:$52 sps:$4 sm:$0xff]  }
 0x639   :  { %6472 = vmatprep.subr.bf16.mxu1 %v10913_v54  ;;  %v10967_v51 = vld [vmem:[#allocation14 + $0x106c] ss:$52 sps:$4 sm:$0xff]   ;;  %v10965_v54 = vld [vmem:[#allocation14 + $0x1068] ss:$52 sps:$4 sm:$0xff]  }
 0x63a   :  { %8135 = vmatpush1.bf16.msra.mxu0 %v10908_v20  ;;  %v10973_v59 = vld [vmem:[#allocation14 + $0x10d4] ss:$52 sps:$4 sm:$0xff]  }
 0x63b   :  { %8136 = vmatprep.subr.bf16.mxu0 %v10916_v2  ;;  %v10968_v60 = vld [vmem:[#allocation17 + $0x310] ss:$8 sps:$4 sm:$0xff]   ;;  %v10976_v20 = vld [vmem:[#allocation17 + $0x324] ss:$8 sps:$4 sm:$0xff]  }
 0x63c   :  { %6473 = vmatpush1.bf16.msra.mxu1 %v10911_v3  ;;  %v10971_v2 = vld [vmem:[#allocation14 + $0x10d0] ss:$52 sps:$4 sm:$0xff]  }
 0x63d   :  { %6485 = vmatprep.subr.bf16.mxu1 %v10919_v4  ;;  %v10979_v3 = vld [vmem:[#allocation14 + $0x113c] ss:$52 sps:$4 sm:$0xff]  }
 0x63e   :  { %8137 = vmatpush1.bf16.msra.mxu0 %v10914_v5  ;;  %v10974_v4 = vld [vmem:[#allocation17 + $0x320] ss:$8 sps:$4 sm:$0xff]   ;;  %v10982_v5 = vld [vmem:[#allocation17 + $0x334] ss:$8 sps:$4 sm:$0xff]  }
 0x63f   :  { %6475 = vmatmul.mubr.bf16.vlgmr.msra.gmra.mrb[24].mxu1 %v11781_v56  ;;  %8138 = vmatprep.subr.bf16.mxu0 %v10922_v6  ;;  %v10977_v6 = vld [vmem:[#allocation14 + $0x1138] ss:$52 sps:$4 sm:$0xff]  }
 0x640   :  { %6486 = vmatpush1.bf16.msra.mxu1 %v10917_v10  ;;  %6517 = vmatprep.mubr.bf16.mxu1 %v11807_v48  ;;  %v10938_v48 = vld [vmem:[#allocation17 + $0x2c0] ss:$8 sps:$4 sm:$0xff]  }
 0x641   :  { %6487 = vmatprep.subr.bf16.mxu1 %v10925_v18  ;;  %v10985_v10 = vld [vmem:[#allocation14 + $0x11a4] ss:$52 sps:$4 sm:$0xff]  }
 0x642   :  { %8139 = vmatpush1.bf16.msra.mxu0 %v10920_v11  ;;  %v10988_v18 = vld [vmem:[#allocation17 + $0x344] ss:$8 sps:$4 sm:$0xff]  }
 0x643   :  { %8140 = vmatprep.subr.bf16.mxu0 %v10928_v12  ;;  %v10983_v11 = vld [vmem:[#allocation14 + $0x11a0] ss:$52 sps:$4 sm:$0xff]  }
 0x644   :  { %6488 = vmatpush1.bf16.msra.mxu1 %v10923_v15  ;;  %v10991_v12 = vld [vmem:[#allocation14 + $0x120c] ss:$52 sps:$4 sm:$0xff]  }
 0x645   :  { %6489 = vmatprep.subr.bf16.mxu1 %v10931_v9  ;;  %v10986_v15 = vld [vmem:[#allocation17 + $0x340] ss:$8 sps:$4 sm:$0xff]   ;;  %v10994_v9 = vld [vmem:[#allocation17 + $0x354] ss:$8 sps:$4 sm:$0xff]  }
 0x646   :  { %8141 = vmatpush1.bf16.msra.mxu0 %v10926_v13  ;;  %v10989_v13 = vld [vmem:[#allocation14 + $0x1208] ss:$52 sps:$4 sm:$0xff]  }
 0x647   :  { %8142 = vmatprep.subr.bf16.mxu0 %v10934_v14  ;;  %v10997_v14 = vld [vmem:[#allocation14 + $0x1274] ss:$52 sps:$4 sm:$0xff]  }
 0x648   :  { %6490 = vmatpush1.bf16.msra.mxu1 %v10929_v28  ;;  %v10992_v28 = vld [vmem:[#allocation17 + $0x350] ss:$8 sps:$4 sm:$0xff]  }
 0x649   :  { %6491 = vmatprep.subr.bf16.mxu1 %v10937_v62  ;;  %v11000_v62 = vld [vmem:[#allocation17 + $0x364] ss:$8 sps:$4 sm:$0xff]  }
 0x64a   :  { %8143 = vmatpush1.bf16.msra.mxu0 %v10932_v30 }
 0x64b   :  { %8144 = vmatprep.subr.bf16.mxu0 %v10940_v16  ;;  %v10995_v16 = vld [vmem:[#allocation14 + $0x1270] ss:$52 sps:$4 sm:$0xff]  }
 0x64c   :  { %6492 = vmatpush1.bf16.msra.mxu1 %v10935_v29 }
 0x64d   :  { %6493 = vmatprep.subr.bf16.mxu1 %v10943_v57  ;;  %v11003_v57 = vld [vmem:[#allocation14 + $0x12dc] ss:$52 sps:$4 sm:$0xff]  }
 0x64e   :  { %8145 = vmatpush1.bf16.msra.mxu0 %v10938_v48 }
 0x64f   :  { %8146 = vmatprep.subr.bf16.mxu0 %v10946_v17 }
 0x650   :  { %v9442_v36 = vpop.f32.mrb[24].mxu0  ;;  %6494 = vmatpush1.bf16.msra.mxu1 %v10941_v31  ;;  %v10998_v31 = vld [vmem:[#allocation17 + $0x360] ss:$8 sps:$4 sm:$0xff]  }
 0x651   :  { %v9443_v37 = vpop.f32.mrb[25].mxu0  ;;  %6495 = vmatprep.subr.bf16.mxu1 %v10949_v32 }
 0x652   :  { %v11908_v39 = vadd.f32 %v9443_v37, %v9442_v36  ;;  %v9445_v40 = vpop.f32.mrb[26].mxu0  ;;  %8147 = vmatpush1.bf16.msra.mxu0 %v10944_v33  ;;  %v11006_v33 = vld [vmem:[#allocation17 + $0x374] ss:$8 sps:$4 sm:$0xff]   ;;  %v11004_v37 = vld [vmem:[#allocation17 + $0x370] ss:$8 sps:$4 sm:$0xff]  }
 0x653   :  { %v9446_v42 = vpop.f32.mrb[27].mxu0  ;;  %8148 = vmatprep.subr.bf16.mxu0 %v10952_v34  ;;  %v11001_v36 = vld [vmem:[#allocation14 + $0x12d8] ss:$52 sps:$4 sm:$0xff]  }
 0x654   :  { %v11910_v43 = vadd.f32 %v9446_v42, %v9445_v40  ;;  %6496 = vmatpush1.bf16.msra.mxu1 %v10947_v24  ;;  %v11009_v24 = vld [vmem:[#allocation14 + $0x1344] ss:$52 sps:$4 sm:$0xff]   ;;  %v11007_v40 = vld [vmem:[#allocation14 + $0x1340] ss:$52 sps:$4 sm:$0xff]  }
 0x655   :  { %6497 = vmatprep.subr.bf16.mxu1 %v10955_v38  ;;  %v11012_v38 = vld [vmem:[#allocation17 + $0x384] ss:$8 sps:$4 sm:$0xff]   ;;  %v11010_v42 = vld [vmem:[#allocation17 + $0x380] ss:$8 sps:$4 sm:$0xff]  }
 0x656   :  { %8149 = vmatpush1.bf16.msra.mxu0 %v10950_v41  ;;  %v11015_v41 = vld [vmem:[#allocation14 + $0x13ac] ss:$52 sps:$4 sm:$0xff]  }
 0x657   :  { %8150 = vmatprep.subr.bf16.mxu0 %v10958_v55  ;;  %v11018_v55 = vld [vmem:[#allocation17 + $0x394] ss:$8 sps:$4 sm:$0xff]  }
 0x658   :  { %6498 = vmatpush1.bf16.msra.mxu1 %v10953_v44  ;;  %v11013_v44 = vld [vmem:[#allocation14 + $0x13a8] ss:$52 sps:$4 sm:$0xff]  }
 0x659   :  { %6499 = vmatprep.subr.bf16.mxu1 %v10961_v47  ;;  %v11021_v47 = vld [vmem:[#allocation14 + $0x1414] ss:$52 sps:$4 sm:$0xff]  }
 0x65a   :  { %8151 = vmatpush1.bf16.msra.mxu0 %v10956_v49  ;;  %v11016_v49 = vld [vmem:[#allocation17 + $0x390] ss:$8 sps:$4 sm:$0xff]  }
 0x65b   :  { %8163 = vmatprep.subr.bf16.mxu0 %v10964_v50  ;;  %v11024_v50 = vld [vmem:[#allocation17 + $0x3a4] ss:$8 sps:$4 sm:$0xff]  }
 0x65c   :  { %6500 = vmatpush1.bf16.msra.mxu1 %v10959_v35  ;;  %v11019_v35 = vld [vmem:[#allocation14 + $0x1410] ss:$52 sps:$4 sm:$0xff]  }
 0x65d   :  { %8153 = vmatmul.mubr.bf16.vlgmr.msra.gmra.mrb[32].mxu0 %v11866_v19  ;;  %6501 = vmatprep.subr.bf16.mxu1 %v10967_v51  ;;  %v10980_v19 = vld [vmem:[#allocation17 + $0x330] ss:$8 sps:$4 sm:$0xff]  }
 0x65e   :  { %8164 = vmatpush1.bf16.msra.mxu0 %v10962_v52  ;;  %v11027_v51 = vld [vmem:[#allocation14 + $0x147c] ss:$52 sps:$4 sm:$0xff]  }
 0x65f   :  { %8165 = vmatprep.subr.bf16.mxu0 %v10970_v53  ;;  %v11022_v52 = vld [vmem:[#allocation17 + $0x3a0] ss:$8 sps:$4 sm:$0xff]   ;;  %v11030_v53 = vld [vmem:[#allocation17 + $0x3b4] ss:$8 sps:$4 sm:$0xff]  }
 0x660   :  { %6502 = vmatpush1.bf16.msra.mxu1 %v10965_v54  ;;  %v11025_v54 = vld [vmem:[#allocation14 + $0x1478] ss:$52 sps:$4 sm:$0xff]  }
 0x661   :  { %6503 = vmatprep.subr.bf16.mxu1 %v10973_v59  ;;  %v11033_v59 = vld [vmem:[#allocation14 + $0x14e4] ss:$52 sps:$4 sm:$0xff]  }
 0x662   :  { %8166 = vmatpush1.bf16.msra.mxu0 %v10968_v60  ;;  %v11028_v60 = vld [vmem:[#allocation17 + $0x3b0] ss:$8 sps:$4 sm:$0xff]  }
 0x663   :  { %8167 = vmatprep.subr.bf16.mxu0 %v10976_v20  ;;  %v11031_v20 = vld [vmem:[#allocation14 + $0x14e0] ss:$52 sps:$4 sm:$0xff]  }
 0x664   :  { %6504 = vmatpush1.bf16.msra.mxu1 %v10971_v2  ;;  %v11039_v2 = vld [vmem:[#allocation14 + $0x154c] ss:$52 sps:$4 sm:$0xff]  }
 0x665   :  { %6505 = vmatprep.subr.bf16.mxu1 %v10979_v3  ;;  %v11034_v3 = vld [vmem:[#allocation17 + $0x3c0] ss:$8 sps:$4 sm:$0xff]  }
 0x666   :  { %8168 = vmatpush1.bf16.msra.mxu0 %v10974_v4  ;;  %v11042_v4 = vld [vmem:[#allocation17 + $0x3d4] ss:$8 sps:$4 sm:$0xff]  }
 0x667   :  { %8169 = vmatprep.subr.bf16.mxu0 %v10982_v5  ;;  %v11037_v5 = vld [vmem:[#allocation14 + $0x1548] ss:$52 sps:$4 sm:$0xff]  }
 0x668   :  { %6506 = vmatpush1.bf16.msra.mxu1 %v10977_v6  ;;  %v1808_v6 = vsub.s32 7, %v11755_v21 }
 0x669   :  { %6507 = vmatprep.subr.bf16.mxu1 %v10985_v10  ;;  %v11045_v10 = vld [vmem:[#allocation14 + $0x15b4] ss:$52 sps:$4 sm:$0xff]  }
 0x66a   :  { %8170 = vmatpush1.bf16.msra.mxu0 %v10980_v19  ;;  %v11040_v19 = vld [vmem:[#allocation17 + $0x3d0] ss:$8 sps:$4 sm:$0xff]  }
 0x66b   :  { %8171 = vmatprep.subr.bf16.mxu0 %v10988_v18  ;;  %v11218_v18 = vld [vmem:[#allocation16] sm:$0xff] }
 0x66c   :  { %6508 = vmatpush1.bf16.msra.mxu1 %v10983_v11  ;;  %v1805_v11 = vrot.slane %v11218_v18, %v502_v8  ;;  %v11057_v8 = vld [vmem:[#allocation14 + $0x1684] ss:$52 sps:$4 sm:$0xff]  }
 0x66d   :  { %6509 = vmatprep.subr.bf16.mxu1 %v10991_v12  ;;  %v11048_v12 = vld [vmem:[#allocation17 + $0x3e4] ss:$8 sps:$4 sm:$0xff]  }
 0x66e   :  { %8172 = vmatpush1.bf16.msra.mxu0 %v10986_v15  ;;  %v1809_v15 = vrot.slane %v11218_v18, %v1808_v6  ;;  %v11082_v6 = vld [vmem:[#allocation14 + $0x850] ss:$52 sps:$4 sm:$0xff]  }
 0x66f   :  { %8173 = vmatprep.subr.bf16.mxu0 %v10994_v9  ;;  %v11043_v9 = vld [vmem:[#allocation14 + $0x15b0] ss:$52 sps:$4 sm:$0xff]  }
 0x670   :  { %v9486_v30 = vpop.f32.mrb[28].mxu0  ;;  %6510 = vmatpush1.bf16.msra.mxu1 %v10989_v13  ;;  %v11051_v13 = vld [vmem:[#allocation14 + $0x161c] ss:$52 sps:$4 sm:$0xff]  }
 0x671   :  { %v9487_v29 = vpop.f32.mrb[29].mxu0  ;;  %6511 = vmatprep.subr.bf16.mxu1 %v10997_v14  ;;  %v11090_v18 = vld [vmem:[#allocation17 + $0x464] ss:$8 sps:$4 sm:$0xff]  }
 0x672   :  { %v11913_v48 = vadd.f32 %v9487_v29, %v9486_v30  ;;  %v9489_v17 = vpop.f32.mrb[30].mxu0  ;;  %8174 = vmatpush1.bf16.msra.mxu0 %v10992_v28  ;;  %v11046_v28 = vld [vmem:[#allocation17 + $0x3e0] ss:$8 sps:$4 sm:$0xff]  }
 0x673   :  { %v9490_v32 = vpop.f32.mrb[31].mxu0  ;;  %8175 = vmatprep.subr.bf16.mxu0 %v11000_v62 }
 0x674   :  { %v11915_v34 = vadd.f32 %v9490_v32, %v9489_v17  ;;  %6512 = vmatpush1.bf16.msra.mxu1 %v10995_v16  ;;  %v11054_v16 = vld [vmem:[#allocation17 + $0x3f4] ss:$8 sps:$4 sm:$0xff]  }
 0x675   :  { %6513 = vmatprep.subr.bf16.mxu1 %v11003_v57  ;;  %v11049_v17 = vld [vmem:[#allocation14 + $0x1618] ss:$52 sps:$4 sm:$0xff]  }
 0x676   :  { %8176 = vmatpush1.bf16.msra.mxu0 %v10998_v31 }
 0x677   :  { %8177 = vmatprep.subr.bf16.mxu0 %v11006_v33  ;;  %v11052_v33 = vld [vmem:[#allocation17 + $0x3f0] ss:$8 sps:$4 sm:$0xff]  }
 0x678   :  { %6514 = vmatpush1.bf16.msra.mxu1 %v11001_v36 }
 0x679   :  { %6515 = vmatprep.subr.bf16.mxu1 %v11009_v24 }
 0x67a   :  { %8178 = vmatpush1.bf16.msra.mxu0 %v11004_v37  ;;  %v11060_v37 = vld [vmem:[#allocation17 + $0x404] ss:$8 sps:$4 sm:$0xff]  }
 0x67b   :  { %8179 = vmatprep.subr.bf16.mxu0 %v11012_v38 }
 0x67c   :  { %6516 = vmatpush1.bf16.msra.mxu1 %v11007_v40 }
 0x67d   :  { %6528 = vmatprep.subr.bf16.mxu1 %v11015_v41  ;;  %v11055_v41 = vld [vmem:[#allocation14 + $0x1680] ss:$52 sps:$4 sm:$0xff]  }
 0x67e   :  { %8180 = vmatpush1.bf16.msra.mxu0 %v11010_v42 }
 0x67f   :  { %6518 = vmatmul.mubr.bf16.vlgmr.msra.gmra.mrb[24].mxu1 %v11803_v45  ;;  %8181 = vmatprep.subr.bf16.mxu0 %v11018_v55  ;;  %v11036_v45 = vld [vmem:[#allocation17 + $0x3c4] ss:$8 sps:$4 sm:$0xff]  }
 0x680   :  { %6529 = vmatpush1.bf16.msra.mxu1 %v11013_v44  ;;  %6560 = vmatprep.mubr.bf16.mxu1 %v11518_v61  ;;  %v11061_v55 = vld [vmem:[#allocation14 + $0x9f0] ss:$52 sps:$4 sm:$0xff]  }
 0x681   :  { %6530 = vmatprep.subr.bf16.mxu1 %v11021_v47  ;;  %v11058_v47 = vld [vmem:[#allocation17 + $0x400] ss:$8 sps:$4 sm:$0xff]  }
 0x682   :  { %8182 = vmatpush1.bf16.msra.mxu0 %v11016_v49  ;;  %v11065_v49 = vld [vmem:[#allocation17 + $0x414] ss:$8 sps:$4 sm:$0xff]  }
 0x683   :  { %8183 = vmatprep.subr.bf16.mxu0 %v11024_v50  ;;  %v11062_v50 = vld [vmem:[#allocation14 + $0x6b0] ss:$52 sps:$4 sm:$0xff]  }
 0x684   :  { %6531 = vmatpush1.bf16.msra.mxu1 %v11019_v35  ;;  %v11066_v35 = vld [vmem:[#allocation14 + $0xa58] ss:$52 sps:$4 sm:$0xff]  }
 0x685   :  { %6532 = vmatprep.subr.bf16.mxu1 %v11027_v51  ;;  %v11063_v51 = vld [vmem:[#allocation17 + $0x410] ss:$8 sps:$4 sm:$0xff]  }
 0x686   :  { %8184 = vmatpush1.bf16.msra.mxu0 %v11022_v52  ;;  %v11070_v52 = vld [vmem:[#allocation17 + $0x424] ss:$8 sps:$4 sm:$0xff]  }
 0x687   :  { %8185 = vmatprep.subr.bf16.mxu0 %v11030_v53  ;;  %v11067_v53 = vld [vmem:[#allocation14 + $0x718] ss:$52 sps:$4 sm:$0xff]  }
 0x688   :  { %6533 = vmatpush1.bf16.msra.mxu1 %v11025_v54  ;;  %v11071_v54 = vld [vmem:[#allocation14 + $0xac0] ss:$52 sps:$4 sm:$0xff]  }
 0x689   :  { %6534 = vmatprep.subr.bf16.mxu1 %v11033_v59  ;;  %v11068_v59 = vld [vmem:[#allocation17 + $0x420] ss:$8 sps:$4 sm:$0xff]  }
 0x68a   :  { %8186 = vmatpush1.bf16.msra.mxu0 %v11028_v60  ;;  %v11075_v60 = vld [vmem:[#allocation17 + $0x434] ss:$8 sps:$4 sm:$0xff]  }
 0x68b   :  { %8187 = vmatprep.subr.bf16.mxu0 %v11036_v45  ;;  %v11072_v45 = vld [vmem:[#allocation14 + $0x780] ss:$52 sps:$4 sm:$0xff]  }
 0x68c   :  { %6535 = vmatpush1.bf16.msra.mxu1 %v11031_v20  ;;  %v11076_v20 = vld [vmem:[#allocation14 + $0xb28] ss:$52 sps:$4 sm:$0xff]  }
 0x68d   :  { %6536 = vmatprep.subr.bf16.mxu1 %v11039_v2  ;;  %v11080_v2 = vld [vmem:[#allocation17 + $0x444] ss:$8 sps:$4 sm:$0xff]  }
 0x68e   :  { %8188 = vmatpush1.bf16.msra.mxu0 %v11034_v3  ;;  %v11077_v3 = vld [vmem:[#allocation14 + $0x7e8] ss:$52 sps:$4 sm:$0xff]  }
 0x68f   :  { %8189 = vmatprep.subr.bf16.mxu0 %v11042_v4  ;;  %v11081_v4 = vld [vmem:[#allocation14 + $0xb90] ss:$52 sps:$4 sm:$0xff]  }
 0x690   :  { %6537 = vmatpush1.bf16.msra.mxu1 %v11037_v5  ;;  %v11085_v5 = vld [vmem:[#allocation17 + $0x454] ss:$8 sps:$4 sm:$0xff]  }
 0x691   :  { %6538 = vmatprep.subr.bf16.mxu1 %v11045_v10  ;;  %v11086_v10 = vld [vmem:[#allocation14 + $0xbf8] ss:$52 sps:$4 sm:$0xff]  }
 0x692   :  { %8190 = vmatpush1.bf16.msra.mxu0 %v11040_v19  ;;  %v6218_v14 = vpop.f32.mrb[20].mxu1  ;;  %v11083_v19 = vld [vmem:[#allocation17 + $0x450] ss:$8 sps:$4 sm:$0xff]  }
 0x693   :  { %v9597_v62 = vadd.f32 %v6218_v14, %v1805_v11  ;;  %v6220_v30 = vpop.f32.mrb[21].mxu1  ;;  %8191 = vmatprep.subr.bf16.mxu0 %v11048_v12  ;;  %v11091_v12 = vld [vmem:[#allocation14 + $0xc60] ss:$52 sps:$4 sm:$0xff]   ;;  %v11096_v14 = vld [vmem:[#allocation14 + $0xcc8] ss:$52 sps:$4 sm:$0xff]  }
 0x694   :  { %v9598_v29 = vadd.f32 %v6220_v30, %v1809_v15  ;;  %v6222_v57 = vpop.f32.mrb[22].mxu1  ;;  %6539 = vmatpush1.bf16.msra.mxu1 %v11043_v9  ;;  %v11095_v9 = vld [vmem:[#allocation17 + $0x474] ss:$8 sps:$4 sm:$0xff]  }
 0x695   :  { %v9599_v31 = vadd.f32 %v6222_v57, %v1805_v11  ;;  %v6224_v21 = vpop.f32.mrb[23].mxu1  ;;  %6540 = vmatprep.subr.bf16.mxu1 %v11051_v13  ;;  %v6741_v36 = vmax.f32 %v9597_v62, 0.0  ;;  %v11087_v11 = vld [vmem:[#allocation14 + $0x8b8] ss:$52 sps:$4 sm:$0xff]   ;;  %v11092_v13 = vld [vmem:[#allocation14 + $0x920] ss:$52 sps:$4 sm:$0xff]  }
 0x696   :  { %v9600_v32 = vadd.f32 %v6224_v21, %v1809_v15  ;;  %8192 = vmatpush1.bf16.msra.mxu0 %v11046_v28  ;;  %v6742_v38 = vmax.f32 %v9598_v29, 0.0  ;;  %v11088_v15 = vld [vmem:[#allocation17 + $0x460] ss:$8 sps:$4 sm:$0xff]   ;;  %v11093_v28 = vld [vmem:[#allocation17 + $0x470] ss:$8 sps:$4 sm:$0xff]  }
 0x697   :  { %v6754_v24 = vmax.f32 %v9599_v31, 0.0  ;;  %8193 = vmatprep.subr.bf16.mxu0 %v11054_v16  ;;  %v11100_v62 = vld [vmem:[#allocation17 + $0x484] ss:$8 sps:$4 sm:$0xff]   ;;  %v11098_v16 = vld [vmem:[#allocation17 + $0x480] ss:$8 sps:$4 sm:$0xff]  }
 0x698   :  { %v6755_v40 = vmax.f32 %v9600_v32, 0.0  ;;  %6541 = vmatpush1.bf16.msra.mxu1 %v11049_v17  ;;  %v11097_v30 = vld [vmem:[#allocation14 + $0x988] ss:$52 sps:$4 sm:$0xff]   ;;  %v11101_v57 = vld [vmem:[#allocation14 + $0x13b0] ss:$52 sps:$4 sm:$0xff]  }
 0x699   :  { %v6767_v42 = vpack.c.bf16 %v6754_v24, %v6741_v36  ;;  %6542 = vmatprep.subr.bf16.mxu1 %v11057_v8  ;;  %v11104_v29 = vld [vmem:[#allocation17 + $0x494] ss:$8 sps:$4 sm:$0xff]   ;;  %v11102_v17 = vld [vmem:[#allocation17 + $0x490] ss:$8 sps:$4 sm:$0xff]   ;;  %v11108_v31 = vld [vmem:[#allocation17 + $0x4a4] ss:$8 sps:$4 sm:$0xff]  }
 0x69a   :  { %v6768_v44 = vpack.c.bf16 %v6755_v40, %v6742_v38  ;;  %8194 = vmatpush1.bf16.msra.mxu0 %v11052_v33  ;;  %v11105_v21 = vld [vmem:[#allocation14 + $0x1418] ss:$52 sps:$4 sm:$0xff]   ;;  %v11109_v33 = vld [vmem:[#allocation14 + $0x1480] ss:$52 sps:$4 sm:$0xff]   ;;  %v11113_v24 = vld [vmem:[#allocation14 + $0x14e8] ss:$52 sps:$4 sm:$0xff]  }
 0x69b   :  { %8206 = vmatprep.subr.bf16.mxu0 %v11060_v37  ;;  %v11106_v8 = vld [vmem:[#allocation17 + $0x4a0] ss:$8 sps:$4 sm:$0xff]   ;;  %v11112_v32 = vld [vmem:[#allocation17 + $0x4b4] ss:$8 sps:$4 sm:$0xff]   ;;  %v11110_v36 = vld [vmem:[#allocation17 + $0x4b0] ss:$8 sps:$4 sm:$0xff]  }
 0x69c   :  { %6543 = vmatpush1.bf16.msra.mxu1 %v11055_v41  ;;  %8195 = vmatprep.mubr.bf16.mxu0 %v6768_v44  ;;  %v11114_v37 = vld [vmem:[#allocation17 + $0x4c0] ss:$8 sps:$4 sm:$0xff]   ;;  %v11120_v38 = vld [vmem:[#allocation17 + $0x4d4] ss:$8 sps:$4 sm:$0xff]   ;;  %v11118_v41 = vld [vmem:[#allocation17 + $0x4d0] ss:$8 sps:$4 sm:$0xff]  }
 0x69d   :  { %8196 = vmatmul.mubr.bf16.vlgmr.msra.gmra.mrb[32].mxu0 %v6767_v42  ;;  %9448 = vmatprep.subr.bf16.mxu1 %v11061_v55  ;;  %v11117_v40 = vld [vmem:[#allocation14 + $0x1550] ss:$52 sps:$4 sm:$0xff]   ;;  %v11121_v55 = vld [vmem:[#allocation14 + $0x15b8] ss:$52 sps:$4 sm:$0xff]  }
 0x69e   :  { %8207 = vmatpush1.bf16.msra.mxu0 %v11058_v47  ;;  %8238 = vmatprep.mubr.bf16.mxu0 %v11904_v1  ;;  %v11073_v1 = vld [vmem:[#allocation17 + $0x430] ss:$8 sps:$4 sm:$0xff]   ;;  %v11124_v42 = vld [vmem:[#allocation17 + $0x4e4] ss:$8 sps:$4 sm:$0xff]   ;;  %v11122_v44 = vld [vmem:[#allocation17 + $0x4e0] ss:$8 sps:$4 sm:$0xff]  }
 0x69f   :  { %6561 = vmatmul.mubr.bf16.vlgmr.msra.gmra.mrb[24].mxu1 %v11805_v46  ;;  %8208 = vmatprep.subr.bf16.mxu0 %v11065_v49  ;;  %v11128_v47 = vld [vmem:[#allocation17 + $0x4f4] ss:$8 sps:$4 sm:$0xff]  }
 0x6a0   :  { %9449 = vmatpush3.bf16.msra.mxu1 %v11062_v50  ;;  %6644 = vmatprep.mubr.bf16.mxu1 %v11785_v58  ;;  %v11078_v58 = vld [vmem:[#allocation17 + $0x440] ss:$8 sps:$4 sm:$0xff]   ;;  %v11126_v50 = vld [vmem:[#allocation17 + $0x4f0] ss:$8 sps:$4 sm:$0xff]  }
 0x6a1   :  { %9450 = vmatprep.subr.bf16.mxu1 %v11066_v35  ;;  %v11125_v49 = vld [vmem:[#allocation14 + $0x1620] ss:$52 sps:$4 sm:$0xff]  }
 0x6a2   :  { %8209 = vmatpush1.bf16.msra.mxu0 %v11063_v51  ;;  %v11132_v35 = vld [vmem:[#allocation17 + $0x504] ss:$8 sps:$4 sm:$0xff]  }
 0x6a3   :  { %8210 = vmatprep.subr.bf16.mxu0 %v11070_v52  ;;  %v11129_v51 = vld [vmem:[#allocation14 + $0x1688] ss:$52 sps:$4 sm:$0xff]   ;;  %v11130_v52 = vld [vmem:[#allocation17 + $0x500] ss:$8 sps:$4 sm:$0xff]  }
 0x6a4   :  { %9451 = vmatpush3.bf16.msra.mxu1 %v11067_v53  ;;  %v11135_v53 = vld [vmem:[#allocation17 + $0x514] ss:$8 sps:$4 sm:$0xff]  }
 0x6a5   :  { %9452 = vmatprep.subr.bf16.mxu1 %v11071_v54  ;;  %v11133_v54 = vld [vmem:[#allocation17 + $0x510] ss:$8 sps:$4 sm:$0xff]  }
 0x6a6   :  { %8211 = vmatpush1.bf16.msra.mxu0 %v11068_v59  ;;  %v11138_v59 = vld [vmem:[#allocation17 + $0x524] ss:$8 sps:$4 sm:$0xff]  }
 0x6a7   :  { %8212 = vmatprep.subr.bf16.mxu0 %v11075_v60  ;;  %v11136_v60 = vld [vmem:[#allocation17 + $0x520] ss:$8 sps:$4 sm:$0xff]  }
 0x6a8   :  { %9453 = vmatpush3.bf16.msra.mxu1 %v11072_v45  ;;  %v11141_v45 = vld [vmem:[#allocation17 + $0x534] ss:$8 sps:$4 sm:$0xff]  }
 0x6a9   :  { %9454 = vmatprep.subr.bf16.mxu1 %v11076_v20  ;;  %v11139_v20 = vld [vmem:[#allocation17 + $0x530] ss:$8 sps:$4 sm:$0xff]  }
 0x6aa   :  { %8213 = vmatpush1.bf16.msra.mxu0 %v11073_v1  ;;  %v11142_v1 = vld [vmem:[#allocation17 + $0x540] ss:$8 sps:$4 sm:$0xff]  }
 0x6ab   :  { %8214 = vmatprep.subr.bf16.mxu0 %v11080_v2  ;;  %v11147_v2 = vld [vmem:[#allocation17 + $0x554] ss:$8 sps:$4 sm:$0xff]  }
 0x6ac   :  { %9455 = vmatpush3.bf16.msra.mxu1 %v11077_v3  ;;  %v11150_v3 = vld [vmem:[#allocation17 + $0x564] ss:$8 sps:$4 sm:$0xff]  }
 0x6ad   :  { %9456 = vmatprep.subr.bf16.mxu1 %v11081_v4  ;;  %v11153_v4 = vld [vmem:[#allocation17 + $0x574] ss:$8 sps:$4 sm:$0xff]  }
 0x6ae   :  { %8215 = vmatpush1.bf16.msra.mxu0 %v11078_v58  ;;  %v11151_v58 = vld [vmem:[#allocation17 + $0x570] ss:$8 sps:$4 sm:$0xff]  }
 0x6af   :  { %8216 = vmatprep.subr.bf16.mxu0 %v11085_v5  ;;  %v11156_v5 = vld [vmem:[#allocation17 + $0x584] ss:$8 sps:$4 sm:$0xff]  }
 0x6b0   :  { %9457 = vmatpush3.bf16.msra.mxu1 %v11082_v6  ;;  %v11154_v6 = vld [vmem:[#allocation17 + $0x580] ss:$8 sps:$4 sm:$0xff]  }
 0x6b1   :  { %9458 = vmatprep.subr.bf16.mxu1 %v11086_v10  ;;  %v11159_v10 = vld [vmem:[#allocation17 + $0x594] ss:$8 sps:$4 sm:$0xff]  }
 0x6b2   :  { %8217 = vmatpush1.bf16.msra.mxu0 %v11083_v19  ;;  %v11157_v19 = vld [vmem:[#allocation17 + $0x590] ss:$8 sps:$4 sm:$0xff]  }
 0x6b3   :  { %8218 = vmatprep.subr.bf16.mxu0 %v11090_v18  ;;  %v11162_v18 = vld [vmem:[#allocation17 + $0x5a4] ss:$8 sps:$4 sm:$0xff]  }
 0x6b4   :  { %9459 = vmatpush3.bf16.msra.mxu1 %v11087_v11  ;;  %v11160_v11 = vld [vmem:[#allocation17 + $0x5a0] ss:$8 sps:$4 sm:$0xff]  }
 0x6b5   :  { %9460 = vmatprep.subr.bf16.mxu1 %v11091_v12  ;;  %v11165_v12 = vld [vmem:[#allocation17 + $0x5b4] ss:$8 sps:$4 sm:$0xff]  }
 0x6b6   :  { %8219 = vmatpush1.bf16.msra.mxu0 %v11088_v15  ;;  %v11163_v15 = vld [vmem:[#allocation17 + $0x5b0] ss:$8 sps:$4 sm:$0xff]  }
 0x6b7   :  { %8220 = vmatprep.subr.bf16.mxu0 %v11095_v9  ;;  %v11168_v9 = vld [vmem:[#allocation17 + $0x5c4] ss:$8 sps:$4 sm:$0xff]  }
 0x6b8   :  { %9461 = vmatpush3.bf16.msra.mxu1 %v11092_v13  ;;  %v11166_v13 = vld [vmem:[#allocation17 + $0x5c0] ss:$8 sps:$4 sm:$0xff]  }
 0x6b9   :  { %9462 = vmatprep.subr.bf16.mxu1 %v11096_v14  ;;  %v11171_v14 = vld [vmem:[#allocation17 + $0x5d4] ss:$8 sps:$4 sm:$0xff]  }
 0x6ba   :  { %8221 = vmatpush1.bf16.msra.mxu0 %v11093_v28  ;;  %v11169_v28 = vld [vmem:[#allocation17 + $0x5d0] ss:$8 sps:$4 sm:$0xff]  }
 0x6bb   :  { %8222 = vmatprep.subr.bf16.mxu0 %v11100_v62  ;;  %v11174_v62 = vld [vmem:[#allocation17 + $0x5e4] ss:$8 sps:$4 sm:$0xff]  }
 0x6bc   :  { %9463 = vmatpush3.bf16.msra.mxu1 %v11097_v30  ;;  %v11172_v30 = vld [vmem:[#allocation17 + $0x5e0] ss:$8 sps:$4 sm:$0xff]  }
 0x6bd   :  { %9561 = vmatprep.subr.bf16.mxu1 %v11516_v0 }
 0x6be   :  { %8223 = vmatpush1.bf16.msra.mxu0 %v11098_v16  ;;  %v11177_v16 = vld [vmem:[#allocation17 + $0x5f4] ss:$8 sps:$4 sm:$0xff]  }
 0x6bf   :  { %6645 = vmatmul.mubr.bf16.vlgmr.msra.gmra.mrb[28].mxu1 %v11781_v56  ;;  %8224 = vmatprep.subr.bf16.mxu0 %v11104_v29  ;;  %v11116_v56 = vld [vmem:[#allocation17 + $0x4c4] ss:$8 sps:$4 sm:$0xff]   ;;  %v11175_v29 = vld [vmem:[#allocation17 + $0x5f0] ss:$8 sps:$4 sm:$0xff]  }
 0x6c0   :  { %9562 = vmatpush3.bf16.msra.mxu1 %v11101_v57  ;;  %9577 = vmatprep.mubr.msk.bf16.mxu1 %vm11517_vm0, %v11516_v0  ;;  %v11180_v57 = vld [vmem:[#allocation17 + $0x604] ss:$8 sps:$4 sm:$0xff]  }
 0x6c1   :  { %9563 = vmatprep.subr.bf16.mxu1 %v11516_v0 }
 0x6c2   :  { %8225 = vmatpush1.bf16.msra.mxu0 %v11102_v17  ;;  %v1821_v17 = vrot.slane %v11896_v27, %v11761_v23  ;;  %v11181_v23 = vld [vmem:[#allocation17 + $0x610] ss:$8 sps:$4 sm:$0xff]  }
 0x6c3   :  { %8226 = vmatprep.subr.bf16.mxu0 %v11108_v31  ;;  %v1825_v31 = vrot.slane %v11896_v27, %v11769_v26  ;;  %v11186_v26 = vld [vmem:[#allocation17 + $0x624] ss:$8 sps:$4 sm:$0xff]  }
 0x6c4   :  { %9564 = vmatpush3.bf16.msra.mxu1 %v11105_v21 }
 0x6c5   :  { %9565 = vmatprep.subr.bf16.mxu1 %v11516_v0 }
 0x6c6   :  { %8227 = vmatpush1.bf16.msra.mxu0 %v11106_v8 }
 0x6c7   :  { %8228 = vmatprep.subr.bf16.mxu0 %v11112_v32 }
 0x6c8   :  { %9566 = vmatpush3.bf16.msra.mxu1 %v11109_v33 }
 0x6c9   :  { %9567 = vmatprep.subr.bf16.mxu1 %v11516_v0 }
 0x6ca   :  { %8229 = vmatpush1.bf16.msra.mxu0 %v11110_v36 }
 0x6cb   :  { %8230 = vmatprep.subr.bf16.mxu0 %v11116_v56 }
 0x6cc   :  { %9568 = vmatpush3.bf16.msra.mxu1 %v11113_v24 }
 0x6cd   :  { %9569 = vmatprep.subr.bf16.mxu1 %v11516_v0 }
 0x6ce   :  { %8231 = vmatpush1.bf16.msra.mxu0 %v11114_v37 }
 0x6cf   :  { %8232 = vmatprep.subr.bf16.mxu0 %v11120_v38 }
 0x6d0   :  { %9570 = vmatpush3.bf16.msra.mxu1 %v11117_v40 }
 0x6d1   :  { %9571 = vmatprep.subr.bf16.mxu1 %v11516_v0 }
 0x6d2   :  { %8233 = vmatpush1.bf16.msra.mxu0 %v11118_v41 }
 0x6d3   :  { %8234 = vmatprep.subr.bf16.mxu0 %v11124_v42 }
 0x6d4   :  { %9572 = vmatpush3.bf16.msra.mxu1 %v11121_v55 }
 0x6d5   :  { %9573 = vmatprep.subr.bf16.mxu1 %v11516_v0 }
 0x6d6   :  { %8235 = vmatpush1.bf16.msra.mxu0 %v11122_v44 }
 0x6d7   :  { %8236 = vmatprep.subr.bf16.mxu0 %v11128_v47  ;;  %v11178_v47 = vld [vmem:[#allocation17 + $0x600] ss:$8 sps:$4 sm:$0xff]  }
 0x6d8   :  { %9574 = vmatpush3.bf16.msra.mxu1 %v11125_v49  ;;  %v11183_v49 = vld [vmem:[#allocation17 + $0x614] ss:$8 sps:$4 sm:$0xff]  }
 0x6d9   :  { %9575 = vmatprep.subr.bf16.mxu1 %v11516_v0  ;;  %v11144_v0 = vld [vmem:[#allocation17 + $0x544] ss:$8 sps:$4 sm:$0xff]  }
 0x6da   :  { %8237 = vmatpush1.bf16.msra.mxu0 %v11126_v50  ;;  %v11184_v50 = vld [vmem:[#allocation17 + $0x620] ss:$8 sps:$4 sm:$0xff]  }
 0x6db   :  { %8249 = vmatprep.subr.bf16.mxu0 %v11132_v35  ;;  %v11189_v35 = vld [vmem:[#allocation17 + $0x634] ss:$8 sps:$4 sm:$0xff]  }
 0x6dc   :  { %9576 = vmatpush3.bf16.msra.mxu1 %v11129_v51  ;;  %v11187_v51 = vld [vmem:[#allocation17 + $0x630] ss:$8 sps:$4 sm:$0xff]  }
 0x6dd   :  { %8239 = vmatmul.mubr.bf16.vlgmr.msra.gmra.mrb[32].mxu0 %v11902_v63  ;;  %v11145_v63 = vld [vmem:[#allocation17 + $0x550] ss:$8 sps:$4 sm:$0xff]  }
 0x6de   :  { %8250 = vmatpush1.bf16.msra.mxu0 %v11130_v52  ;;  %v11192_v52 = vld [vmem:[#allocation17 + $0x644] ss:$8 sps:$4 sm:$0xff]  }
 0x6df   :  { %9578 = vmatmul.mubr.bf16.vlgmr.msra.gmra.mrb[32].mxu1 %v11805_v46  ;;  %8251 = vmatprep.subr.bf16.mxu0 %v11135_v53  ;;  %v11148_v46 = vld [vmem:[#allocation17 + $0x560] ss:$8 sps:$4 sm:$0xff]  }
 0x6e0   :  { %v11190_v53 = vld [vmem:[#allocation17 + $0x640] ss:$8 sps:$4 sm:$0xff]  }
 0x6e2   :  { %8252 = vmatpush1.bf16.msra.mxu0 %v11133_v54  ;;  %v11195_v54 = vld [vmem:[#allocation17 + $0x654] ss:$8 sps:$4 sm:$0xff]  }
 0x6e3   :  { %8253 = vmatprep.subr.bf16.mxu0 %v11138_v59  ;;  %v11193_v59 = vld [vmem:[#allocation17 + $0x650] ss:$8 sps:$4 sm:$0xff]  }
 0x6e6   :  { %8254 = vmatpush1.bf16.msra.mxu0 %v11136_v60  ;;  %v11198_v60 = vld [vmem:[#allocation17 + $0x664] ss:$8 sps:$4 sm:$0xff]  }
 0x6e7   :  { %8255 = vmatprep.subr.bf16.mxu0 %v11141_v45 }
 0x6ea   :  { %8256 = vmatpush1.bf16.msra.mxu0 %v11139_v20  ;;  %v11196_v20 = vld [vmem:[#allocation17 + $0x660] ss:$8 sps:$4 sm:$0xff]  }
 0x6eb   :  { %8257 = vmatprep.subr.bf16.mxu0 %v11144_v0 }
 0x6ee   :  { %8258 = vmatpush1.bf16.msra.mxu0 %v11142_v1  ;;  %v11201_v1 = vld [vmem:[#allocation17 + $0x674] ss:$8 sps:$4 sm:$0xff]  }
 0x6ef   :  { %8259 = vmatprep.subr.bf16.mxu0 %v11147_v2 }
 0x6f2   :  { %8260 = vmatpush1.bf16.msra.mxu0 %v11145_v63 }
 0x6f3   :  { %8261 = vmatprep.subr.bf16.mxu0 %v11150_v3 }
 0x6f6   :  { %8262 = vmatpush1.bf16.msra.mxu0 %v11148_v46 }
 0x6f7   :  { %8263 = vmatprep.subr.bf16.mxu0 %v11153_v4 }
 0x6fa   :  { %8264 = vmatpush1.bf16.msra.mxu0 %v11151_v58 }
 0x6fb   :  { %8265 = vmatprep.subr.bf16.mxu0 %v11156_v5 }
 0x6fe   :  { %8266 = vmatpush1.bf16.msra.mxu0 %v11154_v6  ;;  %v11199_v6 = vld [vmem:[#allocation17 + $0x670] ss:$8 sps:$4 sm:$0xff]  }
 0x6ff   :  { %8267 = vmatprep.subr.bf16.mxu0 %v11159_v10 }
 0x702   :  { %8268 = vmatpush1.bf16.msra.mxu0 %v11157_v19 }
 0x703   :  { %8269 = vmatprep.subr.bf16.mxu0 %v11162_v18 }
 0x706   :  { %8270 = vmatpush1.bf16.msra.mxu0 %v11160_v11 }
 0x707   :  { %8271 = vmatprep.subr.bf16.mxu0 %v11165_v12 }
 0x70a   :  { %8272 = vmatpush1.bf16.msra.mxu0 %v11163_v15 }
 0x70b   :  { %8273 = vmatprep.subr.bf16.mxu0 %v11168_v9 }
 0x70e   :  { %8274 = vmatpush1.bf16.msra.mxu0 %v11166_v13 }
 0x70f   :  { %8275 = vmatprep.subr.bf16.mxu0 %v11171_v14  ;;  %v6982_v14 = vld [vmem:[#allocation19] sm:$0x3] }
 0x712   :  { %8276 = vmatpush1.bf16.msra.mxu0 %v11169_v28  ;;  %v6987_v28 = vrot.slane %v6982_v14, %v11758_v22 }
 0x713   :  { %8277 = vmatprep.subr.bf16.mxu0 %v11174_v62  ;;  %v6991_v62 = vrot.slane %v6982_v14, %v11766_v25 }
 0x716   :  { %8278 = vmatpush1.bf16.msra.mxu0 %v11172_v30 }
 0x717   :  { %8279 = vmatprep.subr.bf16.mxu0 %v11177_v16 }
 0x71a   :  { %8280 = vmatpush1.bf16.msra.mxu0 %v11175_v29 }
 0x71b   :  { %8292 = vmatprep.subr.bf16.mxu0 %v11180_v57 }
 0x772   :  { %v6562_v21 = vpop.f32.mrb[24].mxu1 }
 0x773   :  { %v9605_v8 = vadd.f32 %v6562_v21, %v1821_v17  ;;  %v6564_v32 = vpop.f32.mrb[25].mxu1 }
 0x774   :  { %v9606_v33 = vadd.f32 %v6564_v32, %v1825_v31  ;;  %v6566_v36 = vpop.f32.mrb[26].mxu1 }
 0x775   :  { %v9607_v56 = vadd.f32 %v6566_v36, %v1821_v17  ;;  %v6568_v24 = vpop.f32.mrb[27].mxu1  ;;  %v6745_v38 = vmax.f32 %v9605_v8, 0.0 }
 0x776   :  { %v9608_v37 = vadd.f32 %v6568_v24, %v1825_v31  ;;  %v6746_v41 = vmax.f32 %v9606_v33, 0.0 }
 0x777   :  { %v6758_v40 = vmax.f32 %v9607_v56, 0.0 }
 0x778   :  { %v6759_v42 = vmax.f32 %v9608_v37, 0.0 }
 0x779   :  { %v6771_v55 = vpack.c.bf16 %v6758_v40, %v6745_v38 }
 0x77a   :  { %v6772_v44 = vpack.c.bf16 %v6759_v42, %v6746_v41 }
 0x77c   :  { %8281 = vmatprep.mubr.bf16.mxu0 %v6772_v44 }
 0x77d   :  { %8282 = vmatmul.mubr.bf16.vlgmr.msra.gmra.mrb[32].mxu0 %v6771_v55 }
 0x77e   :  { %8293 = vmatpush1.bf16.msra.mxu0 %v11178_v47  ;;  %8324 = vmatprep.mubr.bf16.mxu0 %v11518_v61  ;;  %v1829_v61 = vrot.slane %v11896_v27, %v11791_v7 }
 0x77f   :  { %8294 = vmatprep.subr.bf16.mxu0 %v11183_v49 }
 0x780   :  { %v6606_v2 = vadd.f32 %v11908_v39, %v1829_v61  ;;  %v6609_v4 = vadd.f32 %v11910_v43, %v1829_v61 }
 0x782   :  { %8295 = vmatpush1.bf16.msra.mxu0 %v11181_v23 }
 0x783   :  { %8296 = vmatprep.subr.bf16.mxu0 %v11186_v26 }
 0x786   :  { %8297 = vmatpush1.bf16.msra.mxu0 %v11184_v50 }
 0x787   :  { %8298 = vmatprep.subr.bf16.mxu0 %v11189_v35 }
 0x78a   :  { %8299 = vmatpush1.bf16.msra.mxu0 %v11187_v51 }
 0x78b   :  { %8300 = vmatprep.subr.bf16.mxu0 %v11192_v52 }
 0x78e   :  { %8301 = vmatpush1.bf16.msra.mxu0 %v11190_v53 }
 0x78f   :  { %8302 = vmatprep.subr.bf16.mxu0 %v11195_v54 }
 0x792   :  { %v9464_v45 = vpop.f32.mrb[28].mxu1  ;;  %8303 = vmatpush1.bf16.msra.mxu0 %v11193_v59 }
 0x793   :  { %v9465_v0 = vpop.f32.mrb[29].mxu1  ;;  %8304 = vmatprep.subr.bf16.mxu0 %v11198_v60 }
 0x794   :  { %v9466_v63 = vadd.f32 %v9465_v0, %v9464_v45  ;;  %v9467_v3 = vpop.f32.mrb[30].mxu1 }
 0x795   :  { %v9468_v46 = vpop.f32.mrb[31].mxu1 }
 0x796   :  { %v6647_v58 = vadd.f32 %v9466_v63, %v6606_v2  ;;  %v9469_v5 = vadd.f32 %v9468_v46, %v9467_v3  ;;  %8305 = vmatpush1.bf16.msra.mxu0 %v11196_v20 }
 0x797   :  { %8306 = vmatprep.subr.bf16.mxu0 %v11201_v1 }
 0x798   :  { %v6650_v10 = vadd.f32 %v9469_v5, %v6609_v4  ;;  %v6688_v7 = vadd.f32 %v11913_v48, %v6647_v58 }
 0x79a   :  { %v6691_v27 = vadd.f32 %v11915_v34, %v6650_v10  ;;  %8307 = vmatpush1.bf16.msra.mxu0 %v11199_v6 }
 0x7b2   :  { %v6728_v19 = vpop.f32.mrb[32].mxu1 }
 0x7b3   :  { %v6729_v18 = vadd.f32 %v6728_v19, %v6688_v7  ;;  %v9579_v11 = vpop.f32.mrb[33].mxu1 }
 0x7b4   :  { %v6731_v39 = vpop.f32.mrb[34].mxu1 }
 0x7b5   :  { %v6732_v12 = vadd.f32 %v6731_v39, %v6691_v27  ;;  %v9580_v15 = vpop.f32.mrb[35].mxu1  ;;  %v6747_v9 = vmax.f32 %v6729_v18, 0.0 }
 0x7b7   :  { %v6760_v13 = vmax.f32 %v6732_v12, 0.0 }
 0x7b9   :  { %v6773_v43 = vpack.c.bf16 %v6760_v13, %v6747_v9 }
 0x7bb   :  { %8325 = vmatmul.mubr.bf16.vlgmr.msra.gmra.mrb[32].mxu0 %v6773_v43 }
 0x88e   :  { %v8326_v30 = vpop.f32.mrb[32].mxu0 }
 0x88f   :  { %v9609_v48 = vadd.f32 %v8326_v30, %v6987_v28  ;;  %v8328_v16 = vpop.f32.mrb[33].mxu0 }
 0x890   :  { %v9610_v34 = vadd.f32 %v8328_v16, %v6991_v62  ;;  %v8330_v29 = vpop.f32.mrb[34].mxu0 }
 0x891   :  { %v9395_v57 = vmul.f32 -1.442695, %v9609_v48  ;;  %v9611_v17 = vadd.f32 %v8330_v29, %v6987_v28  ;;  %v8332_v31 = vpop.f32.mrb[35].mxu0 }
 0x892   :  { %v9396_v21 = vmul.f32 -1.442695, %v9610_v34  ;;  %v9612_v8 = vadd.f32 %v8332_v31, %v6991_v62 }
 0x893   :  { %11202 = vpow2.f32 %v9395_v57  ;;  %v9397_v32 = vmul.f32 -1.442695, %v9611_v17 }
 0x894   :  { %11204 = vpow2.f32 %v9396_v21  ;;  %v9398_v33 = vmul.f32 -1.442695, %v9612_v8 }
 0x895   :  { %11206 = vpow2.f32 %v9397_v32 }
 0x896   :  { %11208 = vpow2.f32 %v9398_v33 }
 0x89d   :  { %v11203_v36 = vpop.eup %11202 }
 0x89e   :  { %v11205_v22 = vpop.eup %11204  ;;  %v8347_v56 = vadd.f32 1.0, %v11203_v36 }
 0x89f   :  { %v11207_v25 = vpop.eup %11206  ;;  %v8348_v24 = vadd.f32 1.0, %v11205_v22 }
 0x8a0   :  { %v11209_v37 = vpop.eup %11208  ;;  %11210 = vrcp.f32 %v8347_v56  ;;  %v8349_v38 = vadd.f32 1.0, %v11207_v25 }
 0x8a1   :  { %11212 = vrcp.f32 %v8348_v24  ;;  %v8350_v40 = vadd.f32 1.0, %v11209_v37 }
 0x8a2   :  { %11214 = vrcp.f32 %v8349_v38 }
 0x8a3   :  { %11216 = vrcp.f32 %v8350_v40 }
 0x8aa   :  { %v11211_v41 = vpop.eup %11210 }
 0x8ab   :  { %v11213_v42 = vpop.eup %11212  ;;  %8359 = vst [vmem:[#allocation20] sm:$0xff] %v11211_v41 }
 0x8ac   :  { %v11215_v55 = vpop.eup %11214  ;;  %8360 = vst [vmem:[#allocation20 + $0x8] sm:$0xff] %v11213_v42 }
 0x8ad   :  { %v11217_v44 = vpop.eup %11216  ;;  %8361 = vst [vmem:[#allocation20 + $0x10] sm:$0xff] %v11215_v55 }
 0x8ae   :  { %8362 = vst [vmem:[#allocation20 + $0x18] sm:$0xff] %v11217_v44 }
 0x8af   :  { %11472 = shalt.err (!%p11469_p8)
}
 0x8b0   :  { %s11473_s17 = scalar_lea.hbm %s11974_s11, 512 }
 0x8b1   :  { %p11474_p9 = scmp.ne.s32.totalorder %s11974_s11, %s11473_s17  ;;  %p11477_p10 = scmp.lt.u32.totalorder %s11473_s17, %s11974_s11 }
 0x8b3   :  { %p11479_p11 = pnand %p11477_p10, %p11474_p9 }
 0x8b5   :  { %11482 = shalt.err (!%p11479_p11)
}
 0x8b6   :  { %s11520_s26 = smov 256   ;;  %s11521_s5 = smov 16  }
 0x8b7   :  { %8374 = dma.vmem_to_hbm [thread:$0]  %s8369_s18, 512, %s11974_s11, [#allocation4], %s11520_s26, %s11520_s26, %s11521_s5  }
 0x8b8   :  { %11495 = dma.done.wait [#allocation4], 512  }
 0x8b9   :  { %11496 = vsyncadd [#allocation4], 4294966784 }
 0x8ba   :  { %8378 = vsyncpa [#allocation3], 1 }
 0x8bb   :  { %8379 = vsyncpa [#allocation6], 1 }
 0x8bc   :  { %8380 = vsyncpa [#allocation9], 1 }
 0x8bd   :  { %8381 = vsyncpa [#allocation12], 1 }
 0x8be   :  { %8382 = vsyncpa [#allocation15], 1 }
 0x8bf   :  { %8383 = vsyncpa [#allocation18], 1 }
 0x8c0   :  { %8384 = vsyncpa [#allocation4], 1 }

</bundles_post_ra>
